<compile_context>
chip_gen: v5e
topology: v5e:2x2
jax: 0.10.0
libtpu: 0.0.40
codegen_flags: <defaults>
</compile_context>

<pallas_src>
import functools

import jax
import jax.numpy as jnp
from jax.experimental import pallas as pl
from jax.experimental.pallas import tpu as pltpu


def _default_block_target():
    """256 tiles on v6e/v7x (2x256x256 MXU), 128 elsewhere (v5e / unknown / CPU)."""
    try:
        kind = jax.devices()[0].device_kind.lower()
    except Exception:  # pragma: no cover - defensive
        return 128
    if "v6" in kind or "v7" in kind:
        return 256
    return 128


def _pick_block(t, target):
    """Largest multiple-of-8 tile <= target that divides t (falls back to t)."""
    if t % target == 0:
        return target
    cand = (min(target, t) // 8) * 8
    while cand >= 8:
        if t % cand == 0:
            return cand
        cand -= 8
    return t


def _mha_flash_kernel(x_ref, wq_ref, wkv_ref, wp_ref, bp_ref, out_ref,
                      q_s, kv_s, m_s, l_s, acc_s, o_s,
                      *, num_heads, head_size, block_q, block_k,
                      mxu_precision, approx_reciprocal):
    H, hs = num_heads, head_size
    C = H * hs
    qi = pl.program_id(1)
    ki = pl.program_id(2)
    scale = 1.0 / (float(hs) ** 0.5)
    NEG = -1e30  # finite mask value: never yields NaN even under tiling/padding

    def _attend(kv, masked):
        # kv: (block_k, 2C) in compute dtype; online-softmax update of (m, l, acc).
        q_all = q_s[...]
        if masked:
            # Diagonal tile only: purely local mask (valid because block_q == block_k).
            row = jax.lax.broadcasted_iota(jnp.int32, (block_q, block_k), 0)
            col = jax.lax.broadcasted_iota(jnp.int32, (block_q, block_k), 1)
            causal = col <= row
        # Static unroll over heads.  TODO(synk): at H>=12 with 256 tiles check the
        # bundle dump for spills; a fori_loop with pl.ds lane slices is the fallback.
        for h in range(H):
            q_h = q_all[:, h * hs:(h + 1) * hs]          # (bq, hs) static lane slice
            k_h = kv[:, h * hs:(h + 1) * hs]             # (bk, hs)
            v_h = kv[:, C + h * hs:C + (h + 1) * hs]     # (bk, hs)
            # q k^T via dot_general on the last dims (no .T relayout through the XLU).
            s = jax.lax.dot_general(q_h, k_h, (((1,), (1,)), ((), ())),
                                    preferred_element_type=jnp.float32,
                                    precision=mxu_precision)
            if masked:
                s = jnp.where(causal, s, NEG)
            m_prev = m_s[h]                                           # (bq, 1)
            m_new = jnp.maximum(m_prev, jnp.max(s, axis=-1, keepdims=True))
            alpha = jnp.exp(m_prev - m_new)
            p = jnp.exp(s - m_new)                                    # f32 (bq, bk)
            l_s[h] = alpha * l_s[h] + jnp.sum(p, axis=-1, keepdims=True)
            acc_s[h] = alpha * acc_s[h] + jnp.dot(
                p.astype(kv.dtype), v_h,
                preferred_element_type=jnp.float32, precision=mxu_precision)
            m_s[h] = m_new

    @pl.when(ki == 0)
    def _init():
        # Fused, lane-dense Q projection for this q tile: (bq, C) @ (C, C).
        q = jnp.dot(x_ref[0], wq_ref[...], preferred_element_type=jnp.float32,
                    precision=mxu_precision)
        q_s[...] = (q * scale).astype(q_s.dtype)   # fold 1/sqrt(hs) into q once
        m_s[...] = jnp.full(m_s.shape, -jnp.inf, m_s.dtype)
        l_s[...] = jnp.zeros(l_s.shape, l_s.dtype)
        acc_s[...] = jnp.zeros(acc_s.shape, acc_s.dtype)

    @pl.when(ki < qi)
    def _off_diagonal():
        # KV tile already projected (at qi' == ki earlier for this batch element):
        # read it from the persistent VMEM cache; no mask work, no x_kv DMA.
        start = pl.multiple_of(ki * block_k, block_k)
        _attend(kv_s[pl.ds(start, block_k), :], masked=False)

    @pl.when(ki == qi)
    def _diagonal_and_finalize():
        # First (and only) visit of kv tile `ki` for this batch element:
        # fused, lane-dense K/V projection (bq, C) @ (C, 2C), cached for later q tiles.
        kv = jnp.dot(x_ref[0], wkv_ref[...], preferred_element_type=jnp.float32,
                     precision=mxu_precision).astype(kv_s.dtype)
        start = pl.multiple_of(ki * block_k, block_k)
        kv_s[pl.ds(start, block_k), :] = kv
        _attend(kv, masked=True)

        # Finalize this q tile: normalize heads into a lane-dense (bq, C) slab, then
        # ONE full-depth (bq, C) @ (C, C) output projection + bias.
        for h in range(H):
            if approx_reciprocal:
                inv_l = pl.reciprocal(l_s[h], approx=True)   # EUP vrcp (~1e-3 rel err)
            else:
                inv_l = 1.0 / l_s[h]                          # exact
            o_s[:, h * hs:(h + 1) * hs] = (acc_s[h] * inv_l).astype(o_s.dtype)
        proj = jnp.dot(o_s[...], wp_ref[...], preferred_element_type=jnp.float32,
                       precision=mxu_precision)
        out_ref[0] = (proj + bp_ref[...]).astype(out_ref.dtype)


def multi_head_attention(x, wq, wk, wv, wp, bp, *, num_heads, head_size,
                         block_q=None, block_k=None,
                         compute_dtype=jnp.bfloat16,
                         out_dtype=None,
                         approx_reciprocal=False,
                         vmem_limit_bytes=48 * 1024 * 1024):
    B, T, C = x.shape
    assert C == num_heads * head_size
    out_dtype = x.dtype if out_dtype is None else jnp.dtype(out_dtype)

    target = _default_block_target()
    bq = block_q if block_q is not None else _pick_block(T, target)
    bk = block_k if block_k is not None else bq
    assert bq == bk, "bq == bk keeps the causal tile-skip / local-mask logic valid"
    assert T % bq == 0

    # Exact-f32 MXU emulation only on the f32 verification path; bf16 runs native.
    mxu_precision = (jax.lax.Precision.HIGHEST
                     if jnp.dtype(compute_dtype) == jnp.dtype(jnp.float32) else None)

    # ---- one-time weight packing on the XLA side (not in the kernel) ----
    # Per-head (H, C, hs) -> lane-packed (C, H*hs); k/v fused so the kernel issues one
    # (bq,C)@(C,C) Q matmul and one (bk,C)@(C,2C) KV matmul per tile (per first visit).
    wq_cat = jnp.transpose(wq, (1, 0, 2)).reshape(C, C).astype(compute_dtype)
    wk_cat = jnp.transpose(wk, (1, 0, 2)).reshape(C, C)
    wv_cat = jnp.transpose(wv, (1, 0, 2)).reshape(C, C)
    wkv_cat = jnp.concatenate([wk_cat, wv_cat], axis=1).astype(compute_dtype)  # (C,2C)
    wp_c = wp.astype(compute_dtype)                                            # (C, C)
    bp_f32 = bp.reshape(1, C).astype(jnp.float32)
    x_c = x.astype(compute_dtype)

    grid = (B, T // bq, T // bk)
    kernel = functools.partial(
        _mha_flash_kernel, num_heads=num_heads, head_size=head_size,
        block_q=bq, block_k=bk, mxu_precision=mxu_precision,
        approx_reciprocal=approx_reciprocal)

    return pl.pallas_call(
        kernel,
        out_shape=jax.ShapeDtypeStruct((B, T, C), out_dtype),
        grid=grid,
        in_specs=[
            pl.BlockSpec((1, bq, C), lambda b, q, k: (b, q, 0)),   # x rows for q tile
            pl.BlockSpec((C, C), lambda b, q, k: (0, 0)),          # fused Wq     (C, C)
            pl.BlockSpec((C, 2 * C), lambda b, q, k: (0, 0)),      # fused [Wk|Wv](C,2C)
            pl.BlockSpec((C, C), lambda b, q, k: (0, 0)),          # output proj  (C, C)
            pl.BlockSpec((1, C), lambda b, q, k: (0, 0)),          # output bias
        ],
        out_specs=pl.BlockSpec((1, bq, C), lambda b, q, k: (b, q, 0)),
        scratch_shapes=[
            pltpu.VMEM((bq, C), compute_dtype),                    # q tile (scaled)
            pltpu.VMEM((T, 2 * C), compute_dtype),                 # per-batch KV cache
            # TODO(synk): m/l lane-pad 1->128; store as (H,bq) if VMEM is tight on v7x.
            pltpu.VMEM((num_heads, bq, 1), jnp.float32),           # running max  m
            pltpu.VMEM((num_heads, bq, 1), jnp.float32),           # running sum  l
            pltpu.VMEM((num_heads, bq, head_size), jnp.float32),   # running numerator
            pltpu.VMEM((bq, C), compute_dtype),                    # lane-dense head out
        ],
        compiler_params=pltpu.CompilerParams(
            # q axis must be "arbitrary": the KV cache carries state across q tiles.
            dimension_semantics=("parallel", "arbitrary", "arbitrary"),
            vmem_limit_bytes=vmem_limit_bytes,
        ),
    )(x_c, wq_cat, wkv_cat, wp_c, bp_f32)


def _reference(x, wq, wk, wv, wp, bp, *, head_size):
    # Pure-JAX f32 reference mirroring the PyTorch forward (eval mode).
    # HIGHEST precision so the reference is accurate regardless of backend defaults.
    B, T, C = x.shape
    hp = jax.lax.Precision.HIGHEST
    scale = 1.0 / (float(head_size) ** 0.5)
    mask = jnp.tril(jnp.ones((T, T), dtype=bool))
    outs = []
    for h in range(wq.shape[0]):
        q = jnp.einsum("btc,cd->btd", x, wq[h], precision=hp)
        k = jnp.einsum("btc,cd->btd", x, wk[h], precision=hp)
        v = jnp.einsum("btc,cd->btd", x, wv[h], precision=hp)
        s = jnp.einsum("btd,bsd->bts", q, k, precision=hp) * scale
        s = jnp.where(mask[None], s, -jnp.inf)
        p = jax.nn.softmax(s, axis=-1)
        outs.append(jnp.einsum("bts,bsd->btd", p, v, precision=hp))
    concat = jnp.concatenate(outs, axis=-1)
    return jnp.einsum("btc,cd->btd", concat, wp, precision=hp) + bp[0]


if __name__ == "__main__":
    # Small shapes consistent with the module: n_embeddings = num_heads * head_size.
    B, T = 2, 16
    num_heads, head_size = 4, 8
    C = num_heads * head_size            # n_embeddings = 32

    key = jax.random.PRNGKey(0)
    k_x, k_q, k_k, k_v, k_p, k_b = jax.random.split(key, 6)
    x = jax.random.normal(k_x, (B, T, C), dtype=jnp.float32)
    wq = jax.random.normal(k_q, (num_heads, C, head_size), dtype=jnp.float32) * 0.1
    wk = jax.random.normal(k_k, (num_heads, C, head_size), dtype=jnp.float32) * 0.1
    wv = jax.random.normal(k_v, (num_heads, C, head_size), dtype=jnp.float32) * 0.1
    wp = jax.random.normal(k_p, (C, C), dtype=jnp.float32) * 0.1
    bp = jax.random.normal(k_b, (1, C), dtype=jnp.float32) * 0.1

    ref = _reference(x, wq, wk, wv, wp, bp, head_size=head_size)

    # f32 operands, explicit 8x8 tiles -> grid (B, 2, 2): exercises the KV-cache reuse,
    # the unmasked off-diagonal path, the local diagonal mask, and the online-softmax
    # rescale.  Exact reciprocal + HIGHEST precision -> tight check.
    out_f32 = multi_head_attention(x, wq, wk, wv, wp, bp, num_heads=num_heads,
                                   head_size=head_size, block_q=8, block_k=8,
                                   compute_dtype=jnp.float32)
    out_f32 = jax.block_until_ready(out_f32)
    assert out_f32.shape == (B, T, C)
    assert jnp.allclose(out_f32, ref, atol=2e-4, rtol=2e-4), "f32 mismatch vs reference"

    # Default perf path: bf16 MXU operands, auto-picked tile; looser tolerance.
    out_bf16 = multi_head_attention(x, wq, wk, wv, wp, bp, num_heads=num_heads,
                                    head_size=head_size)   # compute_dtype=bf16
    out_bf16 = jax.block_until_ready(out_bf16)
    assert out_bf16.shape == (B, T, C)
    assert jnp.allclose(out_bf16, ref, atol=5e-2, rtol=5e-2), "bf16 mismatch vs reference"

    print("KERNEL_OK")
</pallas_src>

<mosaic_0001>
module attributes {stable_mosaic.version = 11 : i64} {
  func.func @_mha_flash_kernel(%arg0: i32, %arg1: i32, %arg2: i32, %arg3: memref<1x8x32xf32, #tpu.memory_space<vmem>>, %arg4: memref<32x32xf32, #tpu.memory_space<vmem>>, %arg5: memref<32x64xf32, #tpu.memory_space<vmem>>, %arg6: memref<32x32xf32, #tpu.memory_space<vmem>>, %arg7: memref<1x32xf32, #tpu.memory_space<vmem>>, %arg8: memref<1x8x32xf32, #tpu.memory_space<vmem>>, %arg9: memref<8x32xf32, #tpu.memory_space<vmem>>, %arg10: memref<16x64xf32, #tpu.memory_space<vmem>>, %arg11: memref<4x8x1xf32, #tpu.memory_space<vmem>>, %arg12: memref<4x8x1xf32, #tpu.memory_space<vmem>>, %arg13: memref<4x8x8xf32, #tpu.memory_space<vmem>>, %arg14: memref<8x32xf32, #tpu.memory_space<vmem>>) attributes {dimension_semantics = [#tpu.dimension_semantics<parallel>, #tpu.dimension_semantics<arbitrary>, #tpu.dimension_semantics<arbitrary>], iteration_bounds = array<i64: 2, 2, 2>, scalar_prefetch = 0 : i64, scratch_operands = 6 : i64, tpu.core_type = #tpu.core_type<tc>, window_params = [{transform_indices = @transform_0, window_bounds = array<i64: 1, 8, 32>}, {pipeline_mode = #tpu.pipeline_mode<synchronous>, transform_indices = @transform_1, window_bounds = array<i64: 32, 32>}, {pipeline_mode = #tpu.pipeline_mode<synchronous>, transform_indices = @transform_2, window_bounds = array<i64: 32, 64>}, {pipeline_mode = #tpu.pipeline_mode<synchronous>, transform_indices = @transform_3, window_bounds = array<i64: 32, 32>}, {pipeline_mode = #tpu.pipeline_mode<synchronous>, transform_indices = @transform_4, window_bounds = array<i64: 1, 32>}, {transform_indices = @transform_5, window_bounds = array<i64: 1, 8, 32>}]} {
    %c0_i32 = arith.constant 0 : i32
    %0 = arith.cmpi eq, %arg2, %c0_i32 : i32
    %1 = arith.extui %0 : i1 to i32
    %c0_i32_0 = arith.constant 0 : i32
    %2 = arith.cmpi ne, %1, %c0_i32_0 : i32
    scf.if %2 {
      %c0 = arith.constant 0 : index
      %c0_3 = arith.constant 0 : index
      %c0_4 = arith.constant 0 : index
      %9 = vector.load %arg3[%c0, %c0_3, %c0_4] : memref<1x8x32xf32, #tpu.memory_space<vmem>>, vector<1x8x32xf32>
      %10 = vector.shape_cast %9 : vector<1x8x32xf32> to vector<8x32xf32>
      %c0_5 = arith.constant 0 : index
      %c0_6 = arith.constant 0 : index
      %11 = vector.load %arg4[%c0_5, %c0_6] : memref<32x32xf32, #tpu.memory_space<vmem>>, vector<32x32xf32>
      %cst = arith.constant dense<0.000000e+00> : vector<8x32xf32>
      %12 = tpu.matmul %10, %11, %cst {dimension_numbers = #tpu.dot_dimension_numbers<[1], [0], [0], [1], [0, 0, 1, 1], [], []>, precision = #tpu.contract_precision<fp32>} : vector<8x32xf32>, vector<32x32xf32>, vector<8x32xf32> -> vector<8x32xf32>
      %cst_7 = arith.constant 0.353553385 : f32
      %13 = vector.broadcast %cst_7 : f32 to vector<8x32xf32>
      %14 = arith.mulf %12, %13 : vector<8x32xf32>
      %c0_8 = arith.constant 0 : index
      %c0_9 = arith.constant 0 : index
      %15 = vector.load %arg9[%c0_8, %c0_9] : memref<8x32xf32, #tpu.memory_space<vmem>>, vector<8x32xf32>
      tpu.vector_store %arg9[%c0_8, %c0_9], %14 {strides = array<i32>} : memref<8x32xf32, #tpu.memory_space<vmem>>, vector<8x32xf32>,
      %cst_10 = arith.constant 0xFF800000 : f32
      %16 = vector.broadcast %cst_10 : f32 to vector<4x8x1xf32>
      %c0_11 = arith.constant 0 : index
      %c0_12 = arith.constant 0 : index
      %c0_13 = arith.constant 0 : index
      %17 = vector.load %arg11[%c0_11, %c0_12, %c0_13] : memref<4x8x1xf32, #tpu.memory_space<vmem>>, vector<4x8x1xf32>
      tpu.vector_store %arg11[%c0_11, %c0_12, %c0_13], %16 {strides = array<i32>} : memref<4x8x1xf32, #tpu.memory_space<vmem>>, vector<4x8x1xf32>,
      %cst_14 = arith.constant 0.000000e+00 : f32
      %18 = vector.broadcast %cst_14 : f32 to vector<4x8x1xf32>
      %c0_15 = arith.constant 0 : index
      %c0_16 = arith.constant 0 : index
      %c0_17 = arith.constant 0 : index
      %19 = vector.load %arg12[%c0_15, %c0_16, %c0_17] : memref<4x8x1xf32, #tpu.memory_space<vmem>>, vector<4x8x1xf32>
      tpu.vector_store %arg12[%c0_15, %c0_16, %c0_17], %18 {strides = array<i32>} : memref<4x8x1xf32, #tpu.memory_space<vmem>>, vector<4x8x1xf32>,
      %cst_18 = arith.constant 0.000000e+00 : f32
      %20 = vector.broadcast %cst_18 : f32 to vector<4x8x8xf32>
      %c0_19 = arith.constant 0 : index
      %c0_20 = arith.constant 0 : index
      %c0_21 = arith.constant 0 : index
      %21 = vector.load %arg13[%c0_19, %c0_20, %c0_21] : memref<4x8x8xf32, #tpu.memory_space<vmem>>, vector<4x8x8xf32>
      tpu.vector_store %arg13[%c0_19, %c0_20, %c0_21], %20 {strides = array<i32>} : memref<4x8x8xf32, #tpu.memory_space<vmem>>, vector<4x8x8xf32>,
    } else {
    }
    %3 = arith.cmpi slt, %arg2, %arg1 : i32
    %4 = arith.extui %3 : i1 to i32
    %c0_i32_1 = arith.constant 0 : i32
    %5 = arith.cmpi ne, %4, %c0_i32_1 : i32
    scf.if %5 {
      %c8_i32 = arith.constant 8 : i32
      %9 = arith.muli %arg2, %c8_i32 : i32
      %10 = tpu.assume_multiple %9, 8 : i32
      %11 = arith.index_cast %10 : i32 to index
      %c0 = arith.constant 0 : index
      %12 = vector.load %arg10[%11, %c0] : memref<16x64xf32, #tpu.memory_space<vmem>>, vector<8x64xf32>
      %c0_3 = arith.constant 0 : index
      %c0_4 = arith.constant 0 : index
      %13 = vector.load %arg9[%c0_3, %c0_4] : memref<8x32xf32, #tpu.memory_space<vmem>>, vector<8x32xf32>
      %14 = vector.extract_strided_slice %13 {offsets = [0, 0], sizes = [8, 8], strides = [1, 1]} : vector<8x32xf32> to vector<8x8xf32>
      %15 = vector.extract_strided_slice %12 {offsets = [0, 0], sizes = [8, 8], strides = [1, 1]} : vector<8x64xf32> to vector<8x8xf32>
      %16 = vector.extract_strided_slice %12 {offsets = [0, 32], sizes = [8, 8], strides = [1, 1]} : vector<8x64xf32> to vector<8x8xf32>
      %cst = arith.constant dense<0.000000e+00> : vector<8x8xf32>
      %17 = tpu.matmul %14, %15, %cst {dimension_numbers = #tpu.dot_dimension_numbers<[1], [1], [0], [0], [0, 0, 1, 0], [], []>, precision = #tpu.contract_precision<fp32>} : vector<8x8xf32>, vector<8x8xf32>, vector<8x8xf32> -> vector<8x8xf32>
      %c0_5 = arith.constant 0 : index
      %c0_6 = arith.constant 0 : index
      %c0_7 = arith.constant 0 : index
      %18 = vector.load %arg11[%c0_5, %c0_6, %c0_7] : memref<4x8x1xf32, #tpu.memory_space<vmem>>, vector<1x8x1xf32>
      %19 = vector.shape_cast %18 : vector<1x8x1xf32> to vector<8x1xf32>
      %cst_8 = arith.constant dense<0xFF800000> : vector<8xf32>
      %20 = vector.multi_reduction <maximumf>, %17, %cst_8 [1] : vector<8x8xf32> to vector<8xf32>
      %21 = vector.shape_cast %20 : vector<8xf32> to vector<8x1xf32>
      %22 = arith.maximumf %19, %21 : vector<8x1xf32>
      %23 = arith.subf %19, %22 : vector<8x1xf32>
      %24 = math.exp %23 : vector<8x1xf32>
      %25 = vector.broadcast %22 : vector<8x1xf32> to vector<8x8xf32>
      %26 = arith.subf %17, %25 : vector<8x8xf32>
      %27 = math.exp %26 : vector<8x8xf32>
      %c0_9 = arith.constant 0 : index
      %c0_10 = arith.constant 0 : index
      %c0_11 = arith.constant 0 : index
      %28 = vector.load %arg12[%c0_9, %c0_10, %c0_11] : memref<4x8x1xf32, #tpu.memory_space<vmem>>, vector<1x8x1xf32>
      %29 = vector.shape_cast %28 : vector<1x8x1xf32> to vector<8x1xf32>
      %30 = arith.mulf %24, %29 : vector<8x1xf32>
      %cst_12 = arith.constant dense<0.000000e+00> : vector<8xf32>
      %31 = vector.multi_reduction <add>, %27, %cst_12 [1] : vector<8x8xf32> to vector<8xf32>
      %32 = vector.shape_cast %31 : vector<8xf32> to vector<8x1xf32>
      %33 = arith.addf %30, %32 : vector<8x1xf32>
      %c0_13 = arith.constant 0 : index
      %c0_14 = arith.constant 0 : index
      %c0_15 = arith.constant 0 : index
      %34 = vector.load %arg12[%c0_13, %c0_14, %c0_15] : memref<4x8x1xf32, #tpu.memory_space<vmem>>, vector<1x8x1xf32>
      %35 = vector.shape_cast %34 : vector<1x8x1xf32> to vector<8x1xf32>
      %36 = vector.shape_cast %33 : vector<8x1xf32> to vector<1x8x1xf32>
      tpu.vector_store %arg12[%c0_13, %c0_14, %c0_15], %36 {strides = array<i32>} : memref<4x8x1xf32, #tpu.memory_space<vmem>>, vector<1x8x1xf32>,
      %c0_16 = arith.constant 0 : index
      %c0_17 = arith.constant 0 : index
      %c0_18 = arith.constant 0 : index
      %37 = vector.load %arg13[%c0_16, %c0_17, %c0_18] : memref<4x8x8xf32, #tpu.memory_space<vmem>>, vector<1x8x8xf32>
      %38 = vector.shape_cast %37 : vector<1x8x8xf32> to vector<8x8xf32>
      %39 = vector.broadcast %24 : vector<8x1xf32> to vector<8x8xf32>
      %40 = arith.mulf %39, %38 : vector<8x8xf32>
      %cst_19 = arith.constant dense<0.000000e+00> : vector<8x8xf32>
      %41 = tpu.matmul %27, %16, %cst_19 {dimension_numbers = #tpu.dot_dimension_numbers<[1], [0], [0], [1], [0, 0, 1, 1], [], []>, precision = #tpu.contract_precision<fp32>} : vector<8x8xf32>, vector<8x8xf32>, vector<8x8xf32> -> vector<8x8xf32>
      %42 = arith.addf %40, %41 : vector<8x8xf32>
      %c0_20 = arith.constant 0 : index
      %c0_21 = arith.constant 0 : index
      %c0_22 = arith.constant 0 : index
      %43 = vector.load %arg13[%c0_20, %c0_21, %c0_22] : memref<4x8x8xf32, #tpu.memory_space<vmem>>, vector<1x8x8xf32>
      %44 = vector.shape_cast %43 : vector<1x8x8xf32> to vector<8x8xf32>
      %45 = vector.shape_cast %42 : vector<8x8xf32> to vector<1x8x8xf32>
      tpu.vector_store %arg13[%c0_20, %c0_21, %c0_22], %45 {strides = array<i32>} : memref<4x8x8xf32, #tpu.memory_space<vmem>>, vector<1x8x8xf32>,
      %c0_23 = arith.constant 0 : index
      %c0_24 = arith.constant 0 : index
      %c0_25 = arith.constant 0 : index
      %46 = vector.load %arg11[%c0_23, %c0_24, %c0_25] : memref<4x8x1xf32, #tpu.memory_space<vmem>>, vector<1x8x1xf32>
      %47 = vector.shape_cast %46 : vector<1x8x1xf32> to vector<8x1xf32>
      %48 = vector.shape_cast %22 : vector<8x1xf32> to vector<1x8x1xf32>
      tpu.vector_store %arg11[%c0_23, %c0_24, %c0_25], %48 {strides = array<i32>} : memref<4x8x1xf32, #tpu.memory_space<vmem>>, vector<1x8x1xf32>,
      %49 = vector.extract_strided_slice %13 {offsets = [0, 8], sizes = [8, 8], strides = [1, 1]} : vector<8x32xf32> to vector<8x8xf32>
      %50 = vector.extract_strided_slice %12 {offsets = [0, 8], sizes = [8, 8], strides = [1, 1]} : vector<8x64xf32> to vector<8x8xf32>
      %51 = vector.extract_strided_slice %12 {offsets = [0, 40], sizes = [8, 8], strides = [1, 1]} : vector<8x64xf32> to vector<8x8xf32>
      %cst_26 = arith.constant dense<0.000000e+00> : vector<8x8xf32>
      %52 = tpu.matmul %49, %50, %cst_26 {dimension_numbers = #tpu.dot_dimension_numbers<[1], [1], [0], [0], [0, 0, 1, 0], [], []>, precision = #tpu.contract_precision<fp32>} : vector<8x8xf32>, vector<8x8xf32>, vector<8x8xf32> -> vector<8x8xf32>
      %c1 = arith.constant 1 : index
      %c0_27 = arith.constant 0 : index
      %c0_28 = arith.constant 0 : index
      %53 = vector.load %arg11[%c1, %c0_27, %c0_28] : memref<4x8x1xf32, #tpu.memory_space<vmem>>, vector<1x8x1xf32>
      %54 = vector.shape_cast %53 : vector<1x8x1xf32> to vector<8x1xf32>
      %cst_29 = arith.constant dense<0xFF800000> : vector<8xf32>
      %55 = vector.multi_reduction <maximumf>, %52, %cst_29 [1] : vector<8x8xf32> to vector<8xf32>
      %56 = vector.shape_cast %55 : vector<8xf32> to vector<8x1xf32>
      %57 = arith.maximumf %54, %56 : vector<8x1xf32>
      %58 = arith.subf %54, %57 : vector<8x1xf32>
      %59 = math.exp %58 : vector<8x1xf32>
      %60 = vector.broadcast %57 : vector<8x1xf32> to vector<8x8xf32>
      %61 = arith.subf %52, %60 : vector<8x8xf32>
      %62 = math.exp %61 : vector<8x8xf32>
      %c1_30 = arith.constant 1 : index
      %c0_31 = arith.constant 0 : index
      %c0_32 = arith.constant 0 : index
      %63 = vector.load %arg12[%c1_30, %c0_31, %c0_32] : memref<4x8x1xf32, #tpu.memory_space<vmem>>, vector<1x8x1xf32>
      %64 = vector.shape_cast %63 : vector<1x8x1xf32> to vector<8x1xf32>
      %65 = arith.mulf %59, %64 : vector<8x1xf32>
      %cst_33 = arith.constant dense<0.000000e+00> : vector<8xf32>
      %66 = vector.multi_reduction <add>, %62, %cst_33 [1] : vector<8x8xf32> to vector<8xf32>
      %67 = vector.shape_cast %66 : vector<8xf32> to vector<8x1xf32>
      %68 = arith.addf %65, %67 : vector<8x1xf32>
      %c1_34 = arith.constant 1 : index
      %c0_35 = arith.constant 0 : index
      %c0_36 = arith.constant 0 : index
      %69 = vector.load %arg12[%c1_34, %c0_35, %c0_36] : memref<4x8x1xf32, #tpu.memory_space<vmem>>, vector<1x8x1xf32>
      %70 = vector.shape_cast %69 : vector<1x8x1xf32> to vector<8x1xf32>
      %71 = vector.shape_cast %68 : vector<8x1xf32> to vector<1x8x1xf32>
      tpu.vector_store %arg12[%c1_34, %c0_35, %c0_36], %71 {strides = array<i32>} : memref<4x8x1xf32, #tpu.memory_space<vmem>>, vector<1x8x1xf32>,
      %c1_37 = arith.constant 1 : index
      %c0_38 = arith.constant 0 : index
      %c0_39 = arith.constant 0 : index
      %72 = vector.load %arg13[%c1_37, %c0_38, %c0_39] : memref<4x8x8xf32, #tpu.memory_space<vmem>>, vector<1x8x8xf32>
      %73 = vector.shape_cast %72 : vector<1x8x8xf32> to vector<8x8xf32>
      %74 = vector.broadcast %59 : vector<8x1xf32> to vector<8x8xf32>
      %75 = arith.mulf %74, %73 : vector<8x8xf32>
      %cst_40 = arith.constant dense<0.000000e+00> : vector<8x8xf32>
      %76 = tpu.matmul %62, %51, %cst_40 {dimension_numbers = #tpu.dot_dimension_numbers<[1], [0], [0], [1], [0, 0, 1, 1], [], []>, precision = #tpu.contract_precision<fp32>} : vector<8x8xf32>, vector<8x8xf32>, vector<8x8xf32> -> vector<8x8xf32>
      %77 = arith.addf %75, %76 : vector<8x8xf32>
      %c1_41 = arith.constant 1 : index
      %c0_42 = arith.constant 0 : index
      %c0_43 = arith.constant 0 : index
      %78 = vector.load %arg13[%c1_41, %c0_42, %c0_43] : memref<4x8x8xf32, #tpu.memory_space<vmem>>, vector<1x8x8xf32>
      %79 = vector.shape_cast %78 : vector<1x8x8xf32> to vector<8x8xf32>
      %80 = vector.shape_cast %77 : vector<8x8xf32> to vector<1x8x8xf32>
      tpu.vector_store %arg13[%c1_41, %c0_42, %c0_43], %80 {strides = array<i32>} : memref<4x8x8xf32, #tpu.memory_space<vmem>>, vector<1x8x8xf32>,
      %c1_44 = arith.constant 1 : index
      %c0_45 = arith.constant 0 : index
      %c0_46 = arith.constant 0 : index
      %81 = vector.load %arg11[%c1_44, %c0_45, %c0_46] : memref<4x8x1xf32, #tpu.memory_space<vmem>>, vector<1x8x1xf32>
      %82 = vector.shape_cast %81 : vector<1x8x1xf32> to vector<8x1xf32>
      %83 = vector.shape_cast %57 : vector<8x1xf32> to vector<1x8x1xf32>
      tpu.vector_store %arg11[%c1_44, %c0_45, %c0_46], %83 {strides = array<i32>} : memref<4x8x1xf32, #tpu.memory_space<vmem>>, vector<1x8x1xf32>,
      %84 = vector.extract_strided_slice %13 {offsets = [0, 16], sizes = [8, 8], strides = [1, 1]} : vector<8x32xf32> to vector<8x8xf32>
      %85 = vector.extract_strided_slice %12 {offsets = [0, 16], sizes = [8, 8], strides = [1, 1]} : vector<8x64xf32> to vector<8x8xf32>
      %86 = vector.extract_strided_slice %12 {offsets = [0, 48], sizes = [8, 8], strides = [1, 1]} : vector<8x64xf32> to vector<8x8xf32>
      %cst_47 = arith.constant dense<0.000000e+00> : vector<8x8xf32>
      %87 = tpu.matmul %84, %85, %cst_47 {dimension_numbers = #tpu.dot_dimension_numbers<[1], [1], [0], [0], [0, 0, 1, 0], [], []>, precision = #tpu.contract_precision<fp32>} : vector<8x8xf32>, vector<8x8xf32>, vector<8x8xf32> -> vector<8x8xf32>
      %c2 = arith.constant 2 : index
      %c0_48 = arith.constant 0 : index
      %c0_49 = arith.constant 0 : index
      %88 = vector.load %arg11[%c2, %c0_48, %c0_49] : memref<4x8x1xf32, #tpu.memory_space<vmem>>, vector<1x8x1xf32>
      %89 = vector.shape_cast %88 : vector<1x8x1xf32> to vector<8x1xf32>
      %cst_50 = arith.constant dense<0xFF800000> : vector<8xf32>
      %90 = vector.multi_reduction <maximumf>, %87, %cst_50 [1] : vector<8x8xf32> to vector<8xf32>
      %91 = vector.shape_cast %90 : vector<8xf32> to vector<8x1xf32>
      %92 = arith.maximumf %89, %91 : vector<8x1xf32>
      %93 = arith.subf %89, %92 : vector<8x1xf32>
      %94 = math.exp %93 : vector<8x1xf32>
      %95 = vector.broadcast %92 : vector<8x1xf32> to vector<8x8xf32>
      %96 = arith.subf %87, %95 : vector<8x8xf32>
      %97 = math.exp %96 : vector<8x8xf32>
      %c2_51 = arith.constant 2 : index
      %c0_52 = arith.constant 0 : index
      %c0_53 = arith.constant 0 : index
      %98 = vector.load %arg12[%c2_51, %c0_52, %c0_53] : memref<4x8x1xf32, #tpu.memory_space<vmem>>, vector<1x8x1xf32>
      %99 = vector.shape_cast %98 : vector<1x8x1xf32> to vector<8x1xf32>
      %100 = arith.mulf %94, %99 : vector<8x1xf32>
      %cst_54 = arith.constant dense<0.000000e+00> : vector<8xf32>
      %101 = vector.multi_reduction <add>, %97, %cst_54 [1] : vector<8x8xf32> to vector<8xf32>
      %102 = vector.shape_cast %101 : vector<8xf32> to vector<8x1xf32>
      %103 = arith.addf %100, %102 : vector<8x1xf32>
      %c2_55 = arith.constant 2 : index
      %c0_56 = arith.constant 0 : index
      %c0_57 = arith.constant 0 : index
      %104 = vector.load %arg12[%c2_55, %c0_56, %c0_57] : memref<4x8x1xf32, #tpu.memory_space<vmem>>, vector<1x8x1xf32>
      %105 = vector.shape_cast %104 : vector<1x8x1xf32> to vector<8x1xf32>
      %106 = vector.shape_cast %103 : vector<8x1xf32> to vector<1x8x1xf32>
      tpu.vector_store %arg12[%c2_55, %c0_56, %c0_57], %106 {strides = array<i32>} : memref<4x8x1xf32, #tpu.memory_space<vmem>>, vector<1x8x1xf32>,
      %c2_58 = arith.constant 2 : index
      %c0_59 = arith.constant 0 : index
      %c0_60 = arith.constant 0 : index
      %107 = vector.load %arg13[%c2_58, %c0_59, %c0_60] : memref<4x8x8xf32, #tpu.memory_space<vmem>>, vector<1x8x8xf32>
      %108 = vector.shape_cast %107 : vector<1x8x8xf32> to vector<8x8xf32>
      %109 = vector.broadcast %94 : vector<8x1xf32> to vector<8x8xf32>
      %110 = arith.mulf %109, %108 : vector<8x8xf32>
      %cst_61 = arith.constant dense<0.000000e+00> : vector<8x8xf32>
      %111 = tpu.matmul %97, %86, %cst_61 {dimension_numbers = #tpu.dot_dimension_numbers<[1], [0], [0], [1], [0, 0, 1, 1], [], []>, precision = #tpu.contract_precision<fp32>} : vector<8x8xf32>, vector<8x8xf32>, vector<8x8xf32> -> vector<8x8xf32>
      %112 = arith.addf %110, %111 : vector<8x8xf32>
      %c2_62 = arith.constant 2 : index
      %c0_63 = arith.constant 0 : index
      %c0_64 = arith.constant 0 : index
      %113 = vector.load %arg13[%c2_62, %c0_63, %c0_64] : memref<4x8x8xf32, #tpu.memory_space<vmem>>, vector<1x8x8xf32>
      %114 = vector.shape_cast %113 : vector<1x8x8xf32> to vector<8x8xf32>
      %115 = vector.shape_cast %112 : vector<8x8xf32> to vector<1x8x8xf32>
      tpu.vector_store %arg13[%c2_62, %c0_63, %c0_64], %115 {strides = array<i32>} : memref<4x8x8xf32, #tpu.memory_space<vmem>>, vector<1x8x8xf32>,
      %c2_65 = arith.constant 2 : index
      %c0_66 = arith.constant 0 : index
      %c0_67 = arith.constant 0 : index
      %116 = vector.load %arg11[%c2_65, %c0_66, %c0_67] : memref<4x8x1xf32, #tpu.memory_space<vmem>>, vector<1x8x1xf32>
      %117 = vector.shape_cast %116 : vector<1x8x1xf32> to vector<8x1xf32>
      %118 = vector.shape_cast %92 : vector<8x1xf32> to vector<1x8x1xf32>
      tpu.vector_store %arg11[%c2_65, %c0_66, %c0_67], %118 {strides = array<i32>} : memref<4x8x1xf32, #tpu.memory_space<vmem>>, vector<1x8x1xf32>,
      %119 = vector.extract_strided_slice %13 {offsets = [0, 24], sizes = [8, 8], strides = [1, 1]} : vector<8x32xf32> to vector<8x8xf32>
      %120 = vector.extract_strided_slice %12 {offsets = [0, 24], sizes = [8, 8], strides = [1, 1]} : vector<8x64xf32> to vector<8x8xf32>
      %121 = vector.extract_strided_slice %12 {offsets = [0, 56], sizes = [8, 8], strides = [1, 1]} : vector<8x64xf32> to vector<8x8xf32>
      %cst_68 = arith.constant dense<0.000000e+00> : vector<8x8xf32>
      %122 = tpu.matmul %119, %120, %cst_68 {dimension_numbers = #tpu.dot_dimension_numbers<[1], [1], [0], [0], [0, 0, 1, 0], [], []>, precision = #tpu.contract_precision<fp32>} : vector<8x8xf32>, vector<8x8xf32>, vector<8x8xf32> -> vector<8x8xf32>
      %c3 = arith.constant 3 : index
      %c0_69 = arith.constant 0 : index
      %c0_70 = arith.constant 0 : index
      %123 = vector.load %arg11[%c3, %c0_69, %c0_70] : memref<4x8x1xf32, #tpu.memory_space<vmem>>, vector<1x8x1xf32>
      %124 = vector.shape_cast %123 : vector<1x8x1xf32> to vector<8x1xf32>
      %cst_71 = arith.constant dense<0xFF800000> : vector<8xf32>
      %125 = vector.multi_reduction <maximumf>, %122, %cst_71 [1] : vector<8x8xf32> to vector<8xf32>
      %126 = vector.shape_cast %125 : vector<8xf32> to vector<8x1xf32>
      %127 = arith.maximumf %124, %126 : vector<8x1xf32>
      %128 = arith.subf %124, %127 : vector<8x1xf32>
      %129 = math.exp %128 : vector<8x1xf32>
      %130 = vector.broadcast %127 : vector<8x1xf32> to vector<8x8xf32>
      %131 = arith.subf %122, %130 : vector<8x8xf32>
      %132 = math.exp %131 : vector<8x8xf32>
      %c3_72 = arith.constant 3 : index
      %c0_73 = arith.constant 0 : index
      %c0_74 = arith.constant 0 : index
      %133 = vector.load %arg12[%c3_72, %c0_73, %c0_74] : memref<4x8x1xf32, #tpu.memory_space<vmem>>, vector<1x8x1xf32>
      %134 = vector.shape_cast %133 : vector<1x8x1xf32> to vector<8x1xf32>
      %135 = arith.mulf %129, %134 : vector<8x1xf32>
      %cst_75 = arith.constant dense<0.000000e+00> : vector<8xf32>
      %136 = vector.multi_reduction <add>, %132, %cst_75 [1] : vector<8x8xf32> to vector<8xf32>
      %137 = vector.shape_cast %136 : vector<8xf32> to vector<8x1xf32>
      %138 = arith.addf %135, %137 : vector<8x1xf32>
      %c3_76 = arith.constant 3 : index
      %c0_77 = arith.constant 0 : index
      %c0_78 = arith.constant 0 : index
      %139 = vector.load %arg12[%c3_76, %c0_77, %c0_78] : memref<4x8x1xf32, #tpu.memory_space<vmem>>, vector<1x8x1xf32>
      %140 = vector.shape_cast %139 : vector<1x8x1xf32> to vector<8x1xf32>
      %141 = vector.shape_cast %138 : vector<8x1xf32> to vector<1x8x1xf32>
      tpu.vector_store %arg12[%c3_76, %c0_77, %c0_78], %141 {strides = array<i32>} : memref<4x8x1xf32, #tpu.memory_space<vmem>>, vector<1x8x1xf32>,
      %c3_79 = arith.constant 3 : index
      %c0_80 = arith.constant 0 : index
      %c0_81 = arith.constant 0 : index
      %142 = vector.load %arg13[%c3_79, %c0_80, %c0_81] : memref<4x8x8xf32, #tpu.memory_space<vmem>>, vector<1x8x8xf32>
      %143 = vector.shape_cast %142 : vector<1x8x8xf32> to vector<8x8xf32>
      %144 = vector.broadcast %129 : vector<8x1xf32> to vector<8x8xf32>
      %145 = arith.mulf %144, %143 : vector<8x8xf32>
      %cst_82 = arith.constant dense<0.000000e+00> : vector<8x8xf32>
      %146 = tpu.matmul %132, %121, %cst_82 {dimension_numbers = #tpu.dot_dimension_numbers<[1], [0], [0], [1], [0, 0, 1, 1], [], []>, precision = #tpu.contract_precision<fp32>} : vector<8x8xf32>, vector<8x8xf32>, vector<8x8xf32> -> vector<8x8xf32>
      %147 = arith.addf %145, %146 : vector<8x8xf32>
      %c3_83 = arith.constant 3 : index
      %c0_84 = arith.constant 0 : index
      %c0_85 = arith.constant 0 : index
      %148 = vector.load %arg13[%c3_83, %c0_84, %c0_85] : memref<4x8x8xf32, #tpu.memory_space<vmem>>, vector<1x8x8xf32>
      %149 = vector.shape_cast %148 : vector<1x8x8xf32> to vector<8x8xf32>
      %150 = vector.shape_cast %147 : vector<8x8xf32> to vector<1x8x8xf32>
      tpu.vector_store %arg13[%c3_83, %c0_84, %c0_85], %150 {strides = array<i32>} : memref<4x8x8xf32, #tpu.memory_space<vmem>>, vector<1x8x8xf32>,
      %c3_86 = arith.constant 3 : index
      %c0_87 = arith.constant 0 : index
      %c0_88 = arith.constant 0 : index
      %151 = vector.load %arg11[%c3_86, %c0_87, %c0_88] : memref<4x8x1xf32, #tpu.memory_space<vmem>>, vector<1x8x1xf32>
      %152 = vector.shape_cast %151 : vector<1x8x1xf32> to vector<8x1xf32>
      %153 = vector.shape_cast %127 : vector<8x1xf32> to vector<1x8x1xf32>
      tpu.vector_store %arg11[%c3_86, %c0_87, %c0_88], %153 {strides = array<i32>} : memref<4x8x1xf32, #tpu.memory_space<vmem>>, vector<1x8x1xf32>,
    } else {
    }
    %6 = arith.cmpi eq, %arg2, %arg1 : i32
    %7 = arith.extui %6 : i1 to i32
    %c0_i32_2 = arith.constant 0 : i32
    %8 = arith.cmpi ne, %7, %c0_i32_2 : i32
    scf.if %8 {
      %c0 = arith.constant 0 : index
      %c0_3 = arith.constant 0 : index
      %c0_4 = arith.constant 0 : index
      %9 = vector.load %arg3[%c0, %c0_3, %c0_4] : memref<1x8x32xf32, #tpu.memory_space<vmem>>, vector<1x8x32xf32>
      %10 = vector.shape_cast %9 : vector<1x8x32xf32> to vector<8x32xf32>
      %c0_5 = arith.constant 0 : index
      %c0_6 = arith.constant 0 : index
      %11 = vector.load %arg5[%c0_5, %c0_6] : memref<32x64xf32, #tpu.memory_space<vmem>>, vector<32x64xf32>
      %cst = arith.constant dense<0.000000e+00> : vector<8x64xf32>
      %12 = tpu.matmul %10, %11, %cst {dimension_numbers = #tpu.dot_dimension_numbers<[1], [0], [0], [1], [0, 0, 1, 1], [], []>, precision = #tpu.contract_precision<fp32>} : vector<8x32xf32>, vector<32x64xf32>, vector<8x64xf32> -> vector<8x64xf32>
      %c8_i32 = arith.constant 8 : i32
      %13 = arith.muli %arg2, %c8_i32 : i32
      %14 = tpu.assume_multiple %13, 8 : i32
      %15 = arith.index_cast %14 : i32 to index
      %c0_7 = arith.constant 0 : index
      %16 = vector.load %arg10[%15, %c0_7] : memref<16x64xf32, #tpu.memory_space<vmem>>, vector<8x64xf32>
      tpu.vector_store %arg10[%15, %c0_7], %12 {strides = array<i32>} : memref<16x64xf32, #tpu.memory_space<vmem>>, vector<8x64xf32>,
      %c0_8 = arith.constant 0 : index
      %c0_9 = arith.constant 0 : index
      %17 = vector.load %arg9[%c0_8, %c0_9] : memref<8x32xf32, #tpu.memory_space<vmem>>, vector<8x32xf32>
      %18 = tpu.iota {dimensions = array<i32: 0>} : vector<8x8xi32>
      %19 = tpu.iota {dimensions = array<i32: 1>} : vector<8x8xi32>
      %20 = arith.cmpi sle, %19, %18 : vector<8x8xi32>
      %21 = vector.extract_strided_slice %17 {offsets = [0, 0], sizes = [8, 8], strides = [1, 1]} : vector<8x32xf32> to vector<8x8xf32>
      %22 = vector.extract_strided_slice %12 {offsets = [0, 0], sizes = [8, 8], strides = [1, 1]} : vector<8x64xf32> to vector<8x8xf32>
      %23 = vector.extract_strided_slice %12 {offsets = [0, 32], sizes = [8, 8], strides = [1, 1]} : vector<8x64xf32> to vector<8x8xf32>
      %cst_10 = arith.constant dense<0.000000e+00> : vector<8x8xf32>
      %24 = tpu.matmul %21, %22, %cst_10 {dimension_numbers = #tpu.dot_dimension_numbers<[1], [1], [0], [0], [0, 0, 1, 0], [], []>, precision = #tpu.contract_precision<fp32>} : vector<8x8xf32>, vector<8x8xf32>, vector<8x8xf32> -> vector<8x8xf32>
      %cst_11 = arith.constant -1.000000e+30 : f32
      %25 = vector.broadcast %cst_11 : f32 to vector<8x8xf32>
      %26 = arith.select %20, %24, %25 : vector<8x8xi1>, vector<8x8xf32>
      %c0_12 = arith.constant 0 : index
      %c0_13 = arith.constant 0 : index
      %c0_14 = arith.constant 0 : index
      %27 = vector.load %arg11[%c0_12, %c0_13, %c0_14] : memref<4x8x1xf32, #tpu.memory_space<vmem>>, vector<1x8x1xf32>
      %28 = vector.shape_cast %27 : vector<1x8x1xf32> to vector<8x1xf32>
      %cst_15 = arith.constant dense<0xFF800000> : vector<8xf32>
      %29 = vector.multi_reduction <maximumf>, %26, %cst_15 [1] : vector<8x8xf32> to vector<8xf32>
      %30 = vector.shape_cast %29 : vector<8xf32> to vector<8x1xf32>
      %31 = arith.maximumf %28, %30 : vector<8x1xf32>
      %32 = arith.subf %28, %31 : vector<8x1xf32>
      %33 = math.exp %32 : vector<8x1xf32>
      %34 = vector.broadcast %31 : vector<8x1xf32> to vector<8x8xf32>
      %35 = arith.subf %26, %34 : vector<8x8xf32>
      %36 = math.exp %35 : vector<8x8xf32>
      %c0_16 = arith.constant 0 : index
      %c0_17 = arith.constant 0 : index
      %c0_18 = arith.constant 0 : index
      %37 = vector.load %arg12[%c0_16, %c0_17, %c0_18] : memref<4x8x1xf32, #tpu.memory_space<vmem>>, vector<1x8x1xf32>
      %38 = vector.shape_cast %37 : vector<1x8x1xf32> to vector<8x1xf32>
      %39 = arith.mulf %33, %38 : vector<8x1xf32>
      %cst_19 = arith.constant dense<0.000000e+00> : vector<8xf32>
      %40 = vector.multi_reduction <add>, %36, %cst_19 [1] : vector<8x8xf32> to vector<8xf32>
      %41 = vector.shape_cast %40 : vector<8xf32> to vector<8x1xf32>
      %42 = arith.addf %39, %41 : vector<8x1xf32>
      %c0_20 = arith.constant 0 : index
      %c0_21 = arith.constant 0 : index
      %c0_22 = arith.constant 0 : index
      %43 = vector.load %arg12[%c0_20, %c0_21, %c0_22] : memref<4x8x1xf32, #tpu.memory_space<vmem>>, vector<1x8x1xf32>
      %44 = vector.shape_cast %43 : vector<1x8x1xf32> to vector<8x1xf32>
      %45 = vector.shape_cast %42 : vector<8x1xf32> to vector<1x8x1xf32>
      tpu.vector_store %arg12[%c0_20, %c0_21, %c0_22], %45 {strides = array<i32>} : memref<4x8x1xf32, #tpu.memory_space<vmem>>, vector<1x8x1xf32>,
      %c0_23 = arith.constant 0 : index
      %c0_24 = arith.constant 0 : index
      %c0_25 = arith.constant 0 : index
      %46 = vector.load %arg13[%c0_23, %c0_24, %c0_25] : memref<4x8x8xf32, #tpu.memory_space<vmem>>, vector<1x8x8xf32>
      %47 = vector.shape_cast %46 : vector<1x8x8xf32> to vector<8x8xf32>
      %48 = vector.broadcast %33 : vector<8x1xf32> to vector<8x8xf32>
      %49 = arith.mulf %48, %47 : vector<8x8xf32>
      %cst_26 = arith.constant dense<0.000000e+00> : vector<8x8xf32>
      %50 = tpu.matmul %36, %23, %cst_26 {dimension_numbers = #tpu.dot_dimension_numbers<[1], [0], [0], [1], [0, 0, 1, 1], [], []>, precision = #tpu.contract_precision<fp32>} : vector<8x8xf32>, vector<8x8xf32>, vector<8x8xf32> -> vector<8x8xf32>
      %51 = arith.addf %49, %50 : vector<8x8xf32>
      %c0_27 = arith.constant 0 : index
      %c0_28 = arith.constant 0 : index
      %c0_29 = arith.constant 0 : index
      %52 = vector.load %arg13[%c0_27, %c0_28, %c0_29] : memref<4x8x8xf32, #tpu.memory_space<vmem>>, vector<1x8x8xf32>
      %53 = vector.shape_cast %52 : vector<1x8x8xf32> to vector<8x8xf32>
      %54 = vector.shape_cast %51 : vector<8x8xf32> to vector<1x8x8xf32>
      tpu.vector_store %arg13[%c0_27, %c0_28, %c0_29], %54 {strides = array<i32>} : memref<4x8x8xf32, #tpu.memory_space<vmem>>, vector<1x8x8xf32>,
      %c0_30 = arith.constant 0 : index
      %c0_31 = arith.constant 0 : index
      %c0_32 = arith.constant 0 : index
      %55 = vector.load %arg11[%c0_30, %c0_31, %c0_32] : memref<4x8x1xf32, #tpu.memory_space<vmem>>, vector<1x8x1xf32>
      %56 = vector.shape_cast %55 : vector<1x8x1xf32> to vector<8x1xf32>
      %57 = vector.shape_cast %31 : vector<8x1xf32> to vector<1x8x1xf32>
      tpu.vector_store %arg11[%c0_30, %c0_31, %c0_32], %57 {strides = array<i32>} : memref<4x8x1xf32, #tpu.memory_space<vmem>>, vector<1x8x1xf32>,
      %58 = vector.extract_strided_slice %17 {offsets = [0, 8], sizes = [8, 8], strides = [1, 1]} : vector<8x32xf32> to vector<8x8xf32>
      %59 = vector.extract_strided_slice %12 {offsets = [0, 8], sizes = [8, 8], strides = [1, 1]} : vector<8x64xf32> to vector<8x8xf32>
      %60 = vector.extract_strided_slice %12 {offsets = [0, 40], sizes = [8, 8], strides = [1, 1]} : vector<8x64xf32> to vector<8x8xf32>
      %cst_33 = arith.constant dense<0.000000e+00> : vector<8x8xf32>
      %61 = tpu.matmul %58, %59, %cst_33 {dimension_numbers = #tpu.dot_dimension_numbers<[1], [1], [0], [0], [0, 0, 1, 0], [], []>, precision = #tpu.contract_precision<fp32>} : vector<8x8xf32>, vector<8x8xf32>, vector<8x8xf32> -> vector<8x8xf32>
      %cst_34 = arith.constant -1.000000e+30 : f32
      %62 = vector.broadcast %cst_34 : f32 to vector<8x8xf32>
      %63 = arith.select %20, %61, %62 : vector<8x8xi1>, vector<8x8xf32>
      %c1 = arith.constant 1 : index
      %c0_35 = arith.constant 0 : index
      %c0_36 = arith.constant 0 : index
      %64 = vector.load %arg11[%c1, %c0_35, %c0_36] : memref<4x8x1xf32, #tpu.memory_space<vmem>>, vector<1x8x1xf32>
      %65 = vector.shape_cast %64 : vector<1x8x1xf32> to vector<8x1xf32>
      %cst_37 = arith.constant dense<0xFF800000> : vector<8xf32>
      %66 = vector.multi_reduction <maximumf>, %63, %cst_37 [1] : vector<8x8xf32> to vector<8xf32>
      %67 = vector.shape_cast %66 : vector<8xf32> to vector<8x1xf32>
      %68 = arith.maximumf %65, %67 : vector<8x1xf32>
      %69 = arith.subf %65, %68 : vector<8x1xf32>
      %70 = math.exp %69 : vector<8x1xf32>
      %71 = vector.broadcast %68 : vector<8x1xf32> to vector<8x8xf32>
      %72 = arith.subf %63, %71 : vector<8x8xf32>
      %73 = math.exp %72 : vector<8x8xf32>
      %c1_38 = arith.constant 1 : index
      %c0_39 = arith.constant 0 : index
      %c0_40 = arith.constant 0 : index
      %74 = vector.load %arg12[%c1_38, %c0_39, %c0_40] : memref<4x8x1xf32, #tpu.memory_space<vmem>>, vector<1x8x1xf32>
      %75 = vector.shape_cast %74 : vector<1x8x1xf32> to vector<8x1xf32>
      %76 = arith.mulf %70, %75 : vector<8x1xf32>
      %cst_41 = arith.constant dense<0.000000e+00> : vector<8xf32>
      %77 = vector.multi_reduction <add>, %73, %cst_41 [1] : vector<8x8xf32> to vector<8xf32>
      %78 = vector.shape_cast %77 : vector<8xf32> to vector<8x1xf32>
      %79 = arith.addf %76, %78 : vector<8x1xf32>
      %c1_42 = arith.constant 1 : index
      %c0_43 = arith.constant 0 : index
      %c0_44 = arith.constant 0 : index
      %80 = vector.load %arg12[%c1_42, %c0_43, %c0_44] : memref<4x8x1xf32, #tpu.memory_space<vmem>>, vector<1x8x1xf32>
      %81 = vector.shape_cast %80 : vector<1x8x1xf32> to vector<8x1xf32>
      %82 = vector.shape_cast %79 : vector<8x1xf32> to vector<1x8x1xf32>
      tpu.vector_store %arg12[%c1_42, %c0_43, %c0_44], %82 {strides = array<i32>} : memref<4x8x1xf32, #tpu.memory_space<vmem>>, vector<1x8x1xf32>,
      %c1_45 = arith.constant 1 : index
      %c0_46 = arith.constant 0 : index
      %c0_47 = arith.constant 0 : index
      %83 = vector.load %arg13[%c1_45, %c0_46, %c0_47] : memref<4x8x8xf32, #tpu.memory_space<vmem>>, vector<1x8x8xf32>
      %84 = vector.shape_cast %83 : vector<1x8x8xf32> to vector<8x8xf32>
      %85 = vector.broadcast %70 : vector<8x1xf32> to vector<8x8xf32>
      %86 = arith.mulf %85, %84 : vector<8x8xf32>
      %cst_48 = arith.constant dense<0.000000e+00> : vector<8x8xf32>
      %87 = tpu.matmul %73, %60, %cst_48 {dimension_numbers = #tpu.dot_dimension_numbers<[1], [0], [0], [1], [0, 0, 1, 1], [], []>, precision = #tpu.contract_precision<fp32>} : vector<8x8xf32>, vector<8x8xf32>, vector<8x8xf32> -> vector<8x8xf32>
      %88 = arith.addf %86, %87 : vector<8x8xf32>
      %c1_49 = arith.constant 1 : index
      %c0_50 = arith.constant 0 : index
      %c0_51 = arith.constant 0 : index
      %89 = vector.load %arg13[%c1_49, %c0_50, %c0_51] : memref<4x8x8xf32, #tpu.memory_space<vmem>>, vector<1x8x8xf32>
      %90 = vector.shape_cast %89 : vector<1x8x8xf32> to vector<8x8xf32>
      %91 = vector.shape_cast %88 : vector<8x8xf32> to vector<1x8x8xf32>
      tpu.vector_store %arg13[%c1_49, %c0_50, %c0_51], %91 {strides = array<i32>} : memref<4x8x8xf32, #tpu.memory_space<vmem>>, vector<1x8x8xf32>,
      %c1_52 = arith.constant 1 : index
      %c0_53 = arith.constant 0 : index
      %c0_54 = arith.constant 0 : index
      %92 = vector.load %arg11[%c1_52, %c0_53, %c0_54] : memref<4x8x1xf32, #tpu.memory_space<vmem>>, vector<1x8x1xf32>
      %93 = vector.shape_cast %92 : vector<1x8x1xf32> to vector<8x1xf32>
      %94 = vector.shape_cast %68 : vector<8x1xf32> to vector<1x8x1xf32>
      tpu.vector_store %arg11[%c1_52, %c0_53, %c0_54], %94 {strides = array<i32>} : memref<4x8x1xf32, #tpu.memory_space<vmem>>, vector<1x8x1xf32>,
      %95 = vector.extract_strided_slice %17 {offsets = [0, 16], sizes = [8, 8], strides = [1, 1]} : vector<8x32xf32> to vector<8x8xf32>
      %96 = vector.extract_strided_slice %12 {offsets = [0, 16], sizes = [8, 8], strides = [1, 1]} : vector<8x64xf32> to vector<8x8xf32>
      %97 = vector.extract_strided_slice %12 {offsets = [0, 48], sizes = [8, 8], strides = [1, 1]} : vector<8x64xf32> to vector<8x8xf32>
      %cst_55 = arith.constant dense<0.000000e+00> : vector<8x8xf32>
      %98 = tpu.matmul %95, %96, %cst_55 {dimension_numbers = #tpu.dot_dimension_numbers<[1], [1], [0], [0], [0, 0, 1, 0], [], []>, precision = #tpu.contract_precision<fp32>} : vector<8x8xf32>, vector<8x8xf32>, vector<8x8xf32> -> vector<8x8xf32>
      %cst_56 = arith.constant -1.000000e+30 : f32
      %99 = vector.broadcast %cst_56 : f32 to vector<8x8xf32>
      %100 = arith.select %20, %98, %99 : vector<8x8xi1>, vector<8x8xf32>
      %c2 = arith.constant 2 : index
      %c0_57 = arith.constant 0 : index
      %c0_58 = arith.constant 0 : index
      %101 = vector.load %arg11[%c2, %c0_57, %c0_58] : memref<4x8x1xf32, #tpu.memory_space<vmem>>, vector<1x8x1xf32>
      %102 = vector.shape_cast %101 : vector<1x8x1xf32> to vector<8x1xf32>
      %cst_59 = arith.constant dense<0xFF800000> : vector<8xf32>
      %103 = vector.multi_reduction <maximumf>, %100, %cst_59 [1] : vector<8x8xf32> to vector<8xf32>
      %104 = vector.shape_cast %103 : vector<8xf32> to vector<8x1xf32>
      %105 = arith.maximumf %102, %104 : vector<8x1xf32>
      %106 = arith.subf %102, %105 : vector<8x1xf32>
      %107 = math.exp %106 : vector<8x1xf32>
      %108 = vector.broadcast %105 : vector<8x1xf32> to vector<8x8xf32>
      %109 = arith.subf %100, %108 : vector<8x8xf32>
      %110 = math.exp %109 : vector<8x8xf32>
      %c2_60 = arith.constant 2 : index
      %c0_61 = arith.constant 0 : index
      %c0_62 = arith.constant 0 : index
      %111 = vector.load %arg12[%c2_60, %c0_61, %c0_62] : memref<4x8x1xf32, #tpu.memory_space<vmem>>, vector<1x8x1xf32>
      %112 = vector.shape_cast %111 : vector<1x8x1xf32> to vector<8x1xf32>
      %113 = arith.mulf %107, %112 : vector<8x1xf32>
      %cst_63 = arith.constant dense<0.000000e+00> : vector<8xf32>
      %114 = vector.multi_reduction <add>, %110, %cst_63 [1] : vector<8x8xf32> to vector<8xf32>
      %115 = vector.shape_cast %114 : vector<8xf32> to vector<8x1xf32>
      %116 = arith.addf %113, %115 : vector<8x1xf32>
      %c2_64 = arith.constant 2 : index
      %c0_65 = arith.constant 0 : index
      %c0_66 = arith.constant 0 : index
      %117 = vector.load %arg12[%c2_64, %c0_65, %c0_66] : memref<4x8x1xf32, #tpu.memory_space<vmem>>, vector<1x8x1xf32>
      %118 = vector.shape_cast %117 : vector<1x8x1xf32> to vector<8x1xf32>
      %119 = vector.shape_cast %116 : vector<8x1xf32> to vector<1x8x1xf32>
      tpu.vector_store %arg12[%c2_64, %c0_65, %c0_66], %119 {strides = array<i32>} : memref<4x8x1xf32, #tpu.memory_space<vmem>>, vector<1x8x1xf32>,
      %c2_67 = arith.constant 2 : index
      %c0_68 = arith.constant 0 : index
      %c0_69 = arith.constant 0 : index
      %120 = vector.load %arg13[%c2_67, %c0_68, %c0_69] : memref<4x8x8xf32, #tpu.memory_space<vmem>>, vector<1x8x8xf32>
      %121 = vector.shape_cast %120 : vector<1x8x8xf32> to vector<8x8xf32>
      %122 = vector.broadcast %107 : vector<8x1xf32> to vector<8x8xf32>
      %123 = arith.mulf %122, %121 : vector<8x8xf32>
      %cst_70 = arith.constant dense<0.000000e+00> : vector<8x8xf32>
      %124 = tpu.matmul %110, %97, %cst_70 {dimension_numbers = #tpu.dot_dimension_numbers<[1], [0], [0], [1], [0, 0, 1, 1], [], []>, precision = #tpu.contract_precision<fp32>} : vector<8x8xf32>, vector<8x8xf32>, vector<8x8xf32> -> vector<8x8xf32>
      %125 = arith.addf %123, %124 : vector<8x8xf32>
      %c2_71 = arith.constant 2 : index
      %c0_72 = arith.constant 0 : index
      %c0_73 = arith.constant 0 : index
      %126 = vector.load %arg13[%c2_71, %c0_72, %c0_73] : memref<4x8x8xf32, #tpu.memory_space<vmem>>, vector<1x8x8xf32>
      %127 = vector.shape_cast %126 : vector<1x8x8xf32> to vector<8x8xf32>
      %128 = vector.shape_cast %125 : vector<8x8xf32> to vector<1x8x8xf32>
      tpu.vector_store %arg13[%c2_71, %c0_72, %c0_73], %128 {strides = array<i32>} : memref<4x8x8xf32, #tpu.memory_space<vmem>>, vector<1x8x8xf32>,
      %c2_74 = arith.constant 2 : index
      %c0_75 = arith.constant 0 : index
      %c0_76 = arith.constant 0 : index
      %129 = vector.load %arg11[%c2_74, %c0_75, %c0_76] : memref<4x8x1xf32, #tpu.memory_space<vmem>>, vector<1x8x1xf32>
      %130 = vector.shape_cast %129 : vector<1x8x1xf32> to vector<8x1xf32>
      %131 = vector.shape_cast %105 : vector<8x1xf32> to vector<1x8x1xf32>
      tpu.vector_store %arg11[%c2_74, %c0_75, %c0_76], %131 {strides = array<i32>} : memref<4x8x1xf32, #tpu.memory_space<vmem>>, vector<1x8x1xf32>,
      %132 = vector.extract_strided_slice %17 {offsets = [0, 24], sizes = [8, 8], strides = [1, 1]} : vector<8x32xf32> to vector<8x8xf32>
      %133 = vector.extract_strided_slice %12 {offsets = [0, 24], sizes = [8, 8], strides = [1, 1]} : vector<8x64xf32> to vector<8x8xf32>
      %134 = vector.extract_strided_slice %12 {offsets = [0, 56], sizes = [8, 8], strides = [1, 1]} : vector<8x64xf32> to vector<8x8xf32>
      %cst_77 = arith.constant dense<0.000000e+00> : vector<8x8xf32>
      %135 = tpu.matmul %132, %133, %cst_77 {dimension_numbers = #tpu.dot_dimension_numbers<[1], [1], [0], [0], [0, 0, 1, 0], [], []>, precision = #tpu.contract_precision<fp32>} : vector<8x8xf32>, vector<8x8xf32>, vector<8x8xf32> -> vector<8x8xf32>
      %cst_78 = arith.constant -1.000000e+30 : f32
      %136 = vector.broadcast %cst_78 : f32 to vector<8x8xf32>
      %137 = arith.select %20, %135, %136 : vector<8x8xi1>, vector<8x8xf32>
      %c3 = arith.constant 3 : index
      %c0_79 = arith.constant 0 : index
      %c0_80 = arith.constant 0 : index
      %138 = vector.load %arg11[%c3, %c0_79, %c0_80] : memref<4x8x1xf32, #tpu.memory_space<vmem>>, vector<1x8x1xf32>
      %139 = vector.shape_cast %138 : vector<1x8x1xf32> to vector<8x1xf32>
      %cst_81 = arith.constant dense<0xFF800000> : vector<8xf32>
      %140 = vector.multi_reduction <maximumf>, %137, %cst_81 [1] : vector<8x8xf32> to vector<8xf32>
      %141 = vector.shape_cast %140 : vector<8xf32> to vector<8x1xf32>
      %142 = arith.maximumf %139, %141 : vector<8x1xf32>
      %143 = arith.subf %139, %142 : vector<8x1xf32>
      %144 = math.exp %143 : vector<8x1xf32>
      %145 = vector.broadcast %142 : vector<8x1xf32> to vector<8x8xf32>
      %146 = arith.subf %137, %145 : vector<8x8xf32>
      %147 = math.exp %146 : vector<8x8xf32>
      %c3_82 = arith.constant 3 : index
      %c0_83 = arith.constant 0 : index
      %c0_84 = arith.constant 0 : index
      %148 = vector.load %arg12[%c3_82, %c0_83, %c0_84] : memref<4x8x1xf32, #tpu.memory_space<vmem>>, vector<1x8x1xf32>
      %149 = vector.shape_cast %148 : vector<1x8x1xf32> to vector<8x1xf32>
      %150 = arith.mulf %144, %149 : vector<8x1xf32>
      %cst_85 = arith.constant dense<0.000000e+00> : vector<8xf32>
      %151 = vector.multi_reduction <add>, %147, %cst_85 [1] : vector<8x8xf32> to vector<8xf32>
      %152 = vector.shape_cast %151 : vector<8xf32> to vector<8x1xf32>
      %153 = arith.addf %150, %152 : vector<8x1xf32>
      %c3_86 = arith.constant 3 : index
      %c0_87 = arith.constant 0 : index
      %c0_88 = arith.constant 0 : index
      %154 = vector.load %arg12[%c3_86, %c0_87, %c0_88] : memref<4x8x1xf32, #tpu.memory_space<vmem>>, vector<1x8x1xf32>
      %155 = vector.shape_cast %154 : vector<1x8x1xf32> to vector<8x1xf32>
      %156 = vector.shape_cast %153 : vector<8x1xf32> to vector<1x8x1xf32>
      tpu.vector_store %arg12[%c3_86, %c0_87, %c0_88], %156 {strides = array<i32>} : memref<4x8x1xf32, #tpu.memory_space<vmem>>, vector<1x8x1xf32>,
      %c3_89 = arith.constant 3 : index
      %c0_90 = arith.constant 0 : index
      %c0_91 = arith.constant 0 : index
      %157 = vector.load %arg13[%c3_89, %c0_90, %c0_91] : memref<4x8x8xf32, #tpu.memory_space<vmem>>, vector<1x8x8xf32>
      %158 = vector.shape_cast %157 : vector<1x8x8xf32> to vector<8x8xf32>
      %159 = vector.broadcast %144 : vector<8x1xf32> to vector<8x8xf32>
      %160 = arith.mulf %159, %158 : vector<8x8xf32>
      %cst_92 = arith.constant dense<0.000000e+00> : vector<8x8xf32>
      %161 = tpu.matmul %147, %134, %cst_92 {dimension_numbers = #tpu.dot_dimension_numbers<[1], [0], [0], [1], [0, 0, 1, 1], [], []>, precision = #tpu.contract_precision<fp32>} : vector<8x8xf32>, vector<8x8xf32>, vector<8x8xf32> -> vector<8x8xf32>
      %162 = arith.addf %160, %161 : vector<8x8xf32>
      %c3_93 = arith.constant 3 : index
      %c0_94 = arith.constant 0 : index
      %c0_95 = arith.constant 0 : index
      %163 = vector.load %arg13[%c3_93, %c0_94, %c0_95] : memref<4x8x8xf32, #tpu.memory_space<vmem>>, vector<1x8x8xf32>
      %164 = vector.shape_cast %163 : vector<1x8x8xf32> to vector<8x8xf32>
      %165 = vector.shape_cast %162 : vector<8x8xf32> to vector<1x8x8xf32>
      tpu.vector_store %arg13[%c3_93, %c0_94, %c0_95], %165 {strides = array<i32>} : memref<4x8x8xf32, #tpu.memory_space<vmem>>, vector<1x8x8xf32>,
      %c3_96 = arith.constant 3 : index
      %c0_97 = arith.constant 0 : index
      %c0_98 = arith.constant 0 : index
      %166 = vector.load %arg11[%c3_96, %c0_97, %c0_98] : memref<4x8x1xf32, #tpu.memory_space<vmem>>, vector<1x8x1xf32>
      %167 = vector.shape_cast %166 : vector<1x8x1xf32> to vector<8x1xf32>
      %168 = vector.shape_cast %142 : vector<8x1xf32> to vector<1x8x1xf32>
      tpu.vector_store %arg11[%c3_96, %c0_97, %c0_98], %168 {strides = array<i32>} : memref<4x8x1xf32, #tpu.memory_space<vmem>>, vector<1x8x1xf32>,
      %c0_99 = arith.constant 0 : index
      %c0_100 = arith.constant 0 : index
      %c0_101 = arith.constant 0 : index
      %169 = vector.load %arg12[%c0_99, %c0_100, %c0_101] : memref<4x8x1xf32, #tpu.memory_space<vmem>>, vector<1x8x1xf32>
      %170 = vector.shape_cast %169 : vector<1x8x1xf32> to vector<8x1xf32>
      %cst_102 = arith.constant 1.000000e+00 : f32
      %171 = vector.broadcast %cst_102 : f32 to vector<8x1xf32>
      %172 = arith.divf %171, %170 : vector<8x1xf32>
      %c0_103 = arith.constant 0 : index
      %c0_104 = arith.constant 0 : index
      %c0_105 = arith.constant 0 : index
      %173 = vector.load %arg13[%c0_103, %c0_104, %c0_105] : memref<4x8x8xf32, #tpu.memory_space<vmem>>, vector<1x8x8xf32>
      %174 = vector.shape_cast %173 : vector<1x8x8xf32> to vector<8x8xf32>
      %175 = vector.broadcast %172 : vector<8x1xf32> to vector<8x8xf32>
      %176 = arith.mulf %174, %175 : vector<8x8xf32>
      %c0_106 = arith.constant 0 : index
      %c0_107 = arith.constant 0 : index
      %177 = vector.load %arg14[%c0_106, %c0_107] : memref<8x32xf32, #tpu.memory_space<vmem>>, vector<8x8xf32>
      tpu.vector_store %arg14[%c0_106, %c0_107], %176 {strides = array<i32>} : memref<8x32xf32, #tpu.memory_space<vmem>>, vector<8x8xf32>,
      %c1_108 = arith.constant 1 : index
      %c0_109 = arith.constant 0 : index
      %c0_110 = arith.constant 0 : index
      %178 = vector.load %arg12[%c1_108, %c0_109, %c0_110] : memref<4x8x1xf32, #tpu.memory_space<vmem>>, vector<1x8x1xf32>
      %179 = vector.shape_cast %178 : vector<1x8x1xf32> to vector<8x1xf32>
      %cst_111 = arith.constant 1.000000e+00 : f32
      %180 = vector.broadcast %cst_111 : f32 to vector<8x1xf32>
      %181 = arith.divf %180, %179 : vector<8x1xf32>
      %c1_112 = arith.constant 1 : index
      %c0_113 = arith.constant 0 : index
      %c0_114 = arith.constant 0 : index
      %182 = vector.load %arg13[%c1_112, %c0_113, %c0_114] : memref<4x8x8xf32, #tpu.memory_space<vmem>>, vector<1x8x8xf32>
      %183 = vector.shape_cast %182 : vector<1x8x8xf32> to vector<8x8xf32>
      %184 = vector.broadcast %181 : vector<8x1xf32> to vector<8x8xf32>
      %185 = arith.mulf %183, %184 : vector<8x8xf32>
      %c0_115 = arith.constant 0 : index
      %c8 = arith.constant 8 : index
      %186 = vector.load %arg14[%c0_115, %c8] : memref<8x32xf32, #tpu.memory_space<vmem>>, vector<8x8xf32>
      tpu.vector_store %arg14[%c0_115, %c8], %185 {strides = array<i32>} : memref<8x32xf32, #tpu.memory_space<vmem>>, vector<8x8xf32>,
      %c2_116 = arith.constant 2 : index
      %c0_117 = arith.constant 0 : index
      %c0_118 = arith.constant 0 : index
      %187 = vector.load %arg12[%c2_116, %c0_117, %c0_118] : memref<4x8x1xf32, #tpu.memory_space<vmem>>, vector<1x8x1xf32>
      %188 = vector.shape_cast %187 : vector<1x8x1xf32> to vector<8x1xf32>
      %cst_119 = arith.constant 1.000000e+00 : f32
      %189 = vector.broadcast %cst_119 : f32 to vector<8x1xf32>
      %190 = arith.divf %189, %188 : vector<8x1xf32>
      %c2_120 = arith.constant 2 : index
      %c0_121 = arith.constant 0 : index
      %c0_122 = arith.constant 0 : index
      %191 = vector.load %arg13[%c2_120, %c0_121, %c0_122] : memref<4x8x8xf32, #tpu.memory_space<vmem>>, vector<1x8x8xf32>
      %192 = vector.shape_cast %191 : vector<1x8x8xf32> to vector<8x8xf32>
      %193 = vector.broadcast %190 : vector<8x1xf32> to vector<8x8xf32>
      %194 = arith.mulf %192, %193 : vector<8x8xf32>
      %c0_123 = arith.constant 0 : index
      %c16 = arith.constant 16 : index
      %195 = vector.load %arg14[%c0_123, %c16] : memref<8x32xf32, #tpu.memory_space<vmem>>, vector<8x8xf32>
      tpu.vector_store %arg14[%c0_123, %c16], %194 {strides = array<i32>} : memref<8x32xf32, #tpu.memory_space<vmem>>, vector<8x8xf32>,
      %c3_124 = arith.constant 3 : index
      %c0_125 = arith.constant 0 : index
      %c0_126 = arith.constant 0 : index
      %196 = vector.load %arg12[%c3_124, %c0_125, %c0_126] : memref<4x8x1xf32, #tpu.memory_space<vmem>>, vector<1x8x1xf32>
      %197 = vector.shape_cast %196 : vector<1x8x1xf32> to vector<8x1xf32>
      %cst_127 = arith.constant 1.000000e+00 : f32
      %198 = vector.broadcast %cst_127 : f32 to vector<8x1xf32>
      %199 = arith.divf %198, %197 : vector<8x1xf32>
      %c3_128 = arith.constant 3 : index
      %c0_129 = arith.constant 0 : index
      %c0_130 = arith.constant 0 : index
      %200 = vector.load %arg13[%c3_128, %c0_129, %c0_130] : memref<4x8x8xf32, #tpu.memory_space<vmem>>, vector<1x8x8xf32>
      %201 = vector.shape_cast %200 : vector<1x8x8xf32> to vector<8x8xf32>
      %202 = vector.broadcast %199 : vector<8x1xf32> to vector<8x8xf32>
      %203 = arith.mulf %201, %202 : vector<8x8xf32>
      %c0_131 = arith.constant 0 : index
      %c24 = arith.constant 24 : index
      %204 = vector.load %arg14[%c0_131, %c24] : memref<8x32xf32, #tpu.memory_space<vmem>>, vector<8x8xf32>
      tpu.vector_store %arg14[%c0_131, %c24], %203 {strides = array<i32>} : memref<8x32xf32, #tpu.memory_space<vmem>>, vector<8x8xf32>,
      %c0_132 = arith.constant 0 : index
      %c0_133 = arith.constant 0 : index
      %205 = vector.load %arg14[%c0_132, %c0_133] : memref<8x32xf32, #tpu.memory_space<vmem>>, vector<8x32xf32>
      %c0_134 = arith.constant 0 : index
      %c0_135 = arith.constant 0 : index
      %206 = vector.load %arg6[%c0_134, %c0_135] : memref<32x32xf32, #tpu.memory_space<vmem>>, vector<32x32xf32>
      %cst_136 = arith.constant dense<0.000000e+00> : vector<8x32xf32>
      %207 = tpu.matmul %205, %206, %cst_136 {dimension_numbers = #tpu.dot_dimension_numbers<[1], [0], [0], [1], [0, 0, 1, 1], [], []>, precision = #tpu.contract_precision<fp32>} : vector<8x32xf32>, vector<32x32xf32>, vector<8x32xf32> -> vector<8x32xf32>
      %c0_137 = arith.constant 0 : index
      %c0_138 = arith.constant 0 : index
      %208 = vector.load %arg7[%c0_137, %c0_138] : memref<1x32xf32, #tpu.memory_space<vmem>>, vector<1x32xf32>
      %209 = vector.broadcast %208 : vector<1x32xf32> to vector<8x32xf32>
      %210 = arith.addf %207, %209 : vector<8x32xf32>
      %c0_139 = arith.constant 0 : index
      %c0_140 = arith.constant 0 : index
      %c0_141 = arith.constant 0 : index
      %211 = vector.load %arg8[%c0_139, %c0_140, %c0_141] : memref<1x8x32xf32, #tpu.memory_space<vmem>>, vector<1x8x32xf32>
      %212 = vector.shape_cast %211 : vector<1x8x32xf32> to vector<8x32xf32>
      %213 = vector.shape_cast %210 : vector<8x32xf32> to vector<1x8x32xf32>
      tpu.vector_store %arg8[%c0_139, %c0_140, %c0_141], %213 {strides = array<i32>} : memref<1x8x32xf32, #tpu.memory_space<vmem>>, vector<1x8x32xf32>,
    } else {
    }
    return
  }
  func.func @transform_0(%arg0: i32, %arg1: i32, %arg2: i32) -> (i32, i32, i32) {
    %c0_i32 = arith.constant 0 : i32
    %c0_i32_0 = arith.constant 0 : i32
    return %arg0, %arg1, %c0_i32 : i32, i32, i32
  }
  func.func @transform_1(%arg0: i32, %arg1: i32, %arg2: i32) -> (i32, i32) {
    %c0_i32 = arith.constant 0 : i32
    %c0_i32_0 = arith.constant 0 : i32
    %c0_i32_1 = arith.constant 0 : i32
    return %c0_i32, %c0_i32_0 : i32, i32
  }
  func.func @transform_2(%arg0: i32, %arg1: i32, %arg2: i32) -> (i32, i32) {
    %c0_i32 = arith.constant 0 : i32
    %c0_i32_0 = arith.constant 0 : i32
    %c0_i32_1 = arith.constant 0 : i32
    return %c0_i32, %c0_i32_0 : i32, i32
  }
  func.func @transform_3(%arg0: i32, %arg1: i32, %arg2: i32) -> (i32, i32) {
    %c0_i32 = arith.constant 0 : i32
    %c0_i32_0 = arith.constant 0 : i32
    %c0_i32_1 = arith.constant 0 : i32
    return %c0_i32, %c0_i32_0 : i32, i32
  }
  func.func @transform_4(%arg0: i32, %arg1: i32, %arg2: i32) -> (i32, i32) {
    %c0_i32 = arith.constant 0 : i32
    %c0_i32_0 = arith.constant 0 : i32
    %c0_i32_1 = arith.constant 0 : i32
    return %c0_i32, %c0_i32_0 : i32, i32
  }
  func.func @transform_5(%arg0: i32, %arg1: i32, %arg2: i32) -> (i32, i32, i32) {
    %c0_i32 = arith.constant 0 : i32
    %c0_i32_0 = arith.constant 0 : i32
    return %arg0, %arg1, %c0_i32 : i32, i32, i32
  }
}

</mosaic_0001>

<bundles_post_ra>
// kernel: tpu_custom_call.1
= control target key start
LH: loop header
LB: loop body
LE: loop exit
PB: predicated region body
PF: predicated region fallthrough
CT: control target
= control target key end

     0   :  { %s4922_s0 = inlined_call_operand.hbm [shape: f32[2,16,32], index: 0, kind: input, shape index: {}]   ;;  %s4923_s1 = inlined_call_operand.hbm [shape: f32[32,32], index: 1, kind: input, shape index: {}]   ;;  %s4924_s2 = inlined_call_operand.hbm [shape: f32[32,64], index: 2, kind: input, shape index: {}]   ;;  %s4925_s3 = inlined_call_operand.hbm [shape: f32[32,32], index: 3, kind: input, shape index: {}]   ;;  %s4926_s4 = inlined_call_operand.vmem [shape: f32[1,32], index: 4, kind: input, shape index: {}]   ;;  %s4927_s5 = inlined_call_operand.hbm [shape: f32[2,16,32], index: 5, kind: output, shape index: {}]  }
   0x1   :  { %4937 = sst [smem:[#allocation28_spill]] %s4923_s1 }
   0x2   :  { %4938 = sst [smem:[#allocation29_spill]] %s4924_s2 }
   0x3   :  { %4939 = sst [smem:[#allocation30_spill]] %s4925_s3 }
   0x4   :  { %4940 = sst [smem:[#allocation31_spill]] %s4927_s5 }
   0x5   :  { %10 = vsyncpa [#allocation9], 0 }
   0x6   :  { %12 = vsyncpa [#allocation9 + $0x1], 0 }
   0x7   :  { %13 = vsyncpa [#allocation12], 0 }
   0x8   :  { %14 = vsyncpa [#allocation15], 0 }
   0x9   :  { %15 = vsyncpa [#allocation10], 0 }
   0xa   :  { %17 = vsyncpa [#allocation10 + $0x1], 0  ;;  %s4453_s18 = smov 0   ;;  %s4455_s19 = smov 0  }
   0xb   :  { %s4457_s20 = smov 0   ;;  %s4459_s21 = smov 0  }
   0xc   :  { %s4461_s22 = smov 0   ;;  %s4463_s23 = smov 0  }
   0xd   :  { %s4465_s24 = smov 0   ;;  %s4467_s25 = smov 0  }
   0xe   :  { %s4469_s26 = smov 0   ;;  %s4471_s27 = smov 0  }
   0xf LB: > { %4941 = sst [smem:[#allocation21_spill]] %s4359_s18  ;;  %s4928_s28 = sadd.s32 4294967295, %s4395_s27   ;;  %s4395_s27 = sphi %s4471_s27, %s23_s27   ;;  %s4391_s26 = sphi %s4469_s26, %s4973_s26   ;;  %s4387_s25 = sphi %s4467_s25, %s4972_s25   ;;  %s4383_s24 = sphi %s4465_s24, %s4964_s24   ;;  %s4379_s23 = sphi %s4463_s23, %s4971_s23   ;;  %s4375_s22 = sphi %s4461_s22, %s4970_s22   ;;  %s4371_s21 = sphi %s4459_s21, %s4963_s21   ;;  %s4367_s20 = sphi %s4457_s20, %s4969_s20   ;;  %s4363_s19 = sphi %s4455_s19, %s4968_s19   ;;  %s4359_s18 = sphi %s4453_s18, %s4967_s18  }
  0x10   : > { %4942 = sst [smem:[#allocation22_spill]] %s4383_s24  ;;  %p3934_p0 = scmp.ge.s32.totalorder %s4395_s27, 1 }
  0x11   : > { %p4507_p1 = scmp.eq.s32.totalorder %s4928_s28, 0  ;;  %p187_p2 = scmp.lt.s32.totalorder %s4395_s27, 9 }
  0x12   : > { %s4944_s1 = sld [smem:[#allocation28_spill]]  ;;  %s4397_s9 = smov [#allocation11]  }
  0x13   : > { %p4515_p3 = pnand %p3934_p0, %p187_p2  ;;  %s200_s10 = sshll.u32 %s4397_s9, 4  ;;  %s201_s10 = int_to_ptr.vmem [resolvable:$true] %s200_s10 }
  0x14   : > { %s4947_s2 = sld [smem:[#allocation29_spill]]  ;;  %s4398_s15 = smov 128  }
  0x15   : > { %p3974_p4 = pneg %p4515_p3  ;;  %s4399_s16 = smov 8  }
  0x16   : > { %s4400_s17 = smov [#allocation13]   ;;  %s4948_s3 = sld [smem:[#allocation30_spill]] }
  0x17   : > { %p4523_p5 = pnand %p3974_p4, %p4507_p1  ;;  %s214_s30 = sshll.u32 %s4400_s17, 4  ;;  %s215_s30 = int_to_ptr.vmem [resolvable:$true] %s214_s30 }
  0x18   : > { %s198_s7 = sshll.u32 %s4944_s1, 4  ;;  %s4401_s13 = smov [#allocation14]   ;;  %s199_s7 = int_to_ptr.hbm [resolvable:$true] %s198_s7 }
  0x19   : > { %3977 = dma.hbm_to_vmem [thread:$0]  (!%p4523_p5), %s199_s7, 512, %s201_s10, [#allocation12], %s4398_s15, %s4398_s15, %s4399_s16  }
  0x1a   : > { %s212_s14 = sshll.u32 %s4947_s2, 4  ;;  %s228_s7 = sshll.u32 %s4401_s13, 4  ;;  %s213_s14 = int_to_ptr.hbm [resolvable:$true] %s212_s14  ;;  %s229_s7 = int_to_ptr.vmem [resolvable:$true] %s228_s7 }
  0x1b   : > { %3980 = dma.hbm_to_vmem [thread:$0]  (!%p4523_p5), %s213_s14, 512, %s215_s30, [#allocation12], %s4398_s15, %s4398_s15, %s4399_s16  }
  0x1c   : > { %s226_s12 = sshll.u32 %s4948_s3, 4  ;;  %s3933_s10 = sadd.s32 4294967294, %s4395_s27   ;;  %s227_s12 = int_to_ptr.hbm [resolvable:$true] %s226_s12 }
  0x1d   : > { %3983 = dma.hbm_to_vmem [thread:$0]  (!%p4523_p5), %s227_s12, 512, %s229_s7, [#allocation15], %s4398_s15, %s4398_s15, %s4399_s16  }
  0x1e   : > { %s35_s17 = sadd.s32 1, %s4383_s24  ;;  %s38_s6 = sadd.s32 1, %s4387_s25 }
  0x1f   : > { %p36_p6 = scmp.ge.s32.totalorder %s35_s17, 2  ;;  %s42_s9 = sadd.s32 1, %s4391_s26 }
  0x20   : > { %s51_s28 = sadd.s32 1, %s4367_s20  ;;  %p58_p7 = scmp.ne.s32.totalorder %s4367_s20, %s4363_s19 }
  0x21   : > { %s4975_s17 = smov (%p36_p6, %s35_s17), 0  ;;  %s4977_s6 = smov (!%p36_p6, %s38_s6), %s4387_s25 }
  0x22   : > { %4949 = sst [smem:[#allocation23_spill]] %s4975_s17  ;;  %p59_p8 = scmp.eq.s32.totalorder %s4395_s27, 0 }
  0x23   : > { %p64_p9 = scmp.ne.s32.totalorder %s4363_s19, %s4359_s18  ;;  %p40_p10 = scmp.ge.s32.totalorder %s4977_s6, 2 }
  0x24   : > { %s4950_s11 = sadd.s32 4294967295, %s4395_s27   ;;  %p4554_p12 = por %p59_p8, %p58_p7 }
  0x25   : > { %p174_p11 = scmp.eq.s32.totalorder %s4950_s11, 7  ;;  %p4563_p13 = por %p4507_p1, %p64_p9 }
  0x26   : > { %s4979_s6 = smov (%p40_p10, %s4977_s6), 0  ;;  %s4981_s9 = smov (!%p40_p10, %s42_s9), %s4391_s26 }
  0x27   : > { %4953 = sst [smem:[#allocation24_spill]] %s4979_s6  ;;  %s47_s16 = ssub.s32 %s4387_s25, %s4979_s6 }
  0x28   : > { %p4572_p0 = por %p174_p11, %p58_p7  ;;  %p44_p2 = scmp.ge.s32.totalorder %s4981_s9, 2 }
  0x29   : > { %p180_p4 = scmp.eq.s32.totalorder %s3933_s10, 7  ;;  %p3995_p5 = scmp.lt.s32.totalorder %s4395_s27, 8 }
  0x2a   : > { %s4954_s30 = scalar_select %p4572_p0, 1, 0 }
  0x2b   : > { %s245_s12 = sand.u32 1, %s4367_s20   ;;  %s4983_s9 = smov (%p44_p2, %s4981_s9), 0 }
  0x2c   : > { %4955 = sst [smem:[#allocation25_spill]] %s4954_s30  ;;  %p4583_p6 = por %p180_p4, %p64_p9 }
  0x2d   : > { %4956 = sst [smem:[#allocation26_spill]] %s4983_s9  ;;  %s46_s7 = ssub.s32 %s4391_s26, %s4983_s9 }
  0x2e   : > { %s4957_s13 = scalar_select %p4583_p6, 1, 0 }
  0x2f   : > { %s3939_s11 = sshll.u32 %s245_s12, 3  ;;  %s48_s1 = sor.u32 %s47_s16, %s46_s7 }
  0x30   : > { %4958 = sst [smem:[#allocation27_spill]] %s4957_s13  ;;  %p49_p7 = scmp.eq.s32.totalorder %s48_s1, 0 }
  0x31   : > { %s3940_s2 = sshll.u32 %s4391_s26, 1  ;;  %s249_s6 = scalar_lea.vmem [#allocation8], %s3939_s11 }
  0x32   : > { %s253_s3 = sadd.s32 %s4387_s25, %s3940_s2  ;;  %s259_s10 = sshll.u32 %s249_s6, 4  ;;  %s260_s10 = int_to_ptr.vmem [resolvable:$true] %s259_s10 }
  0x33   : > { %s4592_s17 = scalar_select %p49_p7, %s4367_s20, %s51_s28  }
  0x34   : > { %s3941_s24 = sshll.u32 %s253_s3, 3  ;;  %p3985_p8 = pnand %p3995_p5, %p4554_p12 }
  0x35   : > { %s255_s18 = scalar_lea.hbm %s4922_s0, %s3941_s24  ;;  %s246_s9 = scalar_lea.sflag [#allocation9], %s245_s12 }
  0x36   : > { %s257_s13 = sshll.u32 %s255_s18, 4  ;;  %268 = sbr.rel (%p4515_p3) target bundleno = 4330 (0x10ea), region = 40  ;;  %s258_s13 = int_to_ptr.hbm [resolvable:$true] %s257_s13 }
  0x37   : > { %3987 = dma.hbm_to_vmem [thread:$0]  (!%p3985_p8), %s258_s13, 128, %s260_s10, %s246_s9  }
  0x38   : > { %s4604_s1 = sand.u32 (!%p4515_p3), 1, %s4363_s19  }
  0x39   : > { %s3943_s2 = sshll.u32 (!%p4515_p3), %s4604_s1, 3  ;;  %s271_s3 = scalar_lea.sflag (!%p4515_p3), [#allocation9], %s4604_s1 }
  0x3a   : > { %s4608_s5 = scalar_lea.vmem (!%p4515_p3), [#allocation8], %s3943_s2 }
  0x3b   : > { %4342 = dma.done.wait (%p4563_p13), %s271_s3, 128  }
  0x3c   : > { %4344 = vsyncadd (%p4563_p13), %s271_s3, 4294967168 }
  0x3d   : > { %4346 = dma.done.wait (%p4507_p1), [#allocation12], 1024  }
  0x3e   : > { %4348 = vsyncadd (%p4507_p1), [#allocation12], 4294966272 }
  0x3f   : > { %4350 = dma.done.wait (%p4507_p1), [#allocation15], 512  }
  0x40   : > { %4352 = vsyncadd (%p4507_p1), [#allocation15], 4294966784  ;;  %s4622_s18 = scalar_lea.vmem [#allocation16], %s3943_s2  ;;  %p3948_p3 = scmp.ne.s32.totalorder %s4371_s21, 0 }
  0x42   : > { %320 = sbr.rel (%p3948_p3) target bundleno = 228 (0xe4), region = 60 }
  0x47   : > { %v325_v0 = vld [vmem:[#allocation11 + $0x18] sm:$0xff]  ;;  %v324_v1 = vld [vmem:[#allocation11 + $0x10] sm:$0xff]  ;;  %v323_v2 = vld [vmem:[#allocation11 + $0x8] sm:$0xff]  ;;  %vm326_vm0 = vcmask 261120   ;;  %vm517_vm1 = vcmask 7168   ;;  %v4402_v31 = vmov -inf  }
  0x48   : > { %v342_v3 = vand.u32 4294901760, %v325_v0  ;;  %v344_v4 = vand.u32 4294901760, %v324_v1  ;;  %v346_v5 = vand.u32 4294901760, %v323_v2  ;;  %v322_v6 = vld [vmem:[#allocation11] sm:$0xff]  ;;  %v321_v7 = vld [vmem:[%s4608_s5] sm:$0xff]  ;;  %518 = vst.msk [vmem:[#allocation4] sm:$0xff] %vm517_vm1, %v4402_v31 }
  0x49   : > { %v348_v8 = vand.u32 4294901760, %v322_v6  ;;  %v328_v9 = vsel %vm326_vm0, %v321_v7, 0  ;;  %519 = vst.msk [vmem:[#allocation4 + $0x8] sm:$0xff] %vm517_vm1, %v4402_v31  ;;  %v4403_v32 = vmov 0.0   ;;  %vm526_vm2 = vcmask 64512  }
  0x4a   : > { %v372_v10 = vsub.f32 %v325_v0, %v342_v3  ;;  %343 = vmatpush.msra.mxu0 %v342_v3  ;;  %v378_v11 = vsub.f32 %v324_v1, %v344_v4  ;;  %443 = vmatpush.msra.mxu3 %v342_v3  ;;  %v384_v12 = vsub.f32 %v323_v2, %v346_v5  ;;  %v350_v13 = vand.u32 4294901760, %v328_v9 }
  0x4b   : > { %v390_v14 = vsub.f32 %v322_v6, %v348_v8  ;;  %520 = vst.msk [vmem:[#allocation4 + $0x10] sm:$0xff] %vm517_vm1, %v4402_v31 }
  0x4c   : > { %414 = vmatpush.msra.mxu2 %v372_v10  ;;  %345 = vmatpush.msra.mxu0 %v344_v4  ;;  %v373_v15 = vand.u32 4294901760, %v372_v10  ;;  %v379_v16 = vand.u32 4294901760, %v378_v11  ;;  %v351_v17 = vsub.f32 %v328_v9, %v350_v13  ;;  %v385_v18 = vand.u32 4294901760, %v384_v12  ;;  %521 = vst.msk [vmem:[#allocation4 + $0x18] sm:$0xff] %vm517_vm1, %v4402_v31 }
  0x4d   : > { %445 = vmatpush.msra.mxu3 %v344_v4  ;;  %v391_v19 = vand.u32 4294901760, %v390_v14  ;;  %522 = vst.msk [vmem:[#allocation5] sm:$0xff] %vm517_vm1, %v4403_v32 }
  0x4e   : > { %417 = vmatpush.msra.mxu2 %v378_v11  ;;  %v374_v20 = vsub.f32 %v372_v10, %v373_v15  ;;  %347 = vmatpush.msra.mxu0 %v346_v5  ;;  %v380_v21 = vsub.f32 %v378_v11, %v379_v16  ;;  %v386_v22 = vsub.f32 %v384_v12, %v385_v18  ;;  %v352_v23 = vand.u32 4294901760, %v351_v17 }
  0x4f   : > { %447 = vmatpush.msra.mxu3 %v346_v5  ;;  %v392_v27 = vsub.f32 %v390_v14, %v391_v19  ;;  %523 = vst.msk [vmem:[#allocation5 + $0x8] sm:$0xff] %vm517_vm1, %v4403_v32 }
  0x50   : > { %v375_v24 = vand.u32 4294901760, %v374_v20  ;;  %420 = vmatpush.msra.mxu2 %v384_v12  ;;  %v381_v25 = vand.u32 4294901760, %v380_v21  ;;  %349 = vmatpush.msra.mxu0 %v348_v8  ;;  %v353_v26 = vsub.f32 %v351_v17, %v352_v23  ;;  %v387_v28 = vand.u32 4294901760, %v386_v22  ;;  %524 = vst.msk [vmem:[#allocation5 + $0x10] sm:$0xff] %vm517_vm1, %v4403_v32 }
  0x51   : > { %449 = vmatpush.msra.mxu3 %v348_v8  ;;  %v393_v30 = vand.u32 4294901760, %v392_v27  ;;  %525 = vst.msk [vmem:[#allocation5 + $0x18] sm:$0xff] %vm517_vm1, %v4403_v32 }
  0x52   : > { %472 = vmatpush.msrb.mxu0 %v373_v15  ;;  %376 = vmatpush.msra.mxu1 %v375_v24  ;;  %v354_v29 = vand.u32 4294901760, %v353_v26  ;;  %527 = vst.msk [vmem:[#allocation6] sm:$0xff] %vm526_vm2, %v4403_v32 }
  0x53   : > { %423 = vmatpush.msra.mxu2 %v390_v14  ;;  %453 = vmatmul.f32.vlgmr.msra.gmra.mxu3 %v352_v23  ;;  %528 = vst.msk [vmem:[#allocation6 + $0x8] sm:$0xff] %vm526_vm2, %v4403_v32 }
  0x54   : > { %426 = vmatmul.f32.vlgmr.msra.gmra.mxu2 %v351_v17  ;;  %382 = vmatpush.msra.mxu1 %v381_v25  ;;  %529 = vst.msk [vmem:[#allocation6 + $0x10] sm:$0xff] %vm526_vm2, %v4403_v32 }
  0x55   : > { %355 = vmatmul.f32.vlgmr.msra.gmra.mxu0 %v354_v29  ;;  %530 = vst.msk [vmem:[#allocation6 + $0x18] sm:$0xff] %vm526_vm2, %v4403_v32 }
  0x56   : > { %476 = vmatpush.msrb.mxu0 %v379_v16  ;;  %388 = vmatpush.msra.mxu1 %v387_v28 }
  0x58   : > { %480 = vmatpush.msrb.mxu0 %v385_v18  ;;  %394 = vmatpush.msra.mxu1 %v393_v30 }
  0x59   : > { %396 = vmatmul.f32.vlgmr.msra.gmra.mxu1 %v350_v13 }
  0x5a   : > { %484 = vmatpush.msrb.mxu0 %v391_v19  ;;  %503 = vmatpush.msrb.mxu1 %v342_v3 }
  0x5c   : > { %505 = vmatpush.msrb.mxu1 %v344_v4 }
  0x5d   : > { %486 = vmatmul.f32.vlgmr.msrb.gmra.mxu0 %v350_v13 }
  0x5e   : > { %507 = vmatpush.msrb.mxu1 %v346_v5 }
  0x60   : > { %509 = vmatpush.msrb.mxu1 %v348_v8 }
  0x61   : > { %511 = vmatmul.f32.vlgmr.msrb.gmra.mxu1 %v350_v13 }
  0xd2   : > { %v356_v33 = vpop.f32.mrf.mxu0 }
  0xd6   : > { %v397_v34 = vpop.f32.mrf.mxu1  ;;  %v454_v37 = vpop.f32.mrf.mxu3 }
  0xd7   : > { %v427_v35 = vpop.f32.mrf.mxu2  ;;  %v398_v36 = vadd.f32 %v397_v34, %v356_v33 }
  0xd9   : > { %v428_v38 = vadd.f32 %v427_v35, %v398_v36 }
  0xda   : > { %v487_v39 = vpop.f32.mrf.mxu0 }
  0xdb   : > { %v455_v40 = vadd.f32 %v454_v37, %v428_v38 }
  0xdd   : > { %v488_v41 = vadd.f32 %v487_v39, %v455_v40 }
  0xde   : > { %v512_v42 = vpop.f32.mrf.mxu1 }
  0xdf   : > { %v513_v43 = vadd.f32 %v512_v42, %v488_v41 }
  0xe1   : > { %v515_v44 = vmul.f32 0.35355338, %v513_v43 }
  0xe3   : > { %516 = vst.msk [vmem:[#allocation2] sm:$0xff] %vm326_vm0, %v515_v44 }
  0xe4 PF: > { %p3949_p1 = scmp.ge.s32.totalorder %s4371_s21, %s4375_s22 }
  0xe5   : > { %s3950_s24 = sshll.u32 (!%p3949_p1), %s4371_s21, 3  ;;  %s4404_s29 = smov (!%p3949_p1), 96  }
  0xe6   : > { %534 = sbr.rel (%p3949_p1) target bundleno = 2002 (0x7d2), region = 64  ;;  %s536_s28 = scalar_lea.vmem (!%p3949_p1), [#allocation3], %s3950_s24 }
  0xe7   : > { %s4405_s8 = smov (!%p3949_p1), 120   ;;  %s4407_s6 = smov (!%p3949_p1), 88  }
  0xe8   : > { %s4408_s9 = smov (!%p3949_p1), 112   ;;  %s4409_s14 = smov (!%p3949_p1), 80  }
  0xe9   : > { %s4410_s15 = smov (!%p3949_p1), 104   ;;  %s4411_s16 = smov (!%p3949_p1), 72  }
  0xeb   : > { %vm539_vm3 = vcmask 64512   ;;  %v4631_v45 = vld [vmem:[#allocation2] sm:$0xff]  ;;  %v4406_v7 = vmov 0   ;;  %v4643_v11 = vld [vmem:[#allocation4] sm:$0xff]  ;;  %vm714_vm4 = vcmask 7168  }
  0xec   : > { %v541_v46 = vsel %vm539_vm3, %v4631_v45, 0  ;;  %v4635_v47 = vld [vmem:[%s536_s28] sm:$0xff]  ;;  %878 = vrot.lane.b32.xlu2 %v4631_v45, %s4405_s8  ;;  %4106 = vset.pattern.permute.xlu0 %v4406_v7 }
  0xed   : > { %v563_v48 = vand.u32 4294901760, %v541_v46  ;;  %v544_v49 = vsel %vm539_vm3, %v4635_v47, 0  ;;  %723 = vrot.lane.b32.xlu1 %v4635_v47, %s4404_s29  ;;  %4108 = vset.pattern.permute.xlu2 %v4406_v7 }
  0xee   : > { %v561_v50 = vand.u32 4294901760, %v544_v49  ;;  %4107 = vset.pattern.permute.xlu1 %v4406_v7 }
  0xef   : > { %v564_v51 = vsub.f32 %v541_v46, %v563_v48 }
  0xf0   : > { %v588_v52 = vsub.f32 %v544_v49, %v561_v50  ;;  %562 = vmatpush.xpose.msra.mxu0 %v561_v50  ;;  %638 = vmatpush.xpose.msra.mxu3 %v561_v50 }
  0xf1   : > { %v565_v53 = vand.u32 4294901760, %v564_v51 }
  0xf2   : > { %615 = vmatpush.xpose.msra.mxu2 %v588_v52  ;;  %v589_v54 = vand.u32 4294901760, %v588_v52 }
  0xf3   : > { %v566_v55 = vsub.f32 %v564_v51, %v565_v53  ;;  %642 = vmatmul.f32.vlgmr.msra.gmra.mxu3 %v565_v53 }
  0xf4   : > { %v590_v56 = vsub.f32 %v588_v52, %v589_v54  ;;  %664 = vmatpush.xpose.msrb.mxu0 %v589_v54 }
  0xf5   : > { %v567_v57 = vand.u32 4294901760, %v566_v55  ;;  %618 = vmatmul.f32.vlgmr.msra.gmra.mxu2 %v564_v51  ;;  %880 = vrot.lane.b32.xlu1 %v4635_v47, %s4405_s8 }
  0xf6   : > { %v591_v58 = vand.u32 4294901760, %v590_v56 }
  0xf7   : > { %568 = vmatmul.f32.vlgmr.msra.gmra.mxu0 %v567_v57 }
  0xf8   : > { %592 = vmatpush.xpose.msra.mxu1 %v591_v58 }
  0xfb   : > { %594 = vmatmul.f32.vlgmr.msra.gmra.mxu1 %v563_v48 }
  0xfc   : > { %686 = vmatpush.xpose.msrb.mxu1 %v561_v50 }
  0xff   : > { %666 = vmatmul.f32.vlgmr.msrb.gmra.mxu0 %v563_v48 }
 0x103   : > { %688 = vmatmul.f32.vlgmr.msrb.gmra.mxu1 %v563_v48 }
 0x146   : > { %v879_v25 = vpop.permute.xlu2 %878 }
 0x147   : > { %v882_v28 = vsel %vm539_vm3, %v879_v25, 0 }
 0x148   : > { %v903_v30 = vand.u32 4294901760, %v882_v28 }
 0x14a   : > { %v904_v31 = vsub.f32 %v882_v28, %v903_v30 }
 0x14c   : > { %v905_v34 = vand.u32 4294901760, %v904_v31 }
 0x14e   : > { %v906_v37 = vsub.f32 %v904_v31, %v905_v34 }
 0x150   : > { %v907_v40 = vand.u32 4294901760, %v906_v37 }
 0x15f   : > { %v724_v8 = vpop.permute.xlu1 %723 }
 0x160   : > { %v744_v9 = vand.u32 4294901760, %v724_v8 }
 0x162   : > { %v771_v10 = vsub.f32 %v724_v8, %v744_v9  ;;  %745 = vmatpush.msrb.mxu2 %v744_v9  ;;  %821 = vmatpush.msra.mxu1 %v744_v9 }
 0x164   : > { %798 = vmatpush.msra.mxu0 %v771_v10  ;;  %v772_v15 = vand.u32 4294901760, %v771_v10 }
 0x166   : > { %v773_v18 = vsub.f32 %v771_v10, %v772_v15  ;;  %847 = vmatpush.msra.mxu2 %v772_v15 }
 0x167   : > { %v881_v16 = vpop.permute.xlu1 %880 }
 0x168   : > { %v884_v17 = vsel %vm539_vm3, %v881_v16, 0  ;;  %v774_v20 = vand.u32 4294901760, %v773_v18 }
 0x169   : > { %v901_v19 = vand.u32 4294901760, %v884_v17 }
 0x16a   : > { %775 = vmatpush.msrb.mxu3 %v774_v20 }
 0x16b   : > { %v928_v21 = vsub.f32 %v884_v17, %v901_v19  ;;  %902 = vmatpush.xpose.msrb.mxu0 %v901_v19 }
 0x16c   : > { %869 = vmatpush.msra.mxu3 %v744_v9 }
 0x16d   : > { %v929_v22 = vand.u32 4294901760, %v928_v21 }
 0x16f   : > { %v930_v23 = vsub.f32 %v928_v21, %v929_v22 }
 0x171   : > { %v931_v24 = vand.u32 4294901760, %v930_v23 }
 0x173   : > { %932 = vmatpush.xpose.msrb.mxu1 %v931_v24 }
 0x174   : > { %v569_v59 = vpop.f32.mrf.mxu0 }
 0x176   : > { %v643_v63 = vpop.f32.mrf.mxu3 }
 0x178   : > { %v595_v60 = vpop.f32.mrf.mxu1  ;;  %v619_v61 = vpop.f32.mrf.mxu2 }
 0x179   : > { %v596_v62 = vadd.f32 %v595_v60, %v569_v59 }
 0x17b   : > { %v620_v0 = vadd.f32 %v619_v61, %v596_v62 }
 0x17c   : > { %v667_v1 = vpop.f32.mrf.mxu0 }
 0x17d   : > { %v644_v2 = vadd.f32 %v643_v63, %v620_v0 }
 0x17f   : > { %v668_v3 = vadd.f32 %v667_v1, %v644_v2 }
 0x180   : > { %v689_v4 = vpop.f32.mrf.mxu1 }
 0x181   : > { %v690_v5 = vadd.f32 %v689_v4, %v668_v3  ;;  %v4662_v3 = vld [vmem:[#allocation4 + $0x8] sm:$0xff] }
 0x183   : > { %v693_v6 = vsel %vm539_vm3, %v690_v5, -inf }
 0x184   : > { %694 = vmax.xlane.f32.xlu0 %v693_v6 }
 0x1f7   : > { %v695_v12 = vpop.xlane.xlu0 %694 }
 0x1f8   : > { %v4646_v13 = vmax.f32 %v4643_v11, %v695_v12 }
 0x1fa   : > { %v697_v14 = vsub.f32 %v4643_v11, %v4646_v13  ;;  %877 = vst.msk [vmem:[#allocation4] sm:$0xff] %vm714_vm4, %v4646_v13  ;;  %702 = vperm.xlu0 %4106, %v4646_v13   ;;  %v716_v13 = vld [vmem:[#allocation6] sm:$0xff] }
 0x26c   : > { %v703_v26 = vpop.permute.xlu0 %702 }
 0x26d   : > { %v705_v27 = vsub.f32 %v690_v5, %v703_v26 }
 0x26f   : > { %v706_v29 = vmul.f32 1.442695, %v705_v27 }
 0x271   : > { %4109 = vpow2.f32 %v706_v29 }
 0x277   : > { %v4655_v32 = vpop.eup %4109 }
 0x278   : > { %v727_v33 = vsel %vm539_vm3, %v4655_v32, 0 }
 0x279   : > { %v746_v35 = vand.u32 4294901760, %v727_v33 }
 0x27b   : > { %777 = vmatmul.f32.vlgmr.msrb.gmra.mxu3 %v746_v35  ;;  %v747_v36 = vsub.f32 %v727_v33, %v746_v35 }
 0x27c   : > { %978 = vmatpush.xpose.msrb.mxu3 %v901_v19 }
 0x27d   : > { %801 = vmatmul.f32.vlgmr.msra.gmra.mxu0 %v747_v36  ;;  %v748_v38 = vand.u32 4294901760, %v747_v36 }
 0x27e   : > { %1004 = vmatpush.xpose.msra.mxu0 %v929_v22 }
 0x27f   : > { %825 = vmatmul.f32.vlgmr.msra.gmra.mxu1 %v748_v38  ;;  %v749_v39 = vsub.f32 %v747_v36, %v748_v38 }
 0x280   : > { %1026 = vmatpush.xpose.msra.mxu1 %v901_v19 }
 0x281   : > { %v750_v41 = vand.u32 4294901760, %v749_v39 }
 0x283   : > { %751 = vmatmul.f32.vlgmr.msrb.gmra.mxu2 %v750_v41  ;;  %871 = vmatmul.f32.vlgmr.msra.gmra.mxu3 %v746_v35 }
 0x284   : > { %955 = vmatpush.xpose.msrb.mxu2 %v928_v21 }
 0x285   : > { %908 = vmatmul.f32.vlgmr.msrb.gmra.mxu0 %v907_v40 }
 0x287   : > { %934 = vmatmul.f32.vlgmr.msrb.gmra.mxu1 %v903_v30 }
 0x28b   : > { %849 = vmatmul.f32.vlgmr.msra.gmra.mxu2 %v746_v35  ;;  %982 = vmatmul.f32.vlgmr.msrb.gmra.mxu3 %v905_v34 }
 0x28d   : > { %1006 = vmatmul.f32.vlgmr.msra.gmra.mxu0 %v903_v30 }
 0x28f   : > { %1028 = vmatmul.f32.vlgmr.msra.gmra.mxu1 %v903_v30 }
 0x293   : > { %958 = vmatmul.f32.vlgmr.msrb.gmra.mxu2 %v904_v31 }
 0x2fa   : > { %v802_v42 = vpop.f32.mrf.mxu0 }
 0x2fc   : > { %v826_v48 = vpop.f32.mrf.mxu1 }
 0x2fe   : > { %v778_v43 = vpop.f32.mrf.mxu3 }
 0x302   : > { %v909_v53 = vpop.f32.mrf.mxu0 }
 0x304   : > { %v935_v56 = vpop.f32.mrf.mxu1 }
 0x305   : > { %v936_v57 = vadd.f32 %v935_v56, %v909_v53 }
 0x306   : > { %v752_v44 = vpop.f32.mrf.mxu2  ;;  %v872_v54 = vpop.f32.mrf.mxu3 }
 0x307   : > { %v779_v46 = vadd.f32 %v778_v43, %v752_v44 }
 0x309   : > { %v803_v49 = vadd.f32 %v802_v42, %v779_v46 }
 0x30a   : > { %v1007_v62 = vpop.f32.mrf.mxu0 }
 0x30b   : > { %v827_v50 = vadd.f32 %v826_v48, %v803_v49 }
 0x30c   : > { %v1029_v0 = vpop.f32.mrf.mxu1 }
 0x30e   : > { %v850_v51 = vpop.f32.mrf.mxu2  ;;  %v983_v60 = vpop.f32.mrf.mxu3 }
 0x30f   : > { %v851_v52 = vadd.f32 %v850_v51, %v827_v50 }
 0x311   : > { %v4659_v55 = vadd.f32 %v872_v54, %v851_v52 }
 0x316   : > { %v959_v58 = vpop.f32.mrf.mxu2 }
 0x317   : > { %v960_v59 = vadd.f32 %v959_v58, %v936_v57 }
 0x319   : > { %v984_v61 = vadd.f32 %v983_v60, %v960_v59 }
 0x31b   : > { %v1008_v63 = vadd.f32 %v1007_v62, %v984_v61 }
 0x31d   : > { %v1030_v1 = vadd.f32 %v1029_v0, %v1008_v63 }
 0x31f   : > { %v1034_v2 = vsel %vm539_vm3, %v1030_v1, -inf }
 0x320   : > { %1035 = vmax.xlane.f32.xlu2 %v1034_v2 }
 0x338   : > { %1407 = vrot.lane.b32.xlu2 %v4635_v47, %s4409_s14 }
 0x393   : > { %v1036_v4 = vpop.xlane.xlu2 %1035 }
 0x394   : > { %v4665_v5 = vmax.f32 %v4662_v3, %v1036_v4  ;;  %v698_v4 = vmul.f32 1.442695, %v697_v14 }
 0x396   : > { %v1038_v6 = vsub.f32 %v4662_v3, %v4665_v5  ;;  %1219 = vst.msk [vmem:[#allocation4 + $0x8] sm:$0xff] %vm714_vm4, %v4665_v5  ;;  %1043 = vperm.xlu1 %4107, %v4665_v5  }
 0x39e   : > { %1065 = vrot.lane.b32.xlu1 %v4635_v47, %s4407_s6 }
 0x3a6   : > { %1222 = vrot.lane.b32.xlu1 %v4635_v47, %s4408_s9 }
 0x3ae   : > { %1220 = vrot.lane.b32.xlu1 %v4631_v45, %s4408_s9 }
 0x408   : > { %v1044_v7 = vpop.permute.xlu1 %1043 }
 0x409   : > { %v1046_v8 = vsub.f32 %v1030_v1, %v1044_v7 }
 0x40b   : > { %v1047_v9 = vmul.f32 1.442695, %v1046_v8 }
 0x40d   : > { %4111 = vpow2.f32 %v1047_v9  ;;  %v4693_v9 = vld [vmem:[#allocation4 + $0x10] sm:$0xff] }
 0x40e   : > { %4113 = vpow2.f32 %v698_v4 }
 0x410   : > { %v1066_v10 = vpop.permute.xlu1 %1065 }
 0x411   : > { %v1086_v12 = vand.u32 4294901760, %v1066_v10 }
 0x413   : > { %v4675_v15 = vpop.eup %4111  ;;  %v1113_v16 = vsub.f32 %v1066_v10, %v1086_v12  ;;  %1087 = vmatpush.msra.mxu2 %v1086_v12  ;;  %1163 = vmatpush.msrb.mxu1 %v1086_v12 }
 0x414   : > { %v1069_v17 = vsel %vm539_vm3, %v4675_v15, 0  ;;  %v4688_v7 = vpop.eup %4113  ;;  %v1052_v8 = vsel %vm539_vm3, %v4675_v15, 0.0 }
 0x415   : > { %v1114_v18 = vand.u32 4294901760, %v1113_v16  ;;  %1140 = vmatpush.msrb.mxu0 %v1113_v16  ;;  %v1088_v19 = vand.u32 4294901760, %v1069_v17 }
 0x417   : > { %v1115_v20 = vsub.f32 %v1113_v16, %v1114_v18  ;;  %1189 = vmatpush.msrb.mxu2 %v1114_v18  ;;  %v1089_v21 = vsub.f32 %v1069_v17, %v1088_v19  ;;  %v1408_v17 = vpop.permute.xlu2 %1407 }
 0x418   : > { %v1223_v22 = vpop.permute.xlu1 %1222  ;;  %v1428_v18 = vand.u32 4294901760, %v1408_v17 }
 0x419   : > { %v1116_v23 = vand.u32 4294901760, %v1115_v20  ;;  %v1226_v24 = vsel %vm539_vm3, %v1223_v22, 0  ;;  %1143 = vmatmul.f32.vlgmr.msrb.gmra.mxu0 %v1089_v21  ;;  %v1090_v25 = vand.u32 4294901760, %v1089_v21 }
 0x41a   : > { %v1243_v26 = vand.u32 4294901760, %v1226_v24 }
 0x41b   : > { %1117 = vmatpush.msra.mxu3 %v1116_v23  ;;  %1167 = vmatmul.f32.vlgmr.msrb.gmra.mxu1 %v1090_v25  ;;  %v1091_v27 = vsub.f32 %v1089_v21, %v1090_v25  ;;  %v1050_v23 = vld [vmem:[#allocation5 + $0x8] sm:$0xff] }
 0x41c   : > { %v1270_v28 = vsub.f32 %v1226_v24, %v1243_v26  ;;  %1119 = vmatmul.f32.vlgmr.msra.gmra.mxu3 %v1088_v19  ;;  %1244 = vmatpush.xpose.msra.mxu0 %v1243_v26 }
 0x41d   : > { %1211 = vmatpush.msrb.mxu3 %v1086_v12  ;;  %v1092_v29 = vand.u32 4294901760, %v1091_v27 }
 0x41e   : > { %v1271_v30 = vand.u32 4294901760, %v1270_v28 }
 0x41f   : > { %1320 = vmatpush.xpose.msra.mxu3 %v1243_v26  ;;  %1093 = vmatmul.f32.vlgmr.msra.gmra.mxu2 %v1092_v29 }
 0x420   : > { %v1272_v31 = vsub.f32 %v1270_v28, %v1271_v30  ;;  %v1221_v33 = vpop.permute.xlu1 %1220  ;;  %1297 = vmatpush.xpose.msra.mxu2 %v1270_v28  ;;  %1346 = vmatpush.xpose.msrb.mxu0 %v1271_v30 }
 0x421   : > { %v1224_v34 = vsel %vm539_vm3, %v1221_v33, 0 }
 0x422   : > { %v1273_v35 = vand.u32 4294901760, %v1272_v31  ;;  %v1245_v36 = vand.u32 4294901760, %v1224_v34 }
 0x424   : > { %v1246_v37 = vsub.f32 %v1224_v34, %v1245_v36  ;;  %1213 = vmatmul.f32.vlgmr.msrb.gmra.mxu3 %v1088_v19  ;;  %1274 = vmatpush.xpose.msra.mxu1 %v1273_v35 }
 0x426   : > { %v1247_v38 = vand.u32 4294901760, %v1246_v37 }
 0x427   : > { %1191 = vmatmul.f32.vlgmr.msrb.gmra.mxu2 %v1088_v19  ;;  %1276 = vmatmul.f32.vlgmr.msra.gmra.mxu1 %v1245_v36  ;;  %v1455_v19 = vsub.f32 %v1408_v17, %v1428_v18 }
 0x428   : > { %1368 = vmatpush.xpose.msrb.mxu1 %v1243_v26  ;;  %v1248_v39 = vsub.f32 %v1246_v37, %v1247_v38  ;;  %1429 = vmatpush.msrb.mxu2 %v1428_v18 }
 0x429   : > { %v1456_v20 = vand.u32 4294901760, %v1455_v19 }
 0x42a   : > { %v1249_v40 = vand.u32 4294901760, %v1248_v39 }
 0x42b   : > { %v1457_v21 = vsub.f32 %v1455_v19, %v1456_v20 }
 0x42c   : > { %1250 = vmatmul.f32.vlgmr.msra.gmra.mxu0 %v1249_v40  ;;  %1324 = vmatmul.f32.vlgmr.msra.gmra.mxu3 %v1247_v38 }
 0x42d   : > { %1505 = vmatpush.msra.mxu1 %v1428_v18  ;;  %1482 = vmatpush.msra.mxu0 %v1455_v19  ;;  %v1458_v22 = vand.u32 4294901760, %v1457_v21  ;;  %v1717_v19 = vld [vmem:[#allocation4 + $0x18] sm:$0xff] }
 0x42f   : > { %1300 = vmatmul.f32.vlgmr.msra.gmra.mxu2 %v1246_v37  ;;  %1370 = vmatmul.f32.vlgmr.msrb.gmra.mxu1 %v1245_v36 }
 0x430   : > { %1531 = vmatpush.msra.mxu2 %v1456_v20  ;;  %1459 = vmatpush.msrb.mxu3 %v1458_v22 }
 0x432   : > { %1553 = vmatpush.msra.mxu3 %v1428_v18 }
 0x434   : > { %1348 = vmatmul.f32.vlgmr.msrb.gmra.mxu0 %v1245_v36 }
 0x496   : > { %v1144_v44 = vpop.f32.mrf.mxu0 }
 0x498   : > { %v1168_v48 = vpop.f32.mrf.mxu1 }
 0x49f   : > { %v1120_v41 = vpop.f32.mrf.mxu3 }
 0x4a2   : > { %v1094_v42 = vpop.f32.mrf.mxu2 }
 0x4a3   : > { %v1121_v43 = vadd.f32 %v1120_v41, %v1094_v42 }
 0x4a4   : > { %v1277_v56 = vpop.f32.mrf.mxu1 }
 0x4a5   : > { %v1145_v46 = vadd.f32 %v1144_v44, %v1121_v43 }
 0x4a7   : > { %v1169_v49 = vadd.f32 %v1168_v48, %v1145_v46  ;;  %v1214_v50 = vpop.f32.mrf.mxu3 }
 0x4a9   : > { %v1251_v53 = vpop.f32.mrf.mxu0 }
 0x4aa   : > { %v1192_v51 = vpop.f32.mrf.mxu2  ;;  %v1278_v57 = vadd.f32 %v1277_v56, %v1251_v53 }
 0x4ab   : > { %v1193_v52 = vadd.f32 %v1192_v51, %v1169_v49 }
 0x4ac   : > { %v1371_v0 = vpop.f32.mrf.mxu1 }
 0x4ad   : > { %v4681_v54 = vadd.f32 %v1214_v50, %v1193_v52 }
 0x4af   : > { %v1325_v60 = vpop.f32.mrf.mxu3 }
 0x4b1   : > { %v1349_v62 = vpop.f32.mrf.mxu0 }
 0x4b2   : > { %v1301_v58 = vpop.f32.mrf.mxu2 }
 0x4b3   : > { %v1302_v59 = vadd.f32 %v1301_v58, %v1278_v57 }
 0x4b5   : > { %v1326_v61 = vadd.f32 %v1325_v60, %v1302_v59 }
 0x4b7   : > { %v1350_v63 = vadd.f32 %v1349_v62, %v1326_v61 }
 0x4b9   : > { %v1372_v1 = vadd.f32 %v1371_v0, %v1350_v63 }
 0x4bb   : > { %v1376_v2 = vsel %vm539_vm3, %v1372_v1, -inf }
 0x4bc   : > { %1377 = vmax.xlane.f32.xlu0 %v1376_v2 }
 0x4d0   : > { %719 = vperm.xlu0 %4106, %v4688_v7  }
 0x4fa   : > { %1053 = vadd.xlane.f32.xlu0 %v1052_v8 }
 0x52f   : > { %v1378_v10 = vpop.xlane.xlu0 %1377 }
 0x530   : > { %v4696_v12 = vmax.f32 %v4693_v9, %v1378_v10 }
 0x532   : > { %v1380_v11 = vsub.f32 %v4693_v9, %v4696_v12  ;;  %1561 = vst.msk [vmem:[#allocation4 + $0x10] sm:$0xff] %vm714_vm4, %v4696_v12  ;;  %1385 = vperm.xlu1 %4107, %v4696_v12  }
 0x53a   : > { %1564 = vrot.lane.b32.xlu1 %v4635_v47, %s4410_s15 }
 0x542   : > { %1562 = vrot.lane.b32.xlu1 %v4631_v45, %s4410_s15  ;;  %v720_v14 = vpop.permute.xlu0 %719  ;;  %v1039_v45 = vmul.f32 1.442695, %v1038_v6 }
 0x543   : > { %v722_v15 = vmul.f32 %v720_v14, %v716_v13 }
 0x544   : > { %4115 = vpow2.f32 %v1039_v45 }
 0x545   : > { %v875_v16 = vadd.f32 %v4659_v55, %v722_v15 }
 0x547   : > { %876 = vst.msk [vmem:[#allocation6] sm:$0xff] %vm539_vm3, %v875_v16 }
 0x54a   : > { %v4710_v55 = vpop.eup %4115 }
 0x54b   : > { %v1051_v24 = vmul.f32 %v4710_v55, %v1050_v23 }
 0x56d   : > { %v1054_v25 = vpop.xlane.xlu0 %1053 }
 0x56e   : > { %v1055_v26 = vadd.f32 %v1054_v25, %v1051_v24  ;;  %v1058_v24 = vld [vmem:[#allocation6 + $0x8] sm:$0xff] }
 0x570   : > { %1056 = vst.msk [vmem:[#allocation5 + $0x8] sm:$0xff] %vm714_vm4, %v1055_v26 }
 0x5a4   : > { %v1386_v27 = vpop.permute.xlu1 %1385 }
 0x5a5   : > { %v1388_v28 = vsub.f32 %v1372_v1, %v1386_v27  ;;  %v710_v27 = vsel %vm539_vm3, %v4655_v32, 0.0 }
 0x5a7   : > { %v1389_v29 = vmul.f32 1.442695, %v1388_v28 }
 0x5a9   : > { %4117 = vpow2.f32 %v1389_v29 }
 0x5ac   : > { %v1565_v30 = vpop.permute.xlu1 %1564 }
 0x5ad   : > { %v1568_v31 = vsel %vm539_vm3, %v1565_v30, 0 }
 0x5ae   : > { %v1585_v33 = vand.u32 4294901760, %v1568_v31 }
 0x5af   : > { %v4715_v3 = vpop.eup %4117 }
 0x5b0   : > { %v1612_v5 = vsub.f32 %v1568_v31, %v1585_v33  ;;  %v1411_v6 = vsel %vm539_vm3, %v4715_v3, 0  ;;  %1586 = vmatpush.xpose.msrb.mxu0 %v1585_v33  ;;  %v1394_v28 = vsel %vm539_vm3, %v4715_v3, 0.0 }
 0x5b1   : > { %v1430_v34 = vand.u32 4294901760, %v1411_v6 }
 0x5b2   : > { %v1613_v35 = vand.u32 4294901760, %v1612_v5 }
 0x5b3   : > { %1461 = vmatmul.f32.vlgmr.msrb.gmra.mxu3 %v1430_v34  ;;  %v1431_v36 = vsub.f32 %v1411_v6, %v1430_v34 }
 0x5b4   : > { %v1614_v37 = vsub.f32 %v1612_v5, %v1613_v35  ;;  %v1563_v38 = vpop.permute.xlu1 %1562  ;;  %1662 = vmatpush.xpose.msrb.mxu3 %v1585_v33 }
 0x5b5   : > { %v1566_v39 = vsel %vm539_vm3, %v1563_v38, 0  ;;  %1485 = vmatmul.f32.vlgmr.msra.gmra.mxu0 %v1431_v36  ;;  %v1432_v40 = vand.u32 4294901760, %v1431_v36 }
 0x5b6   : > { %v1615_v41 = vand.u32 4294901760, %v1614_v37  ;;  %v1587_v42 = vand.u32 4294901760, %v1566_v39  ;;  %1688 = vmatpush.xpose.msra.mxu0 %v1613_v35 }
 0x5b7   : > { %1509 = vmatmul.f32.vlgmr.msra.gmra.mxu1 %v1432_v40  ;;  %v1433_v43 = vsub.f32 %v1431_v36, %v1432_v40  ;;  %v708_v40 = vld [vmem:[#allocation5] sm:$0xff] }
 0x5b8   : > { %v1588_v44 = vsub.f32 %v1566_v39, %v1587_v42  ;;  %1616 = vmatpush.xpose.msrb.mxu1 %v1615_v41  ;;  %v709_v41 = vmul.f32 %v4688_v7, %v708_v40 }
 0x5b9   : > { %v1434_v46 = vand.u32 4294901760, %v1433_v43 }
 0x5ba   : > { %v1589_v48 = vand.u32 4294901760, %v1588_v44 }
 0x5bb   : > { %1435 = vmatmul.f32.vlgmr.msrb.gmra.mxu2 %v1434_v46  ;;  %1555 = vmatmul.f32.vlgmr.msra.gmra.mxu3 %v1430_v34 }
 0x5bc   : > { %1710 = vmatpush.xpose.msra.mxu1 %v1585_v33  ;;  %v1590_v49 = vsub.f32 %v1588_v44, %v1589_v48  ;;  %1639 = vmatpush.xpose.msrb.mxu2 %v1612_v5 }
 0x5be   : > { %v1591_v50 = vand.u32 4294901760, %v1590_v49 }
 0x5bf   : > { %1618 = vmatmul.f32.vlgmr.msrb.gmra.mxu1 %v1587_v42 }
 0x5c0   : > { %1592 = vmatmul.f32.vlgmr.msrb.gmra.mxu0 %v1591_v50  ;;  %v1400_v50 = vld [vmem:[#allocation6 + $0x10] sm:$0xff] }
 0x5c3   : > { %1533 = vmatmul.f32.vlgmr.msra.gmra.mxu2 %v1430_v34  ;;  %1666 = vmatmul.f32.vlgmr.msrb.gmra.mxu3 %v1589_v48 }
 0x5c7   : > { %1712 = vmatmul.f32.vlgmr.msra.gmra.mxu1 %v1587_v42 }
 0x5c8   : > { %1690 = vmatmul.f32.vlgmr.msra.gmra.mxu0 %v1587_v42 }
 0x5cb   : > { %1642 = vmatmul.f32.vlgmr.msrb.gmra.mxu2 %v1588_v44  ;;  %v1392_v44 = vld [vmem:[#allocation5 + $0x10] sm:$0xff] }
 0x632   : > { %v1486_v56 = vpop.f32.mrf.mxu0 }
 0x634   : > { %v1510_v57 = vpop.f32.mrf.mxu1 }
 0x636   : > { %v1462_v51 = vpop.f32.mrf.mxu3 }
 0x63c   : > { %v1619_v1 = vpop.f32.mrf.mxu1 }
 0x63d   : > { %v1593_v62 = vpop.f32.mrf.mxu0 }
 0x63e   : > { %v1436_v52 = vpop.f32.mrf.mxu2  ;;  %v1556_v63 = vpop.f32.mrf.mxu3  ;;  %v1620_v2 = vadd.f32 %v1619_v1, %v1593_v62 }
 0x63f   : > { %v1463_v53 = vadd.f32 %v1462_v51, %v1436_v52 }
 0x641   : > { %v1487_v58 = vadd.f32 %v1486_v56, %v1463_v53 }
 0x643   : > { %v1511_v59 = vadd.f32 %v1510_v57, %v1487_v58  ;;  %v1734_v57 = vld [vmem:[#allocation5 + $0x18] sm:$0xff] }
 0x644   : > { %v1713_v16 = vpop.f32.mrf.mxu1 }
 0x645   : > { %v1691_v14 = vpop.f32.mrf.mxu0 }
 0x646   : > { %v1534_v60 = vpop.f32.mrf.mxu2  ;;  %v1667_v10 = vpop.f32.mrf.mxu3 }
 0x647   : > { %v1535_v61 = vadd.f32 %v1534_v60, %v1511_v59 }
 0x649   : > { %v4720_v0 = vadd.f32 %v1556_v63, %v1535_v61 }
 0x64e   : > { %v1643_v4 = vpop.f32.mrf.mxu2 }
 0x64f   : > { %v1644_v8 = vadd.f32 %v1643_v4, %v1620_v2 }
 0x651   : > { %v1668_v13 = vadd.f32 %v1667_v10, %v1644_v8  ;;  %v1742_v8 = vld [vmem:[#allocation6 + $0x18] sm:$0xff] }
 0x653   : > { %v1692_v15 = vadd.f32 %v1691_v14, %v1668_v13 }
 0x655   : > { %v1714_v17 = vadd.f32 %v1713_v16, %v1692_v15 }
 0x657   : > { %v1718_v18 = vsel %vm539_vm3, %v1714_v17, -inf }
 0x658   : > { %1719 = vmax.xlane.f32.xlu1 %v1718_v18 }
 0x671   : > { %1061 = vperm.xlu1 %4107, %v4710_v55  }
 0x6cb   : > { %v1720_v20 = vpop.xlane.xlu1 %1719 }
 0x6cc   : > { %v1721_v21 = vmax.f32 %v1717_v19, %v1720_v20 }
 0x6ce   : > { %v1722_v22 = vsub.f32 %v1717_v19, %v1721_v21  ;;  %1903 = vst.msk [vmem:[#allocation4 + $0x18] sm:$0xff] %vm714_vm4, %v1721_v21  ;;  %1727 = vperm.xlu2 %4108, %v1721_v21  }
 0x6d0   : > { %v1723_v45 = vmul.f32 1.442695, %v1722_v22 }
 0x6d2   : > { %4119 = vpow2.f32 %v1723_v45 }
 0x6d6   : > { %1749 = vrot.lane.b32.xlu2 %v4635_v47, %s4411_s16  ;;  %v1381_v47 = vmul.f32 1.442695, %v1380_v11 }
 0x6d8   : > { %v4726_v23 = vpop.eup %4119  ;;  %4121 = vpow2.f32 %v1381_v47 }
 0x6d9   : > { %1745 = vperm.xlu1 %4107, %v4726_v23   ;;  %v1735_v7 = vmul.f32 %v4726_v23, %v1734_v57 }
 0x6de   : > { %v4122_v29 = vpop.eup %4121 }
 0x6df   : > { %v1393_v46 = vmul.f32 %v4122_v29, %v1392_v44 }
 0x6e3   : > { %v1062_v25 = vpop.permute.xlu1 %1061 }
 0x6e4   : > { %v1064_v26 = vmul.f32 %v1062_v25, %v1058_v24 }
 0x6e6   : > { %v1217_v55 = vadd.f32 %v4681_v54, %v1064_v26 }
 0x6e8   : > { %1218 = vst.msk [vmem:[#allocation6 + $0x8] sm:$0xff] %vm539_vm3, %v1217_v55 }
 0x6ff   : > { %711 = vadd.xlane.f32.xlu2 %v710_v27 }
 0x707   : > { %1395 = vadd.xlane.f32.xlu2 %v1394_v28 }
 0x71f   : > { %1403 = vperm.xlu2 %4108, %v4122_v29  }
 0x728   : > { %v1728_v30 = vpop.permute.xlu2 %1727 }
 0x729   : > { %v1730_v31 = vsub.f32 %v1714_v17, %v1728_v30 }
 0x72b   : > { %v1731_v54 = vmul.f32 1.442695, %v1730_v31 }
 0x72d   : > { %4123 = vpow2.f32 %v1731_v54 }
 0x730   : > { %v1750_v33 = vpop.permute.xlu2 %1749 }
 0x731   : > { %v1770_v5 = vand.u32 4294901760, %v1750_v33 }
 0x733   : > { %v4124_v6 = vpop.eup %4123  ;;  %v1797_v32 = vsub.f32 %v1750_v33, %v1770_v5  ;;  %1771 = vmatpush.msra.mxu2 %v1770_v5  ;;  %1847 = vmatpush.msrb.mxu1 %v1770_v5 }
 0x734   : > { %v1736_v3 = vsel %vm539_vm3, %v4124_v6, 0.0  ;;  %v1753_v34 = vsel %vm539_vm3, %v4124_v6, 0 }
 0x735   : > { %v1798_v35 = vand.u32 4294901760, %v1797_v32  ;;  %1824 = vmatpush.msrb.mxu0 %v1797_v32  ;;  %1737 = vadd.xlane.f32.xlu1 %v1736_v3  ;;  %v1772_v9 = vand.u32 4294901760, %v1753_v34 }
 0x737   : > { %v1799_v12 = vsub.f32 %v1797_v32, %v1798_v35  ;;  %1873 = vmatpush.msrb.mxu2 %v1798_v35  ;;  %v1773_v11 = vsub.f32 %v1753_v34, %v1772_v9 }
 0x739   : > { %v1800_v36 = vand.u32 4294901760, %v1799_v12  ;;  %1827 = vmatmul.f32.vlgmr.msrb.gmra.mxu0 %v1773_v11  ;;  %v1774_v37 = vand.u32 4294901760, %v1773_v11 }
 0x73b   : > { %1801 = vmatpush.msra.mxu3 %v1800_v36  ;;  %1851 = vmatmul.f32.vlgmr.msrb.gmra.mxu1 %v1774_v37  ;;  %v1775_v38 = vsub.f32 %v1773_v11, %v1774_v37 }
 0x73c   : > { %1803 = vmatmul.f32.vlgmr.msra.gmra.mxu3 %v1772_v9 }
 0x73d   : > { %1895 = vmatpush.msrb.mxu3 %v1770_v5  ;;  %v1776_v39 = vand.u32 4294901760, %v1775_v38 }
 0x73f   : > { %1777 = vmatmul.f32.vlgmr.msra.gmra.mxu2 %v1776_v39 }
 0x744   : > { %1897 = vmatmul.f32.vlgmr.msrb.gmra.mxu3 %v1772_v9 }
 0x747   : > { %1875 = vmatmul.f32.vlgmr.msrb.gmra.mxu2 %v1772_v9 }
 0x74b   : > { %v1746_v56 = vpop.permute.xlu1 %1745 }
 0x74c   : > { %v1748_v14 = vmul.f32 %v1746_v56, %v1742_v8 }
 0x772   : > { %v712_v42 = vpop.xlane.xlu2 %711 }
 0x773   : > { %v713_v43 = vadd.f32 %v712_v42, %v709_v41 }
 0x775   : > { %715 = vst.msk [vmem:[#allocation5] sm:$0xff] %vm714_vm4, %v713_v43 }
 0x77a   : > { %v1396_v48 = vpop.xlane.xlu2 %1395 }
 0x77b   : > { %v1397_v49 = vadd.f32 %v1396_v48, %v1393_v46 }
 0x77d   : > { %1398 = vst.msk [vmem:[#allocation5 + $0x10] sm:$0xff] %vm714_vm4, %v1397_v49 }
 0x782   : > { %v1404_v51 = vpop.permute.xlu2 %1403 }
 0x783   : > { %v1406_v52 = vmul.f32 %v1404_v51, %v1400_v50 }
 0x785   : > { %v1559_v53 = vadd.f32 %v4720_v0, %v1406_v52 }
 0x787   : > { %1560 = vst.msk [vmem:[#allocation6 + $0x10] sm:$0xff] %vm539_vm3, %v1559_v53 }
 0x7a8   : > { %v1738_v58 = vpop.xlane.xlu1 %1737 }
 0x7a9   : > { %v1739_v59 = vadd.f32 %v1738_v58, %v1735_v7 }
 0x7ab   : > { %1740 = vst.msk [vmem:[#allocation5 + $0x18] sm:$0xff] %vm714_vm4, %v1739_v59 }
 0x7b6   : > { %v1828_v63 = vpop.f32.mrf.mxu0 }
 0x7b8   : > { %v1852_v2 = vpop.f32.mrf.mxu1 }
 0x7bf   : > { %v1804_v60 = vpop.f32.mrf.mxu3 }
 0x7c2   : > { %v1778_v61 = vpop.f32.mrf.mxu2 }
 0x7c3   : > { %v1805_v62 = vadd.f32 %v1804_v60, %v1778_v61 }
 0x7c5   : > { %v1829_v1 = vadd.f32 %v1828_v63, %v1805_v62 }
 0x7c7   : > { %v1853_v4 = vadd.f32 %v1852_v2, %v1829_v1  ;;  %v1898_v13 = vpop.f32.mrf.mxu3 }
 0x7ca   : > { %v1876_v10 = vpop.f32.mrf.mxu2 }
 0x7cb   : > { %v1877_v0 = vadd.f32 %v1876_v10, %v1853_v4 }
 0x7cd   : > { %v1899_v15 = vadd.f32 %v1898_v13, %v1877_v0 }
 0x7cf   : > { %v1901_v16 = vadd.f32 %v1899_v15, %v1748_v14 }
 0x7d1   : > { %1902 = vst.msk [vmem:[#allocation6 + $0x18] sm:$0xff] %vm539_vm3, %v1901_v16 }
 0x7d2 PF: > { %p3951_p9 = scmp.ne.s32.totalorder %s4371_s21, %s4375_s22 }
 0x7d3   : > { %s4412_s30 = smov (!%p3951_p9), 120   ;;  %s3952_s12 = sshll.u32 (!%p3951_p9), %s4371_s21, 3 }
 0x7d4   : > { %1907 = sbr.rel (%p3951_p9) target bundleno = 4309 (0x10d5), region = 68  ;;  %s2103_s13 = scalar_lea.vmem (!%p3951_p9), [#allocation3], %s3952_s12 }
 0x7d5   : > { %s4413_s7 = smov (!%p3951_p9), 96   ;;  %s4415_s21 = smov (!%p3951_p9), 80  }
 0x7d6   : > { %s4416_s11 = smov (!%p3951_p9), 88   ;;  %s4417_s10 = smov (!%p3951_p9), 112  }
 0x7d7   : > { %s4418_s2 = smov (!%p3951_p9), 104   ;;  %s4419_s3 = smov (!%p3951_p9), 72  }
 0x7d8   : > { %s4421_s24 = smov (!%p3951_p9), 8   ;;  %s4422_s28 = smov (!%p3951_p9), 24  }
 0x7d9   : > { %v1912_v17 = vld [vmem:[#allocation13 + $0x18] sm:$0xff]  ;;  %v1911_v18 = vld [vmem:[#allocation13 + $0x10] sm:$0xff]  ;;  %v1910_v19 = vld [vmem:[#allocation13 + $0x8] sm:$0xff]  ;;  %vm1913_vm5 = vcmask 261120   ;;  %vm2112_vm6 = vcmask 64512   ;;  %vm2104_vm7 = vcmask 523264  }
 0x7da   : > { %v1929_v20 = vand.u32 4294901760, %v1912_v17  ;;  %v1931_v21 = vand.u32 4294901760, %v1911_v18  ;;  %v1933_v22 = vand.u32 4294901760, %v1910_v19  ;;  %v1909_v45 = vld [vmem:[#allocation13] sm:$0xff]  ;;  %v1908_v23 = vld [vmem:[%s4608_s5] sm:$0xff]  ;;  %vm2288_vm9 = vcmask 7168  }
 0x7db   : > { %v1935_v24 = vand.u32 4294901760, %v1909_v45  ;;  %v1915_v25 = vsel %vm1913_vm5, %v1908_v23, 0  ;;  %v4752_v38 = vld [vmem:[#allocation2] sm:$0xff]  ;;  %v2107_v23 = vlaneseq  ;;  %s4420_s5 = smov 16  }
 0x7dc   : > { %v1959_v26 = vsub.f32 %v1912_v17, %v1929_v20  ;;  %1930 = vmatpush.msra.mxu0 %v1929_v20  ;;  %v1965_v55 = vsub.f32 %v1911_v18, %v1931_v21  ;;  %2030 = vmatpush.msra.mxu3 %v1929_v20  ;;  %v1971_v27 = vsub.f32 %v1910_v19, %v1933_v22  ;;  %v1937_v28 = vand.u32 4294901760, %v1915_v25 }
 0x7dd   : > { %v1977_v47 = vsub.f32 %v1909_v45, %v1935_v24  ;;  %2452 = vrot.lane.b32.xlu2 %v4752_v38, %s4412_s30  ;;  %v2114_v39 = vsel %vm2112_vm6, %v4752_v38, 0 }
 0x7de   : > { %2001 = vmatpush.msra.mxu2 %v1959_v26  ;;  %1932 = vmatpush.msra.mxu0 %v1931_v21  ;;  %v1960_v29 = vand.u32 4294901760, %v1959_v26  ;;  %v1966_v30 = vand.u32 4294901760, %v1965_v55  ;;  %v1938_v31 = vsub.f32 %v1915_v25, %v1937_v28  ;;  %v1972_v54 = vand.u32 4294901760, %v1971_v27 }
 0x7df   : > { %2032 = vmatpush.msra.mxu3 %v1931_v21  ;;  %v1978_v33 = vand.u32 4294901760, %v1977_v47  ;;  %v2136_v41 = vand.u32 4294901760, %v2114_v39 }
 0x7e0   : > { %2004 = vmatpush.msra.mxu2 %v1965_v55  ;;  %v1961_v5 = vsub.f32 %v1959_v26, %v1960_v29  ;;  %1934 = vmatpush.msra.mxu0 %v1933_v22  ;;  %v1967_v6 = vsub.f32 %v1965_v55, %v1966_v30  ;;  %v1973_v32 = vsub.f32 %v1971_v27, %v1972_v54  ;;  %v1939_v3 = vand.u32 4294901760, %v1938_v31 }
 0x7e1   : > { %2034 = vmatpush.msra.mxu3 %v1933_v22  ;;  %v1979_v12 = vsub.f32 %v1977_v47, %v1978_v33  ;;  %v2137_v46 = vsub.f32 %v2114_v39, %v2136_v41 }
 0x7e2   : > { %v1962_v34 = vand.u32 4294901760, %v1961_v5  ;;  %2007 = vmatpush.msra.mxu2 %v1971_v27  ;;  %v1968_v35 = vand.u32 4294901760, %v1967_v6  ;;  %1936 = vmatpush.msra.mxu0 %v1935_v24  ;;  %v1940_v9 = vsub.f32 %v1938_v31, %v1939_v3  ;;  %v1974_v11 = vand.u32 4294901760, %v1973_v32  ;;  %v4778_v6 = vld [vmem:[#allocation4] sm:$0xff] }
 0x7e3   : > { %2036 = vmatpush.msra.mxu3 %v1935_v24  ;;  %v1980_v37 = vand.u32 4294901760, %v1979_v12  ;;  %v2138_v52 = vand.u32 4294901760, %v2137_v46  ;;  %v4768_v27 = vshrl.u32 %v2107_v23, 7  ;;  %v4414_v5 = vmov 0  }
 0x7e4   : > { %2059 = vmatpush.msrb.mxu0 %v1960_v29  ;;  %1963 = vmatpush.msra.mxu1 %v1962_v34  ;;  %v1941_v36 = vand.u32 4294901760, %v1940_v9 }
 0x7e5   : > { %2010 = vmatpush.msra.mxu2 %v1977_v47  ;;  %2040 = vmatmul.f32.vlgmr.msra.gmra.mxu3 %v1939_v3  ;;  %v2139_v7 = vsub.f32 %v2137_v46, %v2138_v52 }
 0x7e6   : > { %2013 = vmatmul.f32.vlgmr.msra.gmra.mxu2 %v1938_v31  ;;  %1969 = vmatpush.msra.mxu1 %v1968_v35 }
 0x7e7   : > { %1942 = vmatmul.f32.vlgmr.msra.gmra.mxu0 %v1941_v36  ;;  %v2140_v60 = vand.u32 4294901760, %v2139_v7  ;;  %4125 = vset.pattern.permute.xlu0 %v4414_v5 }
 0x7e8   : > { %2063 = vmatpush.msrb.mxu0 %v1966_v30  ;;  %1975 = vmatpush.msra.mxu1 %v1974_v11 }
 0x7e9   : > { %4126 = vset.pattern.permute.xlu1 %v4414_v5  ;;  %4127 = vset.pattern.permute.xlu2 %v4414_v5 }
 0x7ea   : > { %2067 = vmatpush.msrb.mxu0 %v1972_v54  ;;  %1981 = vmatpush.msra.mxu1 %v1980_v37 }
 0x7eb   : > { %1983 = vmatmul.f32.vlgmr.msra.gmra.mxu1 %v1937_v28 }
 0x7ec   : > { %2071 = vmatpush.msrb.mxu0 %v1978_v33  ;;  %2090 = vmatpush.msrb.mxu1 %v1929_v20 }
 0x7ee   : > { %2092 = vmatpush.msrb.mxu1 %v1931_v21 }
 0x7ef   : > { %2073 = vmatmul.f32.vlgmr.msrb.gmra.mxu0 %v1937_v28 }
 0x7f0   : > { %2094 = vmatpush.msrb.mxu1 %v1933_v22 }
 0x7f2   : > { %2096 = vmatpush.msrb.mxu1 %v1935_v24 }
 0x7f3   : > { %2098 = vmatmul.f32.vlgmr.msrb.gmra.mxu1 %v1937_v28  ;;  %v4770_v28 = vand.u32 127, %v2107_v23 }
 0x7f5   : > { %vm2111_vm8 = vcmp.le.s32.totalorder %v4770_v28, %v4768_v27 }
 0x837   : > { %v2453_v35 = vpop.permute.xlu2 %2452 }
 0x838   : > { %v2456_v11 = vsel %vm2112_vm6, %v2453_v35, 0 }
 0x839   : > { %v2477_v37 = vand.u32 4294901760, %v2456_v11 }
 0x83b   : > { %v2478_v39 = vsub.f32 %v2456_v11, %v2477_v37 }
 0x864   : > { %v1943_v40 = vpop.f32.mrf.mxu0 }
 0x868   : > { %v1984_v42 = vpop.f32.mrf.mxu1  ;;  %v2041_v48 = vpop.f32.mrf.mxu3 }
 0x869   : > { %v2014_v43 = vpop.f32.mrf.mxu2  ;;  %v1985_v44 = vadd.f32 %v1984_v42, %v1943_v40  ;;  %v2479_v42 = vand.u32 4294901760, %v2478_v39 }
 0x86b   : > { %v2015_v49 = vadd.f32 %v2014_v43, %v1985_v44 }
 0x86c   : > { %v2074_v50 = vpop.f32.mrf.mxu0 }
 0x86d   : > { %v2042_v51 = vadd.f32 %v2041_v48, %v2015_v49 }
 0x86f   : > { %v2075_v53 = vadd.f32 %v2074_v50, %v2042_v51 }
 0x870   : > { %v2099_v56 = vpop.f32.mrf.mxu1 }
 0x871   : > { %v4759_v57 = vadd.f32 %v2099_v56, %v2075_v53 }
 0x873   : > { %2105 = vst.msk [vmem:[%s2103_s13] sm:$0xff] %vm2104_vm7, %v4759_v57  ;;  %2297 = vrot.lane.b32.xlu1 %v4759_v57, %s4413_s7  ;;  %v2117_v58 = vsel %vm2112_vm6, %v4759_v57, 0 }
 0x874   : > { %v2134_v59 = vand.u32 4294901760, %v2117_v58 }
 0x876   : > { %2135 = vmatpush.xpose.msrb.mxu2 %v2134_v59  ;;  %2211 = vmatpush.xpose.msra.mxu1 %v2134_v59  ;;  %v2161_v61 = vsub.f32 %v2117_v58, %v2134_v59 }
 0x878   : > { %2188 = vmatpush.xpose.msra.mxu0 %v2161_v61  ;;  %v2162_v62 = vand.u32 4294901760, %v2161_v61 }
 0x879   : > { %2141 = vmatmul.f32.vlgmr.msrb.gmra.mxu2 %v2140_v60  ;;  %2215 = vmatmul.f32.vlgmr.msra.gmra.mxu1 %v2138_v52 }
 0x87a   : > { %2237 = vmatpush.xpose.msra.mxu2 %v2162_v62  ;;  %v2163_v63 = vsub.f32 %v2161_v61, %v2162_v62 }
 0x87b   : > { %2454 = vrot.lane.b32.xlu1 %v4759_v57, %s4412_s30  ;;  %2191 = vmatmul.f32.vlgmr.msra.gmra.mxu0 %v2137_v46  ;;  %v2480_v46 = vsub.f32 %v2478_v39, %v2479_v42 }
 0x87c   : > { %v2164_v1 = vand.u32 4294901760, %v2163_v63 }
 0x87d   : > { %v2481_v50 = vand.u32 4294901760, %v2480_v46 }
 0x87e   : > { %2165 = vmatpush.xpose.msrb.mxu3 %v2164_v1 }
 0x881   : > { %2167 = vmatmul.f32.vlgmr.msrb.gmra.mxu3 %v2136_v41  ;;  %2239 = vmatmul.f32.vlgmr.msra.gmra.mxu2 %v2136_v41 }
 0x882   : > { %2259 = vmatpush.xpose.msra.mxu3 %v2134_v59 }
 0x889   : > { %2261 = vmatmul.f32.vlgmr.msra.gmra.mxu3 %v2136_v41 }
 0x8e5   : > { %v2298_v2 = vpop.permute.xlu1 %2297 }
 0x8e6   : > { %v2318_v4 = vand.u32 4294901760, %v2298_v2 }
 0x8e8   : > { %v2345_v8 = vsub.f32 %v2298_v2, %v2318_v4  ;;  %2319 = vmatpush.msrb.mxu0 %v2318_v4  ;;  %2395 = vmatpush.msrb.mxu3 %v2318_v4 }
 0x8ea   : > { %v2346_v10 = vand.u32 4294901760, %v2345_v8  ;;  %2372 = vmatpush.msrb.mxu2 %v2345_v8 }
 0x8ec   : > { %v2347_v0 = vsub.f32 %v2345_v8, %v2346_v10  ;;  %2421 = vmatpush.msra.mxu0 %v2346_v10 }
 0x8ed   : > { %v2455_v13 = vpop.permute.xlu1 %2454 }
 0x8ee   : > { %v2348_v14 = vand.u32 4294901760, %v2347_v0  ;;  %v2458_v15 = vsel %vm2112_vm6, %v2455_v13, 0 }
 0x8ef   : > { %v2475_v16 = vand.u32 4294901760, %v2458_v15 }
 0x8f0   : > { %2349 = vmatpush.msrb.mxu1 %v2348_v14 }
 0x8f1   : > { %v2502_v17 = vsub.f32 %v2458_v15, %v2475_v16  ;;  %2476 = vmatpush.xpose.msra.mxu2 %v2475_v16 }
 0x8f2   : > { %2443 = vmatpush.msra.mxu1 %v2318_v4 }
 0x8f3   : > { %v2503_v18 = vand.u32 4294901760, %v2502_v17 }
 0x8f5   : > { %v2504_v19 = vsub.f32 %v2502_v17, %v2503_v18 }
 0x8f6   : > { %v2216_v25 = vpop.f32.mrf.mxu1 }
 0x8f7   : > { %v2505_v20 = vand.u32 4294901760, %v2504_v19 }
 0x8f8   : > { %v2192_v45 = vpop.f32.mrf.mxu0 }
 0x8f9   : > { %2506 = vmatpush.xpose.msra.mxu3 %v2505_v20 }
 0x8fc   : > { %v2142_v21 = vpop.f32.mrf.mxu2 }
 0x904   : > { %v2168_v22 = vpop.f32.mrf.mxu3  ;;  %v2240_v55 = vpop.f32.mrf.mxu2 }
 0x905   : > { %v2169_v24 = vadd.f32 %v2168_v22, %v2142_v21  ;;  %v4800_v21 = vld [vmem:[#allocation4 + $0x8] sm:$0xff] }
 0x907   : > { %v2193_v26 = vadd.f32 %v2192_v45, %v2169_v24 }
 0x909   : > { %v2217_v47 = vadd.f32 %v2216_v25, %v2193_v26 }
 0x90b   : > { %v2241_v29 = vadd.f32 %v2240_v55, %v2217_v47 }
 0x90c   : > { %v2262_v30 = vpop.f32.mrf.mxu3 }
 0x90d   : > { %v2263_v31 = vadd.f32 %v2262_v30, %v2241_v29 }
 0x90f   : > { %v2265_v54 = vsel %vm2111_vm8, %v2263_v31, -1e+30 }
 0x910   : > { %v2267_v33 = vsel %vm2112_vm6, %v2265_v54, -inf }
 0x911   : > { %2268 = vmax.xlane.f32.xlu0 %v2267_v33 }
 0x984   : > { %v2269_v32 = vpop.xlane.xlu0 %2268 }
 0x985   : > { %v4781_v3 = vmax.f32 %v4778_v6, %v2269_v32 }
 0x987   : > { %v2271_v34 = vsub.f32 %v4778_v6, %v4781_v3  ;;  %2451 = vst.msk [vmem:[#allocation4] sm:$0xff] %vm2288_vm9, %v4781_v3  ;;  %2276 = vperm.xlu0 %4125, %v4781_v3   ;;  %v2976_v6 = vld [vmem:[#allocation6 + $0x10] sm:$0xff] }
 0x989   : > { %v2272_v27 = vmul.f32 1.442695, %v2271_v34 }
 0x9f9   : > { %v2277_v9 = vpop.permute.xlu0 %2276 }
 0x9fa   : > { %v2279_v12 = vsub.f32 %v2265_v54, %v2277_v9 }
 0x9fc   : > { %v2280_v36 = vmul.f32 1.442695, %v2279_v12 }
 0x9fe   : > { %4129 = vpow2.f32 %v2280_v36 }
 0xa04   : > { %v4789_v40 = vpop.eup %4129 }
 0xa05   : > { %v2301_v41 = vsel %vm2112_vm6, %v4789_v40, 0 }
 0xa06   : > { %v2320_v43 = vand.u32 4294901760, %v2301_v41 }
 0xa08   : > { %2351 = vmatmul.f32.vlgmr.msrb.gmra.mxu1 %v2320_v43  ;;  %v2321_v44 = vsub.f32 %v2301_v41, %v2320_v43 }
 0xa09   : > { %2552 = vmatpush.xpose.msrb.mxu1 %v2475_v16 }
 0xa0a   : > { %2375 = vmatmul.f32.vlgmr.msrb.gmra.mxu2 %v2321_v44  ;;  %v2322_v48 = vand.u32 4294901760, %v2321_v44 }
 0xa0b   : > { %2578 = vmatpush.xpose.msrb.mxu2 %v2503_v18 }
 0xa0c   : > { %2399 = vmatmul.f32.vlgmr.msrb.gmra.mxu3 %v2322_v48  ;;  %v2323_v49 = vsub.f32 %v2321_v44, %v2322_v48 }
 0xa0d   : > { %2600 = vmatpush.xpose.msrb.mxu3 %v2475_v16 }
 0xa0e   : > { %v2324_v51 = vand.u32 4294901760, %v2323_v49 }
 0xa10   : > { %2325 = vmatmul.f32.vlgmr.msrb.gmra.mxu0 %v2324_v51  ;;  %2445 = vmatmul.f32.vlgmr.msra.gmra.mxu1 %v2320_v43 }
 0xa11   : > { %2529 = vmatpush.xpose.msrb.mxu0 %v2502_v17 }
 0xa12   : > { %2482 = vmatmul.f32.vlgmr.msra.gmra.mxu2 %v2481_v50 }
 0xa14   : > { %2508 = vmatmul.f32.vlgmr.msra.gmra.mxu3 %v2477_v37 }
 0xa18   : > { %2423 = vmatmul.f32.vlgmr.msra.gmra.mxu0 %v2320_v43  ;;  %2556 = vmatmul.f32.vlgmr.msrb.gmra.mxu1 %v2479_v42 }
 0xa1a   : > { %2580 = vmatmul.f32.vlgmr.msrb.gmra.mxu2 %v2477_v37 }
 0xa1c   : > { %2602 = vmatmul.f32.vlgmr.msrb.gmra.mxu3 %v2477_v37 }
 0xa20   : > { %2532 = vmatmul.f32.vlgmr.msrb.gmra.mxu0 %v2478_v39 }
 0xa85   : > { %v2352_v52 = vpop.f32.mrf.mxu1 }
 0xa8d   : > { %v2326_v53 = vpop.f32.mrf.mxu0  ;;  %v2376_v56 = vpop.f32.mrf.mxu2 }
 0xa8e   : > { %v2353_v7 = vadd.f32 %v2352_v52, %v2326_v53  ;;  %v2446_v61 = vpop.f32.mrf.mxu1 }
 0xa8f   : > { %v2400_v58 = vpop.f32.mrf.mxu3 }
 0xa90   : > { %v2377_v59 = vadd.f32 %v2376_v56, %v2353_v7 }
 0xa92   : > { %v2401_v60 = vadd.f32 %v2400_v58, %v2377_v59 }
 0xa95   : > { %v2424_v62 = vpop.f32.mrf.mxu0  ;;  %v2483_v1 = vpop.f32.mrf.mxu2 }
 0xa96   : > { %v2425_v63 = vadd.f32 %v2424_v62, %v2401_v60  ;;  %v2557_v13 = vpop.f32.mrf.mxu1 }
 0xa97   : > { %v2509_v4 = vpop.f32.mrf.mxu3 }
 0xa98   : > { %v4793_v2 = vadd.f32 %v2446_v61, %v2425_v63  ;;  %v2510_v8 = vadd.f32 %v2509_v4, %v2483_v1 }
 0xa9d   : > { %v2533_v10 = vpop.f32.mrf.mxu0  ;;  %v2581_v15 = vpop.f32.mrf.mxu2 }
 0xa9e   : > { %v2534_v0 = vadd.f32 %v2533_v10, %v2510_v8 }
 0xa9f   : > { %v2603_v17 = vpop.f32.mrf.mxu3 }
 0xaa0   : > { %v2558_v14 = vadd.f32 %v2557_v13, %v2534_v0 }
 0xaa2   : > { %v2582_v16 = vadd.f32 %v2581_v15, %v2558_v14 }
 0xaa4   : > { %v2604_v18 = vadd.f32 %v2603_v17, %v2582_v16 }
 0xaa6   : > { %v2606_v19 = vsel %vm2111_vm8, %v2604_v18, -1e+30 }
 0xaa7   : > { %v2609_v20 = vsel %vm2112_vm6, %v2606_v19, -inf }
 0xaa8   : > { %2610 = vmax.xlane.f32.xlu2 %v2609_v20 }
 0xac0   : > { %2983 = vrot.lane.b32.xlu2 %v4759_v57, %s4415_s21 }
 0xb1b   : > { %v2611_v22 = vpop.xlane.xlu2 %2610 }
 0xb1c   : > { %v4803_v45 = vmax.f32 %v4800_v21, %v2611_v22 }
 0xb1e   : > { %v2613_v23 = vsub.f32 %v4800_v21, %v4803_v45  ;;  %2794 = vst.msk [vmem:[#allocation4 + $0x8] sm:$0xff] %vm2288_vm9, %v4803_v45  ;;  %2618 = vperm.xlu1 %4126, %v4803_v45  }
 0xb23   : > { %v2984_v55 = vpop.permute.xlu2 %2983 }
 0xb24   : > { %v3004_v31 = vand.u32 4294901760, %v2984_v55 }
 0xb26   : > { %2640 = vrot.lane.b32.xlu1 %v4759_v57, %s4416_s11  ;;  %v3031_v35 = vsub.f32 %v2984_v55, %v3004_v31 }
 0xb28   : > { %v3032_v42 = vand.u32 4294901760, %v3031_v35 }
 0xb2a   : > { %v3033_v49 = vsub.f32 %v3031_v35, %v3032_v42 }
 0xb2c   : > { %v3034_v7 = vand.u32 4294901760, %v3033_v49 }
 0xb2e   : > { %2797 = vrot.lane.b32.xlu1 %v4759_v57, %s4417_s10 }
 0xb36   : > { %2795 = vrot.lane.b32.xlu1 %v4752_v38, %s4417_s10 }
 0xb90   : > { %v2619_v24 = vpop.permute.xlu1 %2618 }
 0xb91   : > { %v2621_v25 = vsub.f32 %v2606_v19, %v2619_v24 }
 0xb93   : > { %v2622_v26 = vmul.f32 1.442695, %v2621_v25 }
 0xb95   : > { %4131 = vpow2.f32 %v2622_v26 }
 0xb98   : > { %v2641_v47 = vpop.permute.xlu1 %2640 }
 0xb99   : > { %v2661_v29 = vand.u32 4294901760, %v2641_v47 }
 0xb9b   : > { %v4813_v30 = vpop.eup %4131  ;;  %v2688_v54 = vsub.f32 %v2641_v47, %v2661_v29  ;;  %2662 = vmatpush.msra.mxu0 %v2661_v29  ;;  %2738 = vmatpush.msra.mxu3 %v2661_v29 }
 0xb9c   : > { %v2644_v33 = vsel %vm2112_vm6, %v4813_v30, 0 }
 0xb9d   : > { %v2689_v5 = vand.u32 4294901760, %v2688_v54  ;;  %2715 = vmatpush.msra.mxu2 %v2688_v54  ;;  %v2663_v32 = vand.u32 4294901760, %v2644_v33 }
 0xb9f   : > { %v2690_v9 = vsub.f32 %v2688_v54, %v2689_v5  ;;  %2764 = vmatpush.msrb.mxu0 %v2689_v5  ;;  %v2664_v12 = vsub.f32 %v2644_v33, %v2663_v32  ;;  %v2951_v33 = vld [vmem:[#allocation4 + $0x10] sm:$0xff] }
 0xba0   : > { %v2798_v11 = vpop.permute.xlu1 %2797 }
 0xba1   : > { %v2691_v36 = vand.u32 4294901760, %v2690_v9  ;;  %v2801_v37 = vsel %vm2112_vm6, %v2798_v11, 0  ;;  %2718 = vmatmul.f32.vlgmr.msra.gmra.mxu2 %v2664_v12  ;;  %v2665_v39 = vand.u32 4294901760, %v2664_v12 }
 0xba2   : > { %v2818_v41 = vand.u32 4294901760, %v2801_v37 }
 0xba3   : > { %2692 = vmatpush.msra.mxu1 %v2691_v36  ;;  %2742 = vmatmul.f32.vlgmr.msra.gmra.mxu3 %v2665_v39  ;;  %v2666_v43 = vsub.f32 %v2664_v12, %v2665_v39 }
 0xba4   : > { %v2845_v44 = vsub.f32 %v2801_v37, %v2818_v41  ;;  %2694 = vmatmul.f32.vlgmr.msra.gmra.mxu1 %v2663_v32  ;;  %2819 = vmatpush.xpose.msrb.mxu2 %v2818_v41 }
 0xba5   : > { %2786 = vmatpush.msrb.mxu1 %v2661_v29  ;;  %v2667_v46 = vand.u32 4294901760, %v2666_v43 }
 0xba6   : > { %v2846_v48 = vand.u32 4294901760, %v2845_v44 }
 0xba7   : > { %2895 = vmatpush.xpose.msra.mxu1 %v2818_v41  ;;  %2668 = vmatmul.f32.vlgmr.msra.gmra.mxu0 %v2667_v46 }
 0xba8   : > { %v2847_v50 = vsub.f32 %v2845_v44, %v2846_v48  ;;  %2872 = vmatpush.xpose.msra.mxu0 %v2845_v44  ;;  %2921 = vmatpush.xpose.msra.mxu2 %v2846_v48  ;;  %v2796_v51 = vpop.permute.xlu1 %2795 }
 0xba9   : > { %v2799_v52 = vsel %vm2112_vm6, %v2796_v51, 0 }
 0xbaa   : > { %v2848_v53 = vand.u32 4294901760, %v2847_v50  ;;  %v2820_v56 = vand.u32 4294901760, %v2799_v52 }
 0xbac   : > { %v2821_v58 = vsub.f32 %v2799_v52, %v2820_v56  ;;  %2788 = vmatmul.f32.vlgmr.msrb.gmra.mxu1 %v2663_v32  ;;  %2849 = vmatpush.xpose.msrb.mxu3 %v2848_v53 }
 0xbad   : > { %3035 = vmatpush.msrb.mxu1 %v3034_v7 }
 0xbae   : > { %v2822_v59 = vand.u32 4294901760, %v2821_v58 }
 0xbaf   : > { %2766 = vmatmul.f32.vlgmr.msrb.gmra.mxu0 %v2663_v32  ;;  %2851 = vmatmul.f32.vlgmr.msrb.gmra.mxu3 %v2820_v56 }
 0xbb0   : > { %2943 = vmatpush.xpose.msra.mxu3 %v2818_v41  ;;  %v2823_v60 = vsub.f32 %v2821_v58, %v2822_v59  ;;  %3005 = vmatpush.msrb.mxu0 %v3004_v31 }
 0xbb2   : > { %v2824_v61 = vand.u32 4294901760, %v2823_v60 }
 0xbb4   : > { %3081 = vmatpush.msrb.mxu3 %v3004_v31  ;;  %2825 = vmatmul.f32.vlgmr.msrb.gmra.mxu2 %v2824_v61 }
 0xbb5   : > { %2899 = vmatmul.f32.vlgmr.msra.gmra.mxu1 %v2822_v59  ;;  %3058 = vmatpush.msrb.mxu2 %v3031_v35 }
 0xbb6   : > { %3129 = vmatpush.msra.mxu1 %v3004_v31 }
 0xbb7   : > { %2875 = vmatmul.f32.vlgmr.msra.gmra.mxu0 %v2821_v58  ;;  %2945 = vmatmul.f32.vlgmr.msra.gmra.mxu3 %v2820_v56 }
 0xbb8   : > { %3107 = vmatpush.msra.mxu0 %v3032_v42 }
 0xbbc   : > { %2923 = vmatmul.f32.vlgmr.msra.gmra.mxu2 %v2820_v56 }
 0xc21   : > { %v2695_v62 = vpop.f32.mrf.mxu1 }
 0xc24   : > { %v2669_v63 = vpop.f32.mrf.mxu0  ;;  %v2719_v4 = vpop.f32.mrf.mxu2 }
 0xc25   : > { %v2696_v1 = vadd.f32 %v2695_v62, %v2669_v63 }
 0xc26   : > { %v2743_v10 = vpop.f32.mrf.mxu3 }
 0xc27   : > { %v2720_v8 = vadd.f32 %v2719_v4, %v2696_v1  ;;  %v2968_v4 = vld [vmem:[#allocation5 + $0x10] sm:$0xff] }
 0xc29   : > { %v2744_v0 = vadd.f32 %v2743_v10, %v2720_v8  ;;  %v2789_v15 = vpop.f32.mrf.mxu1 }
 0xc2c   : > { %v2767_v13 = vpop.f32.mrf.mxu0 }
 0xc2d   : > { %v2768_v14 = vadd.f32 %v2767_v13, %v2744_v0 }
 0xc2f   : > { %v4819_v16 = vadd.f32 %v2789_v15, %v2768_v14 }
 0xc32   : > { %v2852_v17 = vpop.f32.mrf.mxu3  ;;  %v2900_v24 = vpop.f32.mrf.mxu1 }
 0xc34   : > { %v2876_v20 = vpop.f32.mrf.mxu0 }
 0xc37   : > { %v2826_v18 = vpop.f32.mrf.mxu2 }
 0xc38   : > { %v2853_v19 = vadd.f32 %v2852_v17, %v2826_v18 }
 0xc3a   : > { %v2877_v22 = vadd.f32 %v2876_v20, %v2853_v19  ;;  %v2946_v47 = vpop.f32.mrf.mxu3 }
 0xc3c   : > { %v2901_v25 = vadd.f32 %v2900_v24, %v2877_v22 }
 0xc3f   : > { %v2924_v26 = vpop.f32.mrf.mxu2 }
 0xc40   : > { %v2925_v55 = vadd.f32 %v2924_v26, %v2901_v25 }
 0xc42   : > { %v2947_v29 = vadd.f32 %v2946_v47, %v2925_v55 }
 0xc44   : > { %v2949_v31 = vsel %vm2111_vm8, %v2947_v29, -1e+30 }
 0xc45   : > { %v2952_v54 = vsel %vm2112_vm6, %v2949_v31, -inf }
 0xc46   : > { %2953 = vmax.xlane.f32.xlu0 %v2952_v54 }
 0xcb9   : > { %v2954_v5 = vpop.xlane.xlu0 %2953 }
 0xcba   : > { %v2955_v32 = vmax.f32 %v2951_v33, %v2954_v5 }
 0xcbc   : > { %v2956_v35 = vsub.f32 %v2951_v33, %v2955_v32  ;;  %3137 = vst.msk [vmem:[#allocation4 + $0x10] sm:$0xff] %vm2288_vm9, %v2955_v32  ;;  %2961 = vperm.xlu1 %4126, %v2955_v32  }
 0xcbe   : > { %v2957_v63 = vmul.f32 1.442695, %v2956_v35 }
 0xcc4   : > { %3140 = vrot.lane.b32.xlu1 %v4759_v57, %s4418_s2 }
 0xccc   : > { %3138 = vrot.lane.b32.xlu1 %v4752_v38, %s4418_s2 }
 0xd2e   : > { %v2962_v9 = vpop.permute.xlu1 %2961 }
 0xd2f   : > { %v2964_v12 = vsub.f32 %v2949_v31, %v2962_v9 }
 0xd31   : > { %v2965_v11 = vmul.f32 1.442695, %v2964_v12 }
 0xd33   : > { %4133 = vpow2.f32 %v2965_v11 }
 0xd34   : > { %4135 = vpow2.f32 %v2957_v63 }
 0xd36   : > { %v3141_v36 = vpop.permute.xlu1 %3140 }
 0xd37   : > { %v3144_v37 = vsel %vm2112_vm6, %v3141_v36, 0 }
 0xd38   : > { %v3161_v39 = vand.u32 4294901760, %v3144_v37 }
 0xd39   : > { %v4134_v41 = vpop.eup %4133 }
 0xd3a   : > { %v3188_v42 = vsub.f32 %v3144_v37, %v3161_v39  ;;  %3162 = vmatpush.xpose.msra.mxu2 %v3161_v39  ;;  %v2970_v43 = vsel %vm2112_vm6, %v4134_v41, 0.0  ;;  %v2987_v44 = vsel %vm2112_vm6, %v4134_v41, 0  ;;  %v4136_v1 = vpop.eup %4135 }
 0xd3b   : > { %2971 = vadd.xlane.f32.xlu0 %v2970_v43  ;;  %v3006_v46 = vand.u32 4294901760, %v2987_v44  ;;  %v2969_v8 = vmul.f32 %v4136_v1, %v2968_v4 }
 0xd3c   : > { %v3189_v48 = vand.u32 4294901760, %v3188_v42 }
 0xd3d   : > { %3037 = vmatmul.f32.vlgmr.msrb.gmra.mxu1 %v3006_v46  ;;  %v3007_v38 = vsub.f32 %v2987_v44, %v3006_v46 }
 0xd3e   : > { %v3190_v49 = vsub.f32 %v3188_v42, %v3189_v48  ;;  %3238 = vmatpush.xpose.msrb.mxu1 %v3161_v39  ;;  %v3139_v50 = vpop.permute.xlu1 %3138 }
 0xd3f   : > { %v3142_v51 = vsel %vm2112_vm6, %v3139_v50, 0  ;;  %3061 = vmatmul.f32.vlgmr.msrb.gmra.mxu2 %v3007_v38  ;;  %v3008_v52 = vand.u32 4294901760, %v3007_v38 }
 0xd40   : > { %v3191_v53 = vand.u32 4294901760, %v3190_v49  ;;  %v3163_v56 = vand.u32 4294901760, %v3142_v51  ;;  %3264 = vmatpush.xpose.msrb.mxu2 %v3189_v48 }
 0xd41   : > { %3085 = vmatmul.f32.vlgmr.msrb.gmra.mxu3 %v3008_v52  ;;  %v3009_v7 = vsub.f32 %v3007_v38, %v3008_v52 }
 0xd42   : > { %v3164_v58 = vsub.f32 %v3142_v51, %v3163_v56  ;;  %3192 = vmatpush.xpose.msra.mxu3 %v3191_v53  ;;  %v3294_v51 = vld [vmem:[#allocation4 + $0x18] sm:$0xff] }
 0xd43   : > { %v3010_v59 = vand.u32 4294901760, %v3009_v7 }
 0xd44   : > { %v3165_v60 = vand.u32 4294901760, %v3164_v58 }
 0xd45   : > { %3011 = vmatmul.f32.vlgmr.msrb.gmra.mxu0 %v3010_v59  ;;  %3131 = vmatmul.f32.vlgmr.msra.gmra.mxu1 %v3006_v46 }
 0xd46   : > { %3286 = vmatpush.xpose.msrb.mxu3 %v3161_v39  ;;  %v3166_v61 = vsub.f32 %v3164_v58, %v3165_v60  ;;  %3215 = vmatpush.xpose.msrb.mxu0 %v3188_v42 }
 0xd48   : > { %v3167_v62 = vand.u32 4294901760, %v3166_v61 }
 0xd49   : > { %3194 = vmatmul.f32.vlgmr.msra.gmra.mxu3 %v3163_v56 }
 0xd4a   : > { %3168 = vmatmul.f32.vlgmr.msra.gmra.mxu2 %v3167_v62 }
 0xd4d   : > { %3109 = vmatmul.f32.vlgmr.msra.gmra.mxu0 %v3006_v46  ;;  %3242 = vmatmul.f32.vlgmr.msrb.gmra.mxu1 %v3165_v60  ;;  %v2290_v60 = vld [vmem:[#allocation6] sm:$0xff] }
 0xd51   : > { %3288 = vmatmul.f32.vlgmr.msrb.gmra.mxu3 %v3163_v56 }
 0xd52   : > { %3266 = vmatmul.f32.vlgmr.msrb.gmra.mxu2 %v3163_v56 }
 0xd55   : > { %3218 = vmatmul.f32.vlgmr.msrb.gmra.mxu0 %v3164_v58 }
 0xdae   : > { %v2972_v10 = vpop.xlane.xlu0 %2971 }
 0xdaf   : > { %v2973_v0 = vadd.f32 %v2972_v10, %v2969_v8 }
 0xdb1   : > { %2974 = vst.msk [vmem:[#allocation5 + $0x10] sm:$0xff] %vm2288_vm9, %v2973_v0 }
 0xdb8   : > { %v3534_v37 = vld [vmem:[#allocation5 + $0x10] sm:$0xff] }
 0xdb9   : > { %4137 = vrcp.f32 %v3534_v37  ;;  %v3546_v46 = vand.u32 2147483648, %v3534_v37  ;;  %vm3540_vm11 = vweird.f32 %v3534_v37  ;;  %v3544_v48 = vand.u32 2147483647, %v3534_v37 }
 0xdba   : > { %v3038_v13 = vpop.f32.mrf.mxu1  ;;  %4139 = vpow2.f32 %v2272_v27 }
 0xdbb   : > { %v3547_v28 = vor.u32 1.1754944e-38, %v3546_v46  ;;  %vm3545_vm13 = vcmp.eq.f32.partialorder %v3544_v48, 8.507059e+37  ;;  %v2282_v48 = vld [vmem:[#allocation5] sm:$0xff] }
 0xdbf   : > { %v4138_v39 = vpop.eup %4137 }
 0xdc0   : > { %v3536_v41 = vmul.f32 %v4138_v39, %v3534_v37  ;;  %vm3541_vm10 = vweird.f32 %v4138_v39  ;;  %v4840_v50 = vpop.eup %4139 }
 0xdc1   : > { %vm3542_vm12 = vmor %vm3540_vm11, %vm3541_vm10 }
 0xdc2   : > { %v3012_v14 = vpop.f32.mrf.mxu0  ;;  %v3062_v17 = vpop.f32.mrf.mxu2  ;;  %v3537_v42 = vsub.f32 1.0, %v3536_v41 }
 0xdc3   : > { %v3039_v15 = vadd.f32 %v3038_v13, %v3012_v14  ;;  %v3132_v22 = vpop.f32.mrf.mxu1 }
 0xdc4   : > { %v3086_v18 = vpop.f32.mrf.mxu3  ;;  %v3538_v43 = vmul.f32 %v4138_v39, %v3537_v42  ;;  %v3311_v42 = vld [vmem:[#allocation5 + $0x18] sm:$0xff] }
 0xdc5   : > { %v3063_v19 = vadd.f32 %v3062_v17, %v3039_v15 }
 0xdc6   : > { %v3539_v44 = vadd.f32 %v4138_v39, %v3538_v43 }
 0xdc7   : > { %v3087_v20 = vadd.f32 %v3086_v18, %v3063_v19 }
 0xdc8   : > { %v3543_v38 = vsel %vm3542_vm12, %v4138_v39, %v3539_v44  ;;  %vm3532_vm12 = vcmask 130112  }
 0xdc9   : > { %v3548_v49 = vsel %vm3545_vm13, %v3547_v28, %v3543_v38  ;;  %v2283_v38 = vmul.f32 %v4840_v50, %v2282_v48  ;;  %vm3561_vm13 = vcmask 195712  }
 0xdca   : > { %v3110_v24 = vpop.f32.mrf.mxu0 }
 0xdcb   : > { %v3111_v25 = vadd.f32 %v3110_v24, %v3087_v20  ;;  %v3243_v33 = vpop.f32.mrf.mxu1 }
 0xdcc   : > { %v3195_v47 = vpop.f32.mrf.mxu3 }
 0xdcd   : > { %v3133_v26 = vadd.f32 %v3132_v22, %v3111_v25  ;;  %v3169_v55 = vpop.f32.mrf.mxu2 }
 0xdce   : > { %v3196_v29 = vadd.f32 %v3195_v47, %v3169_v55  ;;  %v2284_v47 = vsel %vm2112_vm6, %v4789_v40, 0.0 }
 0xdd2   : > { %v3219_v31 = vpop.f32.mrf.mxu0 }
 0xdd3   : > { %v3220_v54 = vadd.f32 %v3219_v31, %v3196_v29  ;;  %v2614_v31 = vmul.f32 1.442695, %v2613_v23 }
 0xdd4   : > { %v3289_v9 = vpop.f32.mrf.mxu3 }
 0xdd5   : > { %v3244_v5 = vadd.f32 %v3243_v33, %v3220_v54  ;;  %v3267_v32 = vpop.f32.mrf.mxu2  ;;  %v2625_v33 = vld [vmem:[#allocation5 + $0x8] sm:$0xff] }
 0xdd7   : > { %v3268_v35 = vadd.f32 %v3267_v32, %v3244_v5 }
 0xdd9   : > { %v3290_v12 = vadd.f32 %v3289_v9, %v3268_v35 }
 0xddb   : > { %v3292_v11 = vsel %vm2111_vm8, %v3290_v12, -1e+30 }
 0xddc   : > { %v3295_v36 = vsel %vm2112_vm6, %v3292_v11, -inf }
 0xddd   : > { %3296 = vmax.xlane.f32.xlu1 %v3295_v36 }
 0xdf6   : > { %2979 = vperm.xlu1 %4126, %v4136_v1  }
 0xdfe   : > { %3553 = vperm.xlu1 %4126, %v3548_v49  }
 0xe06   : > { %2293 = vperm.xlu1 %4126, %v4840_v50  }
 0xe50   : > { %v3297_v52 = vpop.xlane.xlu1 %3296 }
 0xe51   : > { %v3298_v53 = vmax.f32 %v3294_v51, %v3297_v52 }
 0xe53   : > { %3480 = vst.msk [vmem:[#allocation4 + $0x18] sm:$0xff] %vm2288_vm9, %v3298_v53  ;;  %3304 = vperm.xlu2 %4127, %v3298_v53   ;;  %v3299_v1 = vsub.f32 %v3294_v51, %v3298_v53 }
 0xe55   : > { %v3300_v4 = vmul.f32 1.442695, %v3299_v1 }
 0xe57   : > { %4141 = vpow2.f32 %v3300_v4 }
 0xe5b   : > { %3326 = vrot.lane.b32.xlu2 %v4759_v57, %s4419_s3  ;;  %v2627_v57 = vsel %vm2112_vm6, %v4813_v30, 0.0 }
 0xe5d   : > { %v4142_v8 = vpop.eup %4141 }
 0xe5e   : > { %v3312_v43 = vmul.f32 %v4142_v8, %v3311_v42 }
 0xe68   : > { %v2980_v3 = vpop.permute.xlu1 %2979 }
 0xe69   : > { %v2982_v34 = vmul.f32 %v2980_v3, %v2976_v6 }
 0xe6b   : > { %v3135_v56 = vadd.f32 %v3133_v26, %v2982_v34 }
 0xe6d   : > { %3136 = vst.msk [vmem:[#allocation6 + $0x10] sm:$0xff] %vm2112_vm6, %v3135_v56 }
 0xe70   : > { %v3554_v7 = vpop.permute.xlu1 %3553 }
 0xe74   : > { %v3550_v58 = vld [vmem:[#allocation6 + $0x10] sm:$0xff] }
 0xe75   : > { %v3556_v59 = vmul.f32 %v3554_v7, %v3550_v58 }
 0xe77   : > { %3558 = vrot.lane.b32.xlu1 %v3556_v59, %s4420_s5 }
 0xe78   : > { %v2294_v61 = vpop.permute.xlu1 %2293 }
 0xe79   : > { %v2296_v62 = vmul.f32 %v2294_v61, %v2290_v60 }
 0xe7b   : > { %v2449_v63 = vadd.f32 %v4793_v2, %v2296_v62 }
 0xe7d   : > { %2450 = vst.msk [vmem:[#allocation6] sm:$0xff] %vm2112_vm6, %v2449_v63  ;;  %v2633_v63 = vld [vmem:[#allocation6 + $0x8] sm:$0xff] }
 0xe84   : > { %2628 = vadd.xlane.f32.xlu2 %v2627_v57 }
 0xe9c   : > { %3322 = vperm.xlu2 %4127, %v4142_v8  }
 0xead   : > { %v3305_v10 = vpop.permute.xlu2 %3304 }
 0xeae   : > { %v3307_v0 = vsub.f32 %v3292_v11, %v3305_v10 }
 0xeb0   : > { %v3308_v13 = vmul.f32 1.442695, %v3307_v0 }
 0xeb2   : > { %4143 = vpow2.f32 %v3308_v13 }
 0xeb3   : > { %4145 = vpow2.f32 %v2614_v31 }
 0xeb5   : > { %v3327_v14 = vpop.permute.xlu2 %3326 }
 0xeb6   : > { %v3347_v15 = vand.u32 4294901760, %v3327_v14 }
 0xeb8   : > { %v4144_v17 = vpop.eup %4143  ;;  %v3374_v18 = vsub.f32 %v3327_v14, %v3347_v15  ;;  %3348 = vmatpush.msra.mxu0 %v3347_v15  ;;  %3424 = vmatpush.msra.mxu3 %v3347_v15  ;;  %v3319_v14 = vld [vmem:[#allocation6 + $0x18] sm:$0xff] }
 0xeb9   : > { %v3313_v2 = vsel %vm2112_vm6, %v4144_v17, 0.0  ;;  %v3330_v30 = vsel %vm2112_vm6, %v4144_v17, 0  ;;  %v4146_v54 = vpop.eup %4145 }
 0xeba   : > { %v3375_v19 = vand.u32 4294901760, %v3374_v18  ;;  %3314 = vadd.xlane.f32.xlu0 %v3313_v2  ;;  %3401 = vmatpush.msra.mxu2 %v3374_v18  ;;  %v3349_v20 = vand.u32 4294901760, %v3330_v30  ;;  %v2626_v5 = vmul.f32 %v4146_v54, %v2625_v33 }
 0xebc   : > { %v3376_v22 = vsub.f32 %v3374_v18, %v3375_v19  ;;  %3450 = vmatpush.msrb.mxu0 %v3375_v19  ;;  %v3350_v24 = vsub.f32 %v3330_v30, %v3349_v20 }
 0xebe   : > { %v3377_v25 = vand.u32 4294901760, %v3376_v22  ;;  %3404 = vmatmul.f32.vlgmr.msra.gmra.mxu2 %v3350_v24  ;;  %v3351_v26 = vand.u32 4294901760, %v3350_v24 }
 0xec0   : > { %3378 = vmatpush.msra.mxu1 %v3377_v25  ;;  %3428 = vmatmul.f32.vlgmr.msra.gmra.mxu3 %v3351_v26  ;;  %v3352_v55 = vsub.f32 %v3350_v24, %v3351_v26 }
 0xec1   : > { %3380 = vmatmul.f32.vlgmr.msra.gmra.mxu1 %v3349_v20 }
 0xec2   : > { %3472 = vmatpush.msrb.mxu1 %v3347_v15  ;;  %2285 = vadd.xlane.f32.xlu0 %v2284_v47  ;;  %v3353_v29 = vand.u32 4294901760, %v3352_v55 }
 0xec4   : > { %3354 = vmatmul.f32.vlgmr.msra.gmra.mxu0 %v3353_v29 }
 0xec9   : > { %3474 = vmatmul.f32.vlgmr.msrb.gmra.mxu1 %v3349_v20 }
 0xecc   : > { %3452 = vmatmul.f32.vlgmr.msrb.gmra.mxu0 %v3349_v20 }
 0xed6   : > { %2636 = vperm.xlu0 %4125, %v4146_v54  }
 0xef7   : > { %v2629_v32 = vpop.xlane.xlu2 %2628 }
 0xef8   : > { %v2630_v35 = vadd.f32 %v2629_v32, %v2626_v5 }
 0xefa   : > { %2631 = vst.msk [vmem:[#allocation5 + $0x8] sm:$0xff] %vm2288_vm9, %v2630_v35 }
 0xeff   : > { %v3323_v15 = vpop.permute.xlu2 %3322 }
 0xf00   : > { %v3325_v26 = vmul.f32 %v3323_v15, %v3319_v14 }
 0xf01   : > { %v3505_v40 = vld [vmem:[#allocation5 + $0x8] sm:$0xff] }
 0xf02   : > { %4147 = vrcp.f32 %v3505_v40  ;;  %v3517_v36 = vand.u32 2147483648, %v3505_v40  ;;  %v3515_v21 = vand.u32 2147483647, %v3505_v40  ;;  %vm3511_vm15 = vweird.f32 %v3505_v40 }
 0xf04   : > { %v3518_v23 = vor.u32 1.1754944e-38, %v3517_v36  ;;  %vm3516_vm1 = vcmp.eq.f32.partialorder %v3515_v21, 8.507059e+37  ;;  %v3559_v21 = vpop.permute.xlu1 %3558 }
 0xf08   : > { %v4148_v9 = vpop.eup %4147 }
 0xf09   : > { %v3507_v12 = vmul.f32 %v4148_v9, %v3505_v40  ;;  %vm3512_vm14 = vweird.f32 %v4148_v9 }
 0xf0a   : > { %vm3513_vm0 = vmor %vm3511_vm15, %vm3512_vm14 }
 0xf0b   : > { %v3508_v11 = vsub.f32 1.0, %v3507_v12  ;;  %v3497_v12 = vld [vmem:[#allocation6] sm:$0xff] }
 0xf0d   : > { %v3509_v37 = vmul.f32 %v4148_v9, %v3508_v11 }
 0xf0f   : > { %v3510_v45 = vadd.f32 %v4148_v9, %v3509_v37 }
 0xf11   : > { %v3514_v39 = vsel %vm3513_vm0, %v4148_v9, %v3510_v45  ;;  %v3596_v45 = vld [vmem:[#allocation14 + $0x18] sm:$0xff] }
 0xf12   : > { %v3519_v41 = vsel %vm3516_vm1, %v3518_v23, %v3514_v39  ;;  %v3616_v23 = vand.u32 4294901760, %v3596_v45  ;;  %v3595_v39 = vld [vmem:[#allocation14 + $0x10] sm:$0xff] }
 0xf13   : > { %3524 = vperm.xlu0 %4125, %v3519_v41   ;;  %v3618_v42 = vand.u32 4294901760, %v3595_v39 }
 0xf14   : > { %v3646_v41 = vsub.f32 %v3596_v45, %v3616_v23  ;;  %3717 = vmatpush.msra.mxu1 %v3616_v23  ;;  %3617 = vmatpush.msrb.mxu2 %v3616_v23 }
 0xf16   : > { %3688 = vmatpush.msra.mxu0 %v3646_v41  ;;  %3719 = vmatpush.msra.mxu1 %v3618_v42 }
 0xf17   : > { %3619 = vmatpush.msrb.mxu2 %v3618_v42 }
 0xf2d   : > { %v3315_v44 = vpop.xlane.xlu0 %3314 }
 0xf2e   : > { %v3316_v46 = vadd.f32 %v3315_v44, %v3312_v43  ;;  %v3594_v43 = vld [vmem:[#allocation14 + $0x8] sm:$0xff]  ;;  %v3647_v44 = vand.u32 4294901760, %v3646_v41 }
 0xf2f   : > { %v3620_v48 = vand.u32 4294901760, %v3594_v43 }
 0xf30   : > { %3317 = vst.msk [vmem:[#allocation5 + $0x18] sm:$0xff] %vm2288_vm9, %v3316_v46  ;;  %v3652_v46 = vsub.f32 %v3595_v39, %v3618_v42 }
 0xf31   : > { %3721 = vmatpush.msra.mxu1 %v3620_v48  ;;  %3621 = vmatpush.msrb.mxu2 %v3620_v48 }
 0xf32   : > { %3691 = vmatpush.msra.mxu0 %v3652_v46 }
 0xf35   : > { %v2286_v27 = vpop.xlane.xlu0 %2285 }
 0xf36   : > { %v2287_v28 = vadd.f32 %v2286_v27, %v2283_v38  ;;  %v3593_v38 = vld [vmem:[#allocation14] sm:$0xff]  ;;  %v3648_v27 = vsub.f32 %v3646_v41, %v3647_v44 }
 0xf37   : > { %v3563_v49 = vld [vmem:[#allocation5 + $0x18] sm:$0xff] }
 0xf38   : > { %2289 = vst.msk [vmem:[#allocation5] sm:$0xff] %vm2288_vm9, %v2287_v28  ;;  %4149 = vrcp.f32 %v3563_v49  ;;  %v3575_v7 = vand.u32 2147483648, %v3563_v49  ;;  %v3573_v60 = vand.u32 2147483647, %v3563_v49  ;;  %vm3569_vm3 = vweird.f32 %v3563_v49 }
 0xf39   : > { %v3653_v28 = vand.u32 4294901760, %v3652_v46 }
 0xf3a   : > { %v3576_v57 = vor.u32 1.1754944e-38, %v3575_v7  ;;  %vm3574_vm7 = vcmp.eq.f32.partialorder %v3573_v60, 8.507059e+37 }
 0xf3e   : > { %v4150_v51 = vpop.eup %4149  ;;  %v3381_v6 = vpop.f32.mrf.mxu1 }
 0xf3f   : > { %v3565_v52 = vmul.f32 %v4150_v51, %v3563_v49  ;;  %v3481_v53 = vld [vmem:[#allocation5] sm:$0xff]  ;;  %vm3570_vm2 = vweird.f32 %v4150_v51  ;;  %v3658_v49 = vsub.f32 %v3594_v43, %v3620_v48 }
 0xf40   : > { %4151 = vrcp.f32 %v3481_v53  ;;  %vm3571_vm4 = vmor %vm3569_vm3, %vm3570_vm2  ;;  %v3493_v19 = vand.u32 2147483648, %v3481_v53  ;;  %v3491_v25 = vand.u32 2147483647, %v3481_v53  ;;  %vm3487_vm9 = vweird.f32 %v3481_v53 }
 0xf41   : > { %v3355_v3 = vpop.f32.mrf.mxu0  ;;  %v3566_v34 = vsub.f32 1.0, %v3565_v52  ;;  %v3405_v58 = vpop.f32.mrf.mxu2  ;;  %v3649_v52 = vand.u32 4294901760, %v3648_v27  ;;  %3694 = vmatpush.msra.mxu0 %v3658_v49 }
 0xf42   : > { %v3382_v56 = vadd.f32 %v3381_v6, %v3355_v3  ;;  %v3494_v31 = vor.u32 1.1754944e-38, %v3493_v19  ;;  %vm3492_vm11 = vcmp.eq.f32.partialorder %v3491_v25, 8.507059e+37  ;;  %v3659_v6 = vand.u32 4294901760, %v3658_v49 }
 0xf43   : > { %v3567_v59 = vmul.f32 %v4150_v51, %v3566_v34  ;;  %v3429_v1 = vpop.f32.mrf.mxu3  ;;  %3650 = vmatpush.msrb.mxu3 %v3649_v52 }
 0xf44   : > { %v3406_v50 = vadd.f32 %v3405_v58, %v3382_v56  ;;  %v3660_v56 = vsub.f32 %v3658_v49, %v3659_v6 }
 0xf45   : > { %v3568_v61 = vadd.f32 %v4150_v51, %v3567_v59 }
 0xf46   : > { %v4152_v62 = vpop.eup %4151  ;;  %v3430_v10 = vadd.f32 %v3429_v1, %v3406_v50  ;;  %v3475_v20 = vpop.f32.mrf.mxu1  ;;  %v3661_v58 = vand.u32 4294901760, %v3660_v56 }
 0xf47   : > { %v3572_v4 = vsel %vm3571_vm4, %v4150_v51, %v3568_v61  ;;  %v3483_v8 = vmul.f32 %v4152_v62, %v3481_v53  ;;  %vm3488_vm8 = vweird.f32 %v4152_v62  ;;  %v3622_v51 = vand.u32 4294901760, %v3593_v38 }
 0xf48   : > { %v2637_v0 = vpop.permute.xlu0 %2636  ;;  %v3577_v13 = vsel %vm3574_vm7, %v3576_v57, %v3572_v4  ;;  %vm3489_vm10 = vmor %vm3487_vm9, %vm3488_vm8  ;;  %v3654_v53 = vsub.f32 %v3652_v46, %v3653_v28 }
 0xf49   : > { %v2639_v17 = vmul.f32 %v2637_v0, %v2633_v63  ;;  %v3453_v18 = vpop.f32.mrf.mxu0  ;;  %3582 = vperm.xlu0 %4125, %v3577_v13   ;;  %v3484_v2 = vsub.f32 1.0, %v3483_v8  ;;  %v3664_v3 = vsub.f32 %v3593_v38, %v3622_v51  ;;  %3723 = vmatpush.msra.mxu1 %v3622_v51 }
 0xf4a   : > { %v3454_v30 = vadd.f32 %v3453_v18, %v3430_v10  ;;  %3623 = vmatpush.msrb.mxu2 %v3622_v51  ;;  %v3655_v34 = vand.u32 4294901760, %v3654_v53  ;;  %v4128_v10 = vld [vmem:[%s4926_s4] ss:$0 sm:$0xff] }
 0xf4b   : > { %v2792_v22 = vadd.f32 %v4819_v16, %v2639_v17  ;;  %v3485_v24 = vmul.f32 %v4152_v62, %v3484_v2  ;;  %v3665_v7 = vand.u32 4294901760, %v3664_v3  ;;  %3697 = vmatpush.msra.mxu0 %v3664_v3 }
 0xf4c   : > { %v3476_v55 = vadd.f32 %v3475_v20, %v3454_v30  ;;  %3746 = vmatpush.msra.mxu2 %v3647_v44  ;;  %3656 = vmatpush.msrb.mxu3 %v3655_v34 }
 0xf4d   : > { %2793 = vst.msk [vmem:[#allocation6 + $0x8] sm:$0xff] %vm2112_vm6, %v2792_v22  ;;  %v3486_v47 = vadd.f32 %v4152_v62, %v3485_v24  ;;  %v3666_v59 = vsub.f32 %v3664_v3, %v3665_v7 }
 0xf4e   : > { %v3478_v29 = vadd.f32 %v3476_v55, %v3325_v26  ;;  %3750 = vmatpush.msra.mxu2 %v3653_v28  ;;  %3662 = vmatpush.msrb.mxu3 %v3661_v58 }
 0xf4f   : > { %v3490_v54 = vsel %vm3489_vm10, %v4152_v62, %v3486_v47  ;;  %v3667_v60 = vand.u32 4294901760, %v3666_v59 }
 0xf50   : > { %3479 = vst.msk [vmem:[#allocation6 + $0x18] sm:$0xff] %vm2112_vm6, %v3478_v29  ;;  %v3495_v33 = vsel %vm3492_vm11, %v3494_v31, %v3490_v54  ;;  %3754 = vmatpush.msra.mxu2 %v3659_v6 }
 0xf51   : > { %3500 = vperm.xlu0 %4125, %v3495_v33   ;;  %3668 = vmatpush.msrb.mxu3 %v3667_v60 }
 0xf52   : > { %3758 = vmatpush.msra.mxu2 %v3665_v7 }
 0xf53   : > { %3777 = vmatpush.msra.mxu3 %v3616_v23 }
 0xf54   : > { %v3521_v5 = vld [vmem:[#allocation6 + $0x8] sm:$0xff] }
 0xf55   : > { %3779 = vmatpush.msra.mxu3 %v3618_v42 }
 0xf57   : > { %v3579_v35 = vld [vmem:[#allocation6 + $0x18] sm:$0xff]  ;;  %3781 = vmatpush.msra.mxu3 %v3620_v48 }
 0xf59   : > { %3783 = vmatpush.msra.mxu3 %v3622_v51 }
 0xf85   : > { %v3525_v16 = vpop.permute.xlu0 %3524 }
 0xf86   : > { %v3527_v32 = vmul.f32 %v3525_v16, %v3521_v5 }
 0xf88   : > { %3529 = vrot.lane.b32.xlu2 %v3527_v32, %s4421_s24 }
 0xfbb   : > { %v3583_v40 = vpop.permute.xlu0 %3582 }
 0xfbc   : > { %v3585_v9 = vmul.f32 %v3583_v40, %v3579_v35 }
 0xfbe   : > { %3587 = vrot.lane.b32.xlu0 %v3585_v9, %s4422_s28 }
 0xfc3   : > { %v3501_v11 = vpop.permute.xlu0 %3500 }
 0xfc4   : > { %v3503_v36 = vmul.f32 %v3501_v11, %v3497_v12 }
 0xfc6   : > { %3504 = vst.msk [vmem:[#allocation7] sm:$0xff] %vm2112_vm6, %v3503_v36  ;;  %vm3590_vm6 = vcmask 261312  }
 0xfe2   : > { %v3530_v37 = vpop.permute.xlu2 %3529 }
 0xfe3   : > { %3533 = vst.msk [vmem:[#allocation7] sm:$0xff] %vm3532_vm12, %v3530_v37 }
 0xfe4   : > { %3562 = vst.msk [vmem:[#allocation7] sm:$0xff] %vm3561_vm13, %v3559_v21 }
0x1030   : > { %v3588_v50 = vpop.permute.xlu0 %3587 }
0x1031   : > { %3591 = vst.msk [vmem:[#allocation7] sm:$0xff] %vm3590_vm6, %v3588_v50 }
0x1038   : > { %v3592_v61 = vld [vmem:[#allocation7] sm:$0xff] }
0x1039   : > { %v3602_v62 = vsel %vm1913_vm5, %v3592_v61, 0 }
0x103a   : > { %v3624_v63 = vand.u32 4294901760, %v3602_v62 }
0x103c   : > { %3670 = vmatmul.f32.vlgmr.msrb.gmra.mxu3 %v3624_v63  ;;  %v3625_v57 = vsub.f32 %v3602_v62, %v3624_v63 }
0x103e   : > { %3700 = vmatmul.f32.vlgmr.msra.gmra.mxu0 %v3625_v57  ;;  %v3626_v1 = vand.u32 4294901760, %v3625_v57 }
0x1040   : > { %3727 = vmatmul.f32.vlgmr.msra.gmra.mxu1 %v3626_v1  ;;  %v3627_v4 = vsub.f32 %v3625_v57, %v3626_v1 }
0x1042   : > { %v3628_v8 = vand.u32 4294901760, %v3627_v4 }
0x1044   : > { %3629 = vmatmul.f32.vlgmr.msrb.gmra.mxu2 %v3628_v8  ;;  %3785 = vmatmul.f32.vlgmr.msra.gmra.mxu3 %v3624_v63 }
0x104c   : > { %3760 = vmatmul.f32.vlgmr.msra.gmra.mxu2 %v3624_v63 }
0x10bb   : > { %v3701_v17 = vpop.f32.mrf.mxu0 }
0x10bd   : > { %v3728_v2 = vpop.f32.mrf.mxu1 }
0x10bf   : > { %v3671_v0 = vpop.f32.mrf.mxu3 }
0x10c7   : > { %v3630_v13 = vpop.f32.mrf.mxu2  ;;  %v3786_v22 = vpop.f32.mrf.mxu3 }
0x10c8   : > { %v3631_v14 = vadd.f32 %v4128_v10, %v3630_v13 }
0x10ca   : > { %v3672_v15 = vadd.f32 %v3671_v0, %v3631_v14 }
0x10cc   : > { %v3702_v18 = vadd.f32 %v3701_v17, %v3672_v15 }
0x10ce   : > { %v3729_v30 = vadd.f32 %v3728_v2, %v3702_v18 }
0x10cf   : > { %v3761_v19 = vpop.f32.mrf.mxu2 }
0x10d0   : > { %v3762_v20 = vadd.f32 %v3761_v19, %v3729_v30 }
0x10d2   : > { %v3787_v24 = vadd.f32 %v3786_v22, %v3762_v20 }
0x10d4   : > { %3789 = vst.msk [vmem:[%s4622_s18] sm:$0xff] %vm1913_vm5, %v3787_v24 }
0x10d5 PF: > { %s3954_s9 = sshll.u32 %s4379_s23, 1  ;;  %s3805_s15 = sshll.u32 %s4622_s18, 4  ;;  %s3806_s15 = int_to_ptr.vmem [resolvable:$true] %s3805_s15 }
0x10d6   : > { %s3801_s14 = sadd.s32 %s4375_s22, %s3954_s9  ;;  %s4960_s13 = sld [smem:[#allocation31_spill]] }
0x10d7   : > { %s3955_s16 = sshll.u32 %s3801_s14, 3  ;;  %s3791_s11 = scalar_lea.sflag [#allocation10], %s4604_s1 }
0x10dc   : > { %s3803_s7 = scalar_lea.hbm %s4960_s13, %s3955_s16  ;;  %s4293_s22 = scalar_lea.hbm %s4960_s13, 32 }
0x10dd   : > { %s3807_s21 = sshll.u32 %s3803_s7, 4  ;;  %s3808_s21 = int_to_ptr.hbm [resolvable:$true] %s3807_s21 }
0x10de   : > { %s4287_s10 = sshra.s32 %s3808_s21, 4  ;;  %s4288_s10 = int_to_ptr.hbm [resolvable:$true] %s4287_s10 }
0x10df   : > { %s4289_s2 = scalar_lea.hbm %s4288_s10, 8  ;;  %p4294_p13 = scmp.lt.s32.totalorder %s4288_s10, %s4960_s13 }
0x10e0   : > { %p4290_p10 = scmp.ne.s32.totalorder %s4288_s10, %s4289_s2  ;;  %p4295_p2 = scmp.lt.s32.totalorder %s4293_s22, %s4289_s2 }
0x10e2   : > { %p4291_p11 = pnand %p4290_p10, %p4572_p0  ;;  %p4296_p4 = por %p4295_p2, %p4294_p13 }
0x10e4   : > { %p4292_p12 = pneg %p4291_p11 }
0x10e6   : > { %p4297_p5 = pnand %p4296_p4, %p4292_p12 }
0x10e8   : > { %4300 = shalt.err (!%p4297_p5)
}
0x10e9   : > { %3972 = dma.vmem_to_hbm [thread:$0]  (%p4572_p0), %s3806_s15, 128, %s3808_s21, %s3791_s11  }
0x10ea PF: > { %s4961_s1 = sld [smem:[#allocation21_spill]]  ;;  %p3999_p7 = scmp.ge.s32.totalorder %s4395_s27, 2 }
0x10ec   : > { %p3989_p8 = pnand %p3999_p7, %p4583_p6 }
0x10ee   : > { %p3990_p3 = pneg %p3989_p8 }
0x10f0   : > { %s3819_s28 = sand.u32 1, %s4961_s1  }
0x10f1   : > { %s3820_s29 = scalar_lea.sflag [#allocation10], %s3819_s28 }
0x10f2   : > { %4354 = dma.done.wait (%p3990_p3), %s3820_s29, 128  }
0x10f3   : > { %4356 = vsyncadd (%p3990_p3), %s3820_s29, 4294967168  ;;  %s23_s27 = sadd.s32 1, %s4395_s27   ;;  %s4963_s21 = sld [smem:[#allocation22_spill]] }
0x10f4   : > { %p20_p1 = scmp.ge.s32.totalorder %s23_s27, 10   ;;  %s4964_s24 = sld [smem:[#allocation23_spill]] }
0x10f5   : > { %s4965_s8 = sld [smem:[#allocation24_spill]]  ;;  %s4967_s18 = smov %s4363_s19 }
0x10f6   : > { %s4966_s6 = sld [smem:[#allocation26_spill]]  ;;  %s4968_s19 = smov %s4367_s20 }
0x10f7   : > { %s4969_s20 = smov %s4592_s17  ;;  %s4970_s22 = smov %s4387_s25 }
0x10f8   : > { %s4971_s23 = smov %s4391_s26  ;;  %22 = sbr.rel (!%p20_p1) target bundleno = 15 (0xf), region = 129 }
0x10fb   : > { %s4972_s25 = smov %s4965_s8 }
0x10fc   : > { %s4973_s26 = smov %s4966_s6 }
0x10fd   :  { %3826 = vsyncpa [#allocation9], 1 }
0x10fe   :  { %3828 = vsyncpa [#allocation9 + $0x1], 1 }
0x10ff   :  { %3829 = vsyncpa [#allocation12], 1 }
0x1100   :  { %3830 = vsyncpa [#allocation15], 1 }
0x1101   :  { %3831 = vsyncpa [#allocation10], 1 }
0x1102   :  { %3833 = vsyncpa [#allocation10 + $0x1], 1 }

</bundles_post_ra>
